<compile_context>
chip_gen: v5e
topology: v5e:2x2
jax: 0.10.0
libtpu: 0.0.40
codegen_flags: <defaults>
</compile_context>

<pallas_src>
import jax
import jax.numpy as jnp
from jax.experimental import pallas as pl
from jax.experimental.pallas import tpu as pltpu

BN_EPS = 1e-5


# ----------------------------------------------------------------------------
# Fused whole-Block kernel
# ----------------------------------------------------------------------------
def make_block_kernel(H, W, wp, hw_p, rows, b_tile):
    """Kernel over `rows` = b_tile * hw_p flattened pixel rows (one grid step)."""
    taps = [(dh, dw) for dh in (-1, 0, 1) for dw in (-1, 0, 1)]   # t = kh*3 + kw
    wp_log2 = wp.bit_length() - 1                                  # wp is pow2

    def kernel(x_ref,
               fc1w_ref, fc1b_ref, fc2w_ref, fc2b_ref,
               bt1w_ref, bt1b_ref, bt2w_ref, bt2b_ref, bt3w_ref, bt3b_ref,
               bns_ref, bnt_ref, o_ref):
        f32, bf16 = jnp.float32, jnp.bfloat16

        x = x_ref[...]                                     # (rows, C) f32
        # TODO(synk): Grapher (graph convolution) source is not part of the
        # provided spec; treated as identity (return_neighbors=False path).
        g = x

        # ---- FFN: 1x1 conv+BN+ReLU, 1x1 conv+BN, + shortcut -----------------
        h = jnp.dot(g.astype(bf16), fc1w_ref[...], preferred_element_type=f32)
        h = jnp.maximum(h + fc1b_ref[...], 0.0)            # (rows, 4C)
        x_ffn = (jnp.dot(h.astype(bf16), fc2w_ref[...], preferred_element_type=f32)
                 + fc2b_ref[...] + g)                      # (rows, C)

        # ---- Bottleneck conv1 (1x1)+bn1+ReLU; width lane-padded to 128 ------
        t1 = jnp.dot(x_ffn.astype(bf16), bt1w_ref[...], preferred_element_type=f32)
        t1 = jnp.maximum(t1 + bt1b_ref[...], 0.0)          # (rows, WPAD)

        # ---- 3x3 conv (pad=1, stride=1) as ONE patch matmul -----------------
        # Taps are circular row rolls (XLU); validity masks from an in-kernel
        # iota using only shift/AND/compare (wp and, when b_tile>1, hw_p are
        # powers of two), so wrapped / cross-image / pad-column rows never
        # contribute.  The im2col patch never leaves VMEM.
        r = jax.lax.broadcasted_iota(jnp.int32, (rows, 1), 0)
        p = r if b_tile == 1 else (r & (hw_p - 1))         # row index inside image
        hh = p >> wp_log2
        ww = p & (wp - 1)
        cols = []
        for (dh, dw) in taps:
            off = dh * wp + dw
            shifted = t1 if off == 0 else pltpu.roll(t1, shift=(-off) % rows, axis=0)
            valid = ((hh + dh >= 0) & (hh + dh < H) &
                     (ww + dw >= 0) & (ww + dw < W))
            cols.append(jnp.where(valid, shifted, 0.0))
        patch = jnp.concatenate(cols, axis=-1)             # (rows, 9*WPAD) f32
        t2 = jnp.dot(patch.astype(bf16), bt2w_ref[...], preferred_element_type=f32)
        t2 = jnp.maximum(t2 + bt2b_ref[...], 0.0)          # (rows, WPAD)

        # ---- conv3(1x1)+bn3 + bottleneck identity + block shortcut + BN -----
        o = jnp.dot(t2.astype(bf16), bt3w_ref[...], preferred_element_type=f32)
        o = o + bt3b_ref[...] + x_ffn + x
        o_ref[...] = (o * bns_ref[...] + bnt_ref[...]).astype(o_ref.dtype)

    return kernel


# ----------------------------------------------------------------------------
# Wrapper
# ----------------------------------------------------------------------------
def block_forward(params, x_nhwc):
    """Block.forward for NHWC input; the whole block is one pallas_call."""
    N, H, W, C = x_nhwc.shape

    # Step / batch tiling: keep >=2 grid steps when possible (both v7x
    # TensorCores busy) and fold several images per step for larger batches
    # (amortizes per-step overhead on single-TC v5e/v6e).
    if N <= 2:
        b_tile = 1
    else:
        b_tile = min(8, pl.cdiv(N, 2))
    steps = pl.cdiv(N, b_tile)
    n_pad = steps * b_tile

    # Power-of-two per-image row stride so the in-kernel tap masks need only
    # shifts / ANDs (no integer div/mod, no mask input).
    wp = max(8, pl.next_power_of_2(W))
    hp = pl.next_power_of_2(H) if b_tile > 1 else H
    hw_p = hp * wp                       # multiple of 8 (wp >= 8)
    rows = b_tile * hw_p

    x = x_nhwc.astype(jnp.float32)
    x = jnp.pad(x, ((0, n_pad - N), (0, hp - H), (0, wp - W), (0, 0)))
    x = x.reshape(n_pad * hw_p, C)

    c4 = params["fc1_w"].shape[1]
    w_pad = params["bt1_w"].shape[1]

    out = pl.pallas_call(
        make_block_kernel(H, W, wp, hw_p, rows, b_tile),
        out_shape=jax.ShapeDtypeStruct((n_pad * hw_p, C), jnp.float32),
        grid=(steps,),
        in_specs=[
            pl.BlockSpec((rows, C), lambda s: (s, 0)),            # x rows
            pl.BlockSpec((C, c4), lambda s: (0, 0)),              # fc1_w
            pl.BlockSpec((1, c4), lambda s: (0, 0)),              # fc1_b
            pl.BlockSpec((c4, C), lambda s: (0, 0)),              # fc2_w
            pl.BlockSpec((1, C), lambda s: (0, 0)),               # fc2_b
            pl.BlockSpec((C, w_pad), lambda s: (0, 0)),           # bt1_w
            pl.BlockSpec((1, w_pad), lambda s: (0, 0)),           # bt1_b
            pl.BlockSpec((9 * w_pad, w_pad), lambda s: (0, 0)),   # bt2_w (patch)
            pl.BlockSpec((1, w_pad), lambda s: (0, 0)),           # bt2_b
            pl.BlockSpec((w_pad, C), lambda s: (0, 0)),           # bt3_w
            pl.BlockSpec((1, C), lambda s: (0, 0)),               # bt3_b
            pl.BlockSpec((1, C), lambda s: (0, 0)),               # bn_scale
            pl.BlockSpec((1, C), lambda s: (0, 0)),               # bn_shift
        ],
        out_specs=pl.BlockSpec((rows, C), lambda s: (s, 0)),
        compiler_params=pltpu.CompilerParams(
            dimension_semantics=("parallel",)),
    )(x,
      params["fc1_w"], params["fc1_b"], params["fc2_w"], params["fc2_b"],
      params["bt1_w"], params["bt1_b"], params["bt2_w"], params["bt2_b"],
      params["bt3_w"], params["bt3_b"], params["bn_scale"], params["bn_shift"])

    return out.reshape(n_pad, hp, wp, C)[:N, :H, :W, :]


def block_forward_nchw(params, x_nchw):
    """PyTorch-layout convenience. In a real model convert to NHWC once at the
    network boundary instead -- each transpose round-trips HBM."""
    x = jnp.transpose(x_nchw, (0, 2, 3, 1))
    return jnp.transpose(block_forward(params, x), (0, 3, 1, 2))


# ----------------------------------------------------------------------------
# Parameters (deterministic synthetic init; BatchNorms folded, inference form)
# ----------------------------------------------------------------------------
def _kaiming(key, fan_in, shape):
    return jax.random.normal(key, shape, jnp.float32) * jnp.sqrt(2.0 / fan_in)


def _fold_bn(w, b, c):
    # PyTorch default BN init: gamma=1, beta=0, running_mean=0, running_var=1.
    gamma = jnp.ones((c,), jnp.float32)
    beta = jnp.zeros((c,), jnp.float32)
    mean = jnp.zeros((c,), jnp.float32)
    var = jnp.ones((c,), jnp.float32)
    scale = gamma * jax.lax.rsqrt(var + BN_EPS)
    return w * scale[None, :], (b - mean) * scale + beta


def init_block_params(key, channels):
    width = channels // 4                     # Bottleneck planes=C//4, base_width=64
    w_pad = ((width + 127) // 128) * 128      # lane-dense bottleneck width
    ks = jax.random.split(key, 5)
    p = {}

    # FFN fc1: Conv2d(C, 4C, 1, bias=True) + BN(4C)
    w, b = _fold_bn(_kaiming(ks[0], channels, (channels, 4 * channels)),
                    jnp.zeros((4 * channels,), jnp.float32), 4 * channels)
    p["fc1_w"], p["fc1_b"] = w.astype(jnp.bfloat16), b.reshape(1, -1)
    # FFN fc2: Conv2d(4C, C, 1, bias=True) + BN(C)
    w, b = _fold_bn(_kaiming(ks[1], 4 * channels, (4 * channels, channels)),
                    jnp.zeros((channels,), jnp.float32), channels)
    p["fc2_w"], p["fc2_b"] = w.astype(jnp.bfloat16), b.reshape(1, -1)

    # Bottleneck conv1 (1x1, bias=False) + bn1 -- zero-pad width -> w_pad lanes.
    w, b = _fold_bn(_kaiming(ks[2], channels, (channels, width)),
                    jnp.zeros((width,), jnp.float32), width)
    p["bt1_w"] = jnp.pad(w, ((0, 0), (0, w_pad - width))).astype(jnp.bfloat16)
    p["bt1_b"] = jnp.pad(b, (0, w_pad - width)).reshape(1, -1)

    # Bottleneck conv2 (3x3, bias=False) + bn2.  Generated in the PyTorch
    # (Cout, Cin, KH, KW) layout, re-laid-out to one matmul-ready
    # (9*w_pad, w_pad) matrix in the kernel's tap/patch order.
    wt = _kaiming(ks[3], 9 * width, (width, width, 3, 3))
    w = jnp.transpose(wt, (2, 3, 1, 0)).reshape(9 * width, width)   # (kh,kw,ci,co)
    w, b = _fold_bn(w, jnp.zeros((width,), jnp.float32), width)
    w = w.reshape(9, width, width)
    w = jnp.pad(w, ((0, 0), (0, w_pad - width), (0, w_pad - width)))
    p["bt2_w"] = w.reshape(9 * w_pad, w_pad).astype(jnp.bfloat16)
    p["bt2_b"] = jnp.pad(b, (0, w_pad - width)).reshape(1, -1)

    # Bottleneck conv3 (1x1, bias=False) + bn3
    w, b = _fold_bn(_kaiming(ks[4], width, (width, channels)),
                    jnp.zeros((channels,), jnp.float32), channels)
    p["bt3_w"] = jnp.pad(w, ((0, w_pad - width), (0, 0))).astype(jnp.bfloat16)
    p["bt3_b"] = b.reshape(1, -1)

    # Block trailing BatchNorm (affine applied after the residual sum)
    gamma = jnp.ones((channels,), jnp.float32)
    beta = jnp.zeros((channels,), jnp.float32)
    mean = jnp.zeros((channels,), jnp.float32)
    var = jnp.ones((channels,), jnp.float32)
    scale = gamma * jax.lax.rsqrt(var + BN_EPS)
    p["bn_scale"] = scale.reshape(1, -1)
    p["bn_shift"] = (beta - mean * scale).reshape(1, -1)
    return p


# ----------------------------------------------------------------------------
# Pure-JAX reference (NHWC).  It mirrors the kernel's bf16-input / f32-accum
# matmul policy so the comparison tolerance can be tight.
# ----------------------------------------------------------------------------
def block_reference(params, x_nhwc):
    f32, bf16 = jnp.float32, jnp.bfloat16
    C = x_nhwc.shape[-1]
    width = C // 4
    w_pad = params["bt1_w"].shape[1]

    def mm(a, w, b):
        y = jnp.einsum("nhwc,cd->nhwd", a.astype(bf16), w.astype(bf16),
                       preferred_element_type=f32)
        return y + b.reshape(-1).astype(f32)

    x = x_nhwc.astype(f32)
    g = x                                                   # Grapher identity
    h = jax.nn.relu(mm(g, params["fc1_w"], params["fc1_b"]))
    x_ffn = mm(h, params["fc2_w"], params["fc2_b"]) + g

    t1 = jax.nn.relu(mm(x_ffn, params["bt1_w"][:, :width],
                        params["bt1_b"][:, :width]))
    w2 = params["bt2_w"].reshape(9, w_pad, w_pad)[:, :width, :width]
    w2 = w2.reshape(3, 3, width, width)                     # HWIO
    t2 = jax.lax.conv_general_dilated(
        t1.astype(bf16), w2.astype(bf16), window_strides=(1, 1), padding="SAME",
        dimension_numbers=("NHWC", "HWIO", "NHWC"),
        preferred_element_type=f32)
    t2 = jax.nn.relu(t2 + params["bt2_b"][:, :width].reshape(-1))

    o = mm(t2, params["bt3_w"][:width, :], params["bt3_b"]) + x_ffn + x
    o = o * params["bn_scale"].reshape(-1) + params["bn_shift"].reshape(-1)
    return o


if __name__ == "__main__":
    key = jax.random.PRNGKey(0)
    kp, kx = jax.random.split(key)

    # Block default n=196 -> 14x14 grid; NHWC at the model boundary (see note
    # in block_forward_nchw about the PyTorch NCHW layout).
    N, H, W, C = 2, 14, 14, 32
    params = init_block_params(kp, C)
    x = jax.random.normal(kx, (N, H, W, C), jnp.float32)

    out = jax.block_until_ready(jax.jit(block_forward)(params, x))

    assert out.shape == (N, H, W, C)
    assert bool(jnp.all(jnp.isfinite(out)))

    ref = block_reference(params, x)
    maxdiff = float(jnp.max(jnp.abs(out - ref)))
    assert maxdiff < 2e-2, f"mismatch vs reference: {maxdiff}"

    print("KERNEL_OK")
</pallas_src>

<mosaic_0001>
module attributes {stable_mosaic.version = 11 : i64} {
  func.func @kernel(%arg0: i32, %arg1: memref<224x32xf32, #tpu.memory_space<vmem>>, %arg2: memref<32x128xbf16, #tpu.memory_space<vmem>>, %arg3: memref<1x128xf32, #tpu.memory_space<vmem>>, %arg4: memref<128x32xbf16, #tpu.memory_space<vmem>>, %arg5: memref<1x32xf32, #tpu.memory_space<vmem>>, %arg6: memref<32x128xbf16, #tpu.memory_space<vmem>>, %arg7: memref<1x128xf32, #tpu.memory_space<vmem>>, %arg8: memref<1152x128xbf16, #tpu.memory_space<vmem>>, %arg9: memref<1x128xf32, #tpu.memory_space<vmem>>, %arg10: memref<128x32xbf16, #tpu.memory_space<vmem>>, %arg11: memref<1x32xf32, #tpu.memory_space<vmem>>, %arg12: memref<1x32xf32, #tpu.memory_space<vmem>>, %arg13: memref<1x32xf32, #tpu.memory_space<vmem>>, %arg14: memref<224x32xf32, #tpu.memory_space<vmem>>) attributes {dimension_semantics = [#tpu.dimension_semantics<parallel>], iteration_bounds = array<i64: 2>, scalar_prefetch = 0 : i64, scratch_operands = 0 : i64, tpu.core_type = #tpu.core_type<tc>, window_params = [{transform_indices = @transform_0, window_bounds = array<i64: 224, 32>}, {pipeline_mode = #tpu.pipeline_mode<synchronous>, transform_indices = @transform_1, window_bounds = array<i64: 32, 128>}, {pipeline_mode = #tpu.pipeline_mode<synchronous>, transform_indices = @transform_2, window_bounds = array<i64: 1, 128>}, {pipeline_mode = #tpu.pipeline_mode<synchronous>, transform_indices = @transform_3, window_bounds = array<i64: 128, 32>}, {pipeline_mode = #tpu.pipeline_mode<synchronous>, transform_indices = @transform_4, window_bounds = array<i64: 1, 32>}, {pipeline_mode = #tpu.pipeline_mode<synchronous>, transform_indices = @transform_5, window_bounds = array<i64: 32, 128>}, {pipeline_mode = #tpu.pipeline_mode<synchronous>, transform_indices = @transform_6, window_bounds = array<i64: 1, 128>}, {pipeline_mode = #tpu.pipeline_mode<synchronous>, transform_indices = @transform_7, window_bounds = array<i64: 1152, 128>}, {pipeline_mode = #tpu.pipeline_mode<synchronous>, transform_indices = @transform_8, window_bounds = array<i64: 1, 128>}, {pipeline_mode = #tpu.pipeline_mode<synchronous>, transform_indices = @transform_9, window_bounds = array<i64: 128, 32>}, {pipeline_mode = #tpu.pipeline_mode<synchronous>, transform_indices = @transform_10, window_bounds = array<i64: 1, 32>}, {pipeline_mode = #tpu.pipeline_mode<synchronous>, transform_indices = @transform_11, window_bounds = array<i64: 1, 32>}, {pipeline_mode = #tpu.pipeline_mode<synchronous>, transform_indices = @transform_12, window_bounds = array<i64: 1, 32>}, {transform_indices = @transform_13, window_bounds = array<i64: 224, 32>}]} {
    %c0 = arith.constant 0 : index
    %c0_0 = arith.constant 0 : index
    %0 = vector.load %arg1[%c0, %c0_0] : memref<224x32xf32, #tpu.memory_space<vmem>>, vector<224x32xf32>
    %1 = arith.truncf %0 : vector<224x32xf32> to vector<224x32xbf16>
    %c0_1 = arith.constant 0 : index
    %c0_2 = arith.constant 0 : index
    %2 = vector.load %arg2[%c0_1, %c0_2] : memref<32x128xbf16, #tpu.memory_space<vmem>>, vector<32x128xbf16>
    %cst = arith.constant dense<0.000000e+00> : vector<224x128xf32>
    %3 = tpu.matmul %1, %2, %cst {dimension_numbers = #tpu.dot_dimension_numbers<[1], [0], [0], [1], [0, 0, 1, 1], [], []>} : vector<224x32xbf16>, vector<32x128xbf16>, vector<224x128xf32> -> vector<224x128xf32>
    %c0_3 = arith.constant 0 : index
    %c0_4 = arith.constant 0 : index
    %4 = vector.load %arg3[%c0_3, %c0_4] : memref<1x128xf32, #tpu.memory_space<vmem>>, vector<1x128xf32>
    %5 = vector.broadcast %4 : vector<1x128xf32> to vector<224x128xf32>
    %6 = arith.addf %3, %5 : vector<224x128xf32>
    %cst_5 = arith.constant 0.000000e+00 : f32
    %7 = vector.broadcast %cst_5 : f32 to vector<224x128xf32>
    %8 = arith.maximumf %6, %7 : vector<224x128xf32>
    %9 = arith.truncf %8 : vector<224x128xf32> to vector<224x128xbf16>
    %c0_6 = arith.constant 0 : index
    %c0_7 = arith.constant 0 : index
    %10 = vector.load %arg4[%c0_6, %c0_7] : memref<128x32xbf16, #tpu.memory_space<vmem>>, vector<128x32xbf16>
    %cst_8 = arith.constant dense<0.000000e+00> : vector<224x32xf32>
    %11 = tpu.matmul %9, %10, %cst_8 {dimension_numbers = #tpu.dot_dimension_numbers<[1], [0], [0], [1], [0, 0, 1, 1], [], []>} : vector<224x128xbf16>, vector<128x32xbf16>, vector<224x32xf32> -> vector<224x32xf32>
    %c0_9 = arith.constant 0 : index
    %c0_10 = arith.constant 0 : index
    %12 = vector.load %arg5[%c0_9, %c0_10] : memref<1x32xf32, #tpu.memory_space<vmem>>, vector<1x32xf32>
    %13 = vector.broadcast %12 : vector<1x32xf32> to vector<224x32xf32>
    %14 = arith.addf %11, %13 : vector<224x32xf32>
    %15 = arith.addf %14, %0 : vector<224x32xf32>
    %16 = arith.truncf %15 : vector<224x32xf32> to vector<224x32xbf16>
    %c0_11 = arith.constant 0 : index
    %c0_12 = arith.constant 0 : index
    %17 = vector.load %arg6[%c0_11, %c0_12] : memref<32x128xbf16, #tpu.memory_space<vmem>>, vector<32x128xbf16>
    %cst_13 = arith.constant dense<0.000000e+00> : vector<224x128xf32>
    %18 = tpu.matmul %16, %17, %cst_13 {dimension_numbers = #tpu.dot_dimension_numbers<[1], [0], [0], [1], [0, 0, 1, 1], [], []>} : vector<224x32xbf16>, vector<32x128xbf16>, vector<224x128xf32> -> vector<224x128xf32>
    %c0_14 = arith.constant 0 : index
    %c0_15 = arith.constant 0 : index
    %19 = vector.load %arg7[%c0_14, %c0_15] : memref<1x128xf32, #tpu.memory_space<vmem>>, vector<1x128xf32>
    %20 = vector.broadcast %19 : vector<1x128xf32> to vector<224x128xf32>
    %21 = arith.addf %18, %20 : vector<224x128xf32>
    %cst_16 = arith.constant 0.000000e+00 : f32
    %22 = vector.broadcast %cst_16 : f32 to vector<224x128xf32>
    %23 = arith.maximumf %21, %22 : vector<224x128xf32>
    %24 = tpu.iota {dimensions = array<i32: 0>} : vector<224x1xi32>
    %c4_i32 = arith.constant 4 : i32
    %25 = vector.broadcast %c4_i32 : i32 to vector<224x1xi32>
    %26 = arith.shrsi %24, %25 : vector<224x1xi32>
    %c15_i32 = arith.constant 15 : i32
    %27 = vector.broadcast %c15_i32 : i32 to vector<224x1xi32>
    %28 = arith.andi %24, %27 : vector<224x1xi32>
    %c17_i32 = arith.constant 17 : i32
    %29 = tpu.dynamic_rotate %23 by %c17_i32 dim 0 : vector<224x128xf32>, i32 -> vector<224x128xf32>
    %c-1_i32 = arith.constant -1 : i32
    %30 = vector.broadcast %c-1_i32 : i32 to vector<224x1xi32>
    %31 = arith.addi %26, %30 : vector<224x1xi32>
    %c0_i32 = arith.constant 0 : i32
    %32 = vector.broadcast %c0_i32 : i32 to vector<224x1xi32>
    %33 = arith.cmpi sge, %31, %32 : vector<224x1xi32>
    %c-1_i32_17 = arith.constant -1 : i32
    %34 = vector.broadcast %c-1_i32_17 : i32 to vector<224x1xi32>
    %35 = arith.addi %26, %34 : vector<224x1xi32>
    %c14_i32 = arith.constant 14 : i32
    %36 = vector.broadcast %c14_i32 : i32 to vector<224x1xi32>
    %37 = arith.cmpi slt, %35, %36 : vector<224x1xi32>
    %38 = arith.andi %33, %37 : vector<224x1xi1>
    %c-1_i32_18 = arith.constant -1 : i32
    %39 = vector.broadcast %c-1_i32_18 : i32 to vector<224x1xi32>
    %40 = arith.addi %28, %39 : vector<224x1xi32>
    %c0_i32_19 = arith.constant 0 : i32
    %41 = vector.broadcast %c0_i32_19 : i32 to vector<224x1xi32>
    %42 = arith.cmpi sge, %40, %41 : vector<224x1xi32>
    %43 = arith.andi %38, %42 : vector<224x1xi1>
    %c-1_i32_20 = arith.constant -1 : i32
    %44 = vector.broadcast %c-1_i32_20 : i32 to vector<224x1xi32>
    %45 = arith.addi %28, %44 : vector<224x1xi32>
    %c14_i32_21 = arith.constant 14 : i32
    %46 = vector.broadcast %c14_i32_21 : i32 to vector<224x1xi32>
    %47 = arith.cmpi slt, %45, %46 : vector<224x1xi32>
    %48 = arith.andi %43, %47 : vector<224x1xi1>
    %cst_22 = arith.constant 0.000000e+00 : f32
    %49 = vector.shape_cast %48 : vector<224x1xi1> to vector<224x1xi1>
    %50 = vector.broadcast %49 : vector<224x1xi1> to vector<224x128xi1>
    %51 = vector.broadcast %cst_22 : f32 to vector<224x128xf32>
    %52 = arith.select %50, %29, %51 : vector<224x128xi1>, vector<224x128xf32>
    %c16_i32 = arith.constant 16 : i32
    %53 = tpu.dynamic_rotate %23 by %c16_i32 dim 0 : vector<224x128xf32>, i32 -> vector<224x128xf32>
    %c-1_i32_23 = arith.constant -1 : i32
    %54 = vector.broadcast %c-1_i32_23 : i32 to vector<224x1xi32>
    %55 = arith.addi %26, %54 : vector<224x1xi32>
    %c0_i32_24 = arith.constant 0 : i32
    %56 = vector.broadcast %c0_i32_24 : i32 to vector<224x1xi32>
    %57 = arith.cmpi sge, %55, %56 : vector<224x1xi32>
    %c-1_i32_25 = arith.constant -1 : i32
    %58 = vector.broadcast %c-1_i32_25 : i32 to vector<224x1xi32>
    %59 = arith.addi %26, %58 : vector<224x1xi32>
    %c14_i32_26 = arith.constant 14 : i32
    %60 = vector.broadcast %c14_i32_26 : i32 to vector<224x1xi32>
    %61 = arith.cmpi slt, %59, %60 : vector<224x1xi32>
    %62 = arith.andi %57, %61 : vector<224x1xi1>
    %c0_i32_27 = arith.constant 0 : i32
    %63 = vector.broadcast %c0_i32_27 : i32 to vector<224x1xi32>
    %64 = arith.addi %28, %63 : vector<224x1xi32>
    %c0_i32_28 = arith.constant 0 : i32
    %65 = vector.broadcast %c0_i32_28 : i32 to vector<224x1xi32>
    %66 = arith.cmpi sge, %64, %65 : vector<224x1xi32>
    %67 = arith.andi %62, %66 : vector<224x1xi1>
    %c0_i32_29 = arith.constant 0 : i32
    %68 = vector.broadcast %c0_i32_29 : i32 to vector<224x1xi32>
    %69 = arith.addi %28, %68 : vector<224x1xi32>
    %c14_i32_30 = arith.constant 14 : i32
    %70 = vector.broadcast %c14_i32_30 : i32 to vector<224x1xi32>
    %71 = arith.cmpi slt, %69, %70 : vector<224x1xi32>
    %72 = arith.andi %67, %71 : vector<224x1xi1>
    %cst_31 = arith.constant 0.000000e+00 : f32
    %73 = vector.shape_cast %72 : vector<224x1xi1> to vector<224x1xi1>
    %74 = vector.broadcast %73 : vector<224x1xi1> to vector<224x128xi1>
    %75 = vector.broadcast %cst_31 : f32 to vector<224x128xf32>
    %76 = arith.select %74, %53, %75 : vector<224x128xi1>, vector<224x128xf32>
    %c15_i32_32 = arith.constant 15 : i32
    %77 = tpu.dynamic_rotate %23 by %c15_i32_32 dim 0 : vector<224x128xf32>, i32 -> vector<224x128xf32>
    %c-1_i32_33 = arith.constant -1 : i32
    %78 = vector.broadcast %c-1_i32_33 : i32 to vector<224x1xi32>
    %79 = arith.addi %26, %78 : vector<224x1xi32>
    %c0_i32_34 = arith.constant 0 : i32
    %80 = vector.broadcast %c0_i32_34 : i32 to vector<224x1xi32>
    %81 = arith.cmpi sge, %79, %80 : vector<224x1xi32>
    %c-1_i32_35 = arith.constant -1 : i32
    %82 = vector.broadcast %c-1_i32_35 : i32 to vector<224x1xi32>
    %83 = arith.addi %26, %82 : vector<224x1xi32>
    %c14_i32_36 = arith.constant 14 : i32
    %84 = vector.broadcast %c14_i32_36 : i32 to vector<224x1xi32>
    %85 = arith.cmpi slt, %83, %84 : vector<224x1xi32>
    %86 = arith.andi %81, %85 : vector<224x1xi1>
    %c1_i32 = arith.constant 1 : i32
    %87 = vector.broadcast %c1_i32 : i32 to vector<224x1xi32>
    %88 = arith.addi %28, %87 : vector<224x1xi32>
    %c0_i32_37 = arith.constant 0 : i32
    %89 = vector.broadcast %c0_i32_37 : i32 to vector<224x1xi32>
    %90 = arith.cmpi sge, %88, %89 : vector<224x1xi32>
    %91 = arith.andi %86, %90 : vector<224x1xi1>
    %c1_i32_38 = arith.constant 1 : i32
    %92 = vector.broadcast %c1_i32_38 : i32 to vector<224x1xi32>
    %93 = arith.addi %28, %92 : vector<224x1xi32>
    %c14_i32_39 = arith.constant 14 : i32
    %94 = vector.broadcast %c14_i32_39 : i32 to vector<224x1xi32>
    %95 = arith.cmpi slt, %93, %94 : vector<224x1xi32>
    %96 = arith.andi %91, %95 : vector<224x1xi1>
    %cst_40 = arith.constant 0.000000e+00 : f32
    %97 = vector.shape_cast %96 : vector<224x1xi1> to vector<224x1xi1>
    %98 = vector.broadcast %97 : vector<224x1xi1> to vector<224x128xi1>
    %99 = vector.broadcast %cst_40 : f32 to vector<224x128xf32>
    %100 = arith.select %98, %77, %99 : vector<224x128xi1>, vector<224x128xf32>
    %c1_i32_41 = arith.constant 1 : i32
    %101 = tpu.dynamic_rotate %23 by %c1_i32_41 dim 0 : vector<224x128xf32>, i32 -> vector<224x128xf32>
    %c0_i32_42 = arith.constant 0 : i32
    %102 = vector.broadcast %c0_i32_42 : i32 to vector<224x1xi32>
    %103 = arith.addi %26, %102 : vector<224x1xi32>
    %c0_i32_43 = arith.constant 0 : i32
    %104 = vector.broadcast %c0_i32_43 : i32 to vector<224x1xi32>
    %105 = arith.cmpi sge, %103, %104 : vector<224x1xi32>
    %c0_i32_44 = arith.constant 0 : i32
    %106 = vector.broadcast %c0_i32_44 : i32 to vector<224x1xi32>
    %107 = arith.addi %26, %106 : vector<224x1xi32>
    %c14_i32_45 = arith.constant 14 : i32
    %108 = vector.broadcast %c14_i32_45 : i32 to vector<224x1xi32>
    %109 = arith.cmpi slt, %107, %108 : vector<224x1xi32>
    %110 = arith.andi %105, %109 : vector<224x1xi1>
    %c-1_i32_46 = arith.constant -1 : i32
    %111 = vector.broadcast %c-1_i32_46 : i32 to vector<224x1xi32>
    %112 = arith.addi %28, %111 : vector<224x1xi32>
    %c0_i32_47 = arith.constant 0 : i32
    %113 = vector.broadcast %c0_i32_47 : i32 to vector<224x1xi32>
    %114 = arith.cmpi sge, %112, %113 : vector<224x1xi32>
    %115 = arith.andi %110, %114 : vector<224x1xi1>
    %c-1_i32_48 = arith.constant -1 : i32
    %116 = vector.broadcast %c-1_i32_48 : i32 to vector<224x1xi32>
    %117 = arith.addi %28, %116 : vector<224x1xi32>
    %c14_i32_49 = arith.constant 14 : i32
    %118 = vector.broadcast %c14_i32_49 : i32 to vector<224x1xi32>
    %119 = arith.cmpi slt, %117, %118 : vector<224x1xi32>
    %120 = arith.andi %115, %119 : vector<224x1xi1>
    %cst_50 = arith.constant 0.000000e+00 : f32
    %121 = vector.shape_cast %120 : vector<224x1xi1> to vector<224x1xi1>
    %122 = vector.broadcast %121 : vector<224x1xi1> to vector<224x128xi1>
    %123 = vector.broadcast %cst_50 : f32 to vector<224x128xf32>
    %124 = arith.select %122, %101, %123 : vector<224x128xi1>, vector<224x128xf32>
    %c0_i32_51 = arith.constant 0 : i32
    %125 = vector.broadcast %c0_i32_51 : i32 to vector<224x1xi32>
    %126 = arith.addi %26, %125 : vector<224x1xi32>
    %c0_i32_52 = arith.constant 0 : i32
    %127 = vector.broadcast %c0_i32_52 : i32 to vector<224x1xi32>
    %128 = arith.cmpi sge, %126, %127 : vector<224x1xi32>
    %c0_i32_53 = arith.constant 0 : i32
    %129 = vector.broadcast %c0_i32_53 : i32 to vector<224x1xi32>
    %130 = arith.addi %26, %129 : vector<224x1xi32>
    %c14_i32_54 = arith.constant 14 : i32
    %131 = vector.broadcast %c14_i32_54 : i32 to vector<224x1xi32>
    %132 = arith.cmpi slt, %130, %131 : vector<224x1xi32>
    %133 = arith.andi %128, %132 : vector<224x1xi1>
    %c0_i32_55 = arith.constant 0 : i32
    %134 = vector.broadcast %c0_i32_55 : i32 to vector<224x1xi32>
    %135 = arith.addi %28, %134 : vector<224x1xi32>
    %c0_i32_56 = arith.constant 0 : i32
    %136 = vector.broadcast %c0_i32_56 : i32 to vector<224x1xi32>
    %137 = arith.cmpi sge, %135, %136 : vector<224x1xi32>
    %138 = arith.andi %133, %137 : vector<224x1xi1>
    %c0_i32_57 = arith.constant 0 : i32
    %139 = vector.broadcast %c0_i32_57 : i32 to vector<224x1xi32>
    %140 = arith.addi %28, %139 : vector<224x1xi32>
    %c14_i32_58 = arith.constant 14 : i32
    %141 = vector.broadcast %c14_i32_58 : i32 to vector<224x1xi32>
    %142 = arith.cmpi slt, %140, %141 : vector<224x1xi32>
    %143 = arith.andi %138, %142 : vector<224x1xi1>
    %cst_59 = arith.constant 0.000000e+00 : f32
    %144 = vector.shape_cast %143 : vector<224x1xi1> to vector<224x1xi1>
    %145 = vector.broadcast %144 : vector<224x1xi1> to vector<224x128xi1>
    %146 = vector.broadcast %cst_59 : f32 to vector<224x128xf32>
    %147 = arith.select %145, %23, %146 : vector<224x128xi1>, vector<224x128xf32>
    %c223_i32 = arith.constant 223 : i32
    %148 = tpu.dynamic_rotate %23 by %c223_i32 dim 0 : vector<224x128xf32>, i32 -> vector<224x128xf32>
    %c0_i32_60 = arith.constant 0 : i32
    %149 = vector.broadcast %c0_i32_60 : i32 to vector<224x1xi32>
    %150 = arith.addi %26, %149 : vector<224x1xi32>
    %c0_i32_61 = arith.constant 0 : i32
    %151 = vector.broadcast %c0_i32_61 : i32 to vector<224x1xi32>
    %152 = arith.cmpi sge, %150, %151 : vector<224x1xi32>
    %c0_i32_62 = arith.constant 0 : i32
    %153 = vector.broadcast %c0_i32_62 : i32 to vector<224x1xi32>
    %154 = arith.addi %26, %153 : vector<224x1xi32>
    %c14_i32_63 = arith.constant 14 : i32
    %155 = vector.broadcast %c14_i32_63 : i32 to vector<224x1xi32>
    %156 = arith.cmpi slt, %154, %155 : vector<224x1xi32>
    %157 = arith.andi %152, %156 : vector<224x1xi1>
    %c1_i32_64 = arith.constant 1 : i32
    %158 = vector.broadcast %c1_i32_64 : i32 to vector<224x1xi32>
    %159 = arith.addi %28, %158 : vector<224x1xi32>
    %c0_i32_65 = arith.constant 0 : i32
    %160 = vector.broadcast %c0_i32_65 : i32 to vector<224x1xi32>
    %161 = arith.cmpi sge, %159, %160 : vector<224x1xi32>
    %162 = arith.andi %157, %161 : vector<224x1xi1>
    %c1_i32_66 = arith.constant 1 : i32
    %163 = vector.broadcast %c1_i32_66 : i32 to vector<224x1xi32>
    %164 = arith.addi %28, %163 : vector<224x1xi32>
    %c14_i32_67 = arith.constant 14 : i32
    %165 = vector.broadcast %c14_i32_67 : i32 to vector<224x1xi32>
    %166 = arith.cmpi slt, %164, %165 : vector<224x1xi32>
    %167 = arith.andi %162, %166 : vector<224x1xi1>
    %cst_68 = arith.constant 0.000000e+00 : f32
    %168 = vector.shape_cast %167 : vector<224x1xi1> to vector<224x1xi1>
    %169 = vector.broadcast %168 : vector<224x1xi1> to vector<224x128xi1>
    %170 = vector.broadcast %cst_68 : f32 to vector<224x128xf32>
    %171 = arith.select %169, %148, %170 : vector<224x128xi1>, vector<224x128xf32>
    %c209_i32 = arith.constant 209 : i32
    %172 = tpu.dynamic_rotate %23 by %c209_i32 dim 0 : vector<224x128xf32>, i32 -> vector<224x128xf32>
    %c1_i32_69 = arith.constant 1 : i32
    %173 = vector.broadcast %c1_i32_69 : i32 to vector<224x1xi32>
    %174 = arith.addi %26, %173 : vector<224x1xi32>
    %c0_i32_70 = arith.constant 0 : i32
    %175 = vector.broadcast %c0_i32_70 : i32 to vector<224x1xi32>
    %176 = arith.cmpi sge, %174, %175 : vector<224x1xi32>
    %c1_i32_71 = arith.constant 1 : i32
    %177 = vector.broadcast %c1_i32_71 : i32 to vector<224x1xi32>
    %178 = arith.addi %26, %177 : vector<224x1xi32>
    %c14_i32_72 = arith.constant 14 : i32
    %179 = vector.broadcast %c14_i32_72 : i32 to vector<224x1xi32>
    %180 = arith.cmpi slt, %178, %179 : vector<224x1xi32>
    %181 = arith.andi %176, %180 : vector<224x1xi1>
    %c-1_i32_73 = arith.constant -1 : i32
    %182 = vector.broadcast %c-1_i32_73 : i32 to vector<224x1xi32>
    %183 = arith.addi %28, %182 : vector<224x1xi32>
    %c0_i32_74 = arith.constant 0 : i32
    %184 = vector.broadcast %c0_i32_74 : i32 to vector<224x1xi32>
    %185 = arith.cmpi sge, %183, %184 : vector<224x1xi32>
    %186 = arith.andi %181, %185 : vector<224x1xi1>
    %c-1_i32_75 = arith.constant -1 : i32
    %187 = vector.broadcast %c-1_i32_75 : i32 to vector<224x1xi32>
    %188 = arith.addi %28, %187 : vector<224x1xi32>
    %c14_i32_76 = arith.constant 14 : i32
    %189 = vector.broadcast %c14_i32_76 : i32 to vector<224x1xi32>
    %190 = arith.cmpi slt, %188, %189 : vector<224x1xi32>
    %191 = arith.andi %186, %190 : vector<224x1xi1>
    %cst_77 = arith.constant 0.000000e+00 : f32
    %192 = vector.shape_cast %191 : vector<224x1xi1> to vector<224x1xi1>
    %193 = vector.broadcast %192 : vector<224x1xi1> to vector<224x128xi1>
    %194 = vector.broadcast %cst_77 : f32 to vector<224x128xf32>
    %195 = arith.select %193, %172, %194 : vector<224x128xi1>, vector<224x128xf32>
    %c208_i32 = arith.constant 208 : i32
    %196 = tpu.dynamic_rotate %23 by %c208_i32 dim 0 : vector<224x128xf32>, i32 -> vector<224x128xf32>
    %c1_i32_78 = arith.constant 1 : i32
    %197 = vector.broadcast %c1_i32_78 : i32 to vector<224x1xi32>
    %198 = arith.addi %26, %197 : vector<224x1xi32>
    %c0_i32_79 = arith.constant 0 : i32
    %199 = vector.broadcast %c0_i32_79 : i32 to vector<224x1xi32>
    %200 = arith.cmpi sge, %198, %199 : vector<224x1xi32>
    %c1_i32_80 = arith.constant 1 : i32
    %201 = vector.broadcast %c1_i32_80 : i32 to vector<224x1xi32>
    %202 = arith.addi %26, %201 : vector<224x1xi32>
    %c14_i32_81 = arith.constant 14 : i32
    %203 = vector.broadcast %c14_i32_81 : i32 to vector<224x1xi32>
    %204 = arith.cmpi slt, %202, %203 : vector<224x1xi32>
    %205 = arith.andi %200, %204 : vector<224x1xi1>
    %c0_i32_82 = arith.constant 0 : i32
    %206 = vector.broadcast %c0_i32_82 : i32 to vector<224x1xi32>
    %207 = arith.addi %28, %206 : vector<224x1xi32>
    %c0_i32_83 = arith.constant 0 : i32
    %208 = vector.broadcast %c0_i32_83 : i32 to vector<224x1xi32>
    %209 = arith.cmpi sge, %207, %208 : vector<224x1xi32>
    %210 = arith.andi %205, %209 : vector<224x1xi1>
    %c0_i32_84 = arith.constant 0 : i32
    %211 = vector.broadcast %c0_i32_84 : i32 to vector<224x1xi32>
    %212 = arith.addi %28, %211 : vector<224x1xi32>
    %c14_i32_85 = arith.constant 14 : i32
    %213 = vector.broadcast %c14_i32_85 : i32 to vector<224x1xi32>
    %214 = arith.cmpi slt, %212, %213 : vector<224x1xi32>
    %215 = arith.andi %210, %214 : vector<224x1xi1>
    %cst_86 = arith.constant 0.000000e+00 : f32
    %216 = vector.shape_cast %215 : vector<224x1xi1> to vector<224x1xi1>
    %217 = vector.broadcast %216 : vector<224x1xi1> to vector<224x128xi1>
    %218 = vector.broadcast %cst_86 : f32 to vector<224x128xf32>
    %219 = arith.select %217, %196, %218 : vector<224x128xi1>, vector<224x128xf32>
    %c207_i32 = arith.constant 207 : i32
    %220 = tpu.dynamic_rotate %23 by %c207_i32 dim 0 : vector<224x128xf32>, i32 -> vector<224x128xf32>
    %c1_i32_87 = arith.constant 1 : i32
    %221 = vector.broadcast %c1_i32_87 : i32 to vector<224x1xi32>
    %222 = arith.addi %26, %221 : vector<224x1xi32>
    %c0_i32_88 = arith.constant 0 : i32
    %223 = vector.broadcast %c0_i32_88 : i32 to vector<224x1xi32>
    %224 = arith.cmpi sge, %222, %223 : vector<224x1xi32>
    %c1_i32_89 = arith.constant 1 : i32
    %225 = vector.broadcast %c1_i32_89 : i32 to vector<224x1xi32>
    %226 = arith.addi %26, %225 : vector<224x1xi32>
    %c14_i32_90 = arith.constant 14 : i32
    %227 = vector.broadcast %c14_i32_90 : i32 to vector<224x1xi32>
    %228 = arith.cmpi slt, %226, %227 : vector<224x1xi32>
    %229 = arith.andi %224, %228 : vector<224x1xi1>
    %c1_i32_91 = arith.constant 1 : i32
    %230 = vector.broadcast %c1_i32_91 : i32 to vector<224x1xi32>
    %231 = arith.addi %28, %230 : vector<224x1xi32>
    %c0_i32_92 = arith.constant 0 : i32
    %232 = vector.broadcast %c0_i32_92 : i32 to vector<224x1xi32>
    %233 = arith.cmpi sge, %231, %232 : vector<224x1xi32>
    %234 = arith.andi %229, %233 : vector<224x1xi1>
    %c1_i32_93 = arith.constant 1 : i32
    %235 = vector.broadcast %c1_i32_93 : i32 to vector<224x1xi32>
    %236 = arith.addi %28, %235 : vector<224x1xi32>
    %c14_i32_94 = arith.constant 14 : i32
    %237 = vector.broadcast %c14_i32_94 : i32 to vector<224x1xi32>
    %238 = arith.cmpi slt, %236, %237 : vector<224x1xi32>
    %239 = arith.andi %234, %238 : vector<224x1xi1>
    %cst_95 = arith.constant 0.000000e+00 : f32
    %240 = vector.shape_cast %239 : vector<224x1xi1> to vector<224x1xi1>
    %241 = vector.broadcast %240 : vector<224x1xi1> to vector<224x128xi1>
    %242 = vector.broadcast %cst_95 : f32 to vector<224x128xf32>
    %243 = arith.select %241, %220, %242 : vector<224x128xi1>, vector<224x128xf32>
    %244 = tpu.concatenate %52, %76, %100, %124, %147, %171, %195, %219, %243 in 1 : vector<224x128xf32>, vector<224x128xf32>, vector<224x128xf32>, vector<224x128xf32>, vector<224x128xf32>, vector<224x128xf32>, vector<224x128xf32>, vector<224x128xf32>, vector<224x128xf32> -> vector<224x1152xf32>
    %245 = arith.truncf %244 : vector<224x1152xf32> to vector<224x1152xbf16>
    %c0_96 = arith.constant 0 : index
    %c0_97 = arith.constant 0 : index
    %246 = vector.load %arg8[%c0_96, %c0_97] : memref<1152x128xbf16, #tpu.memory_space<vmem>>, vector<1152x128xbf16>
    %cst_98 = arith.constant dense<0.000000e+00> : vector<224x128xf32>
    %247 = tpu.matmul %245, %246, %cst_98 {dimension_numbers = #tpu.dot_dimension_numbers<[1], [0], [0], [1], [0, 0, 1, 1], [], []>} : vector<224x1152xbf16>, vector<1152x128xbf16>, vector<224x128xf32> -> vector<224x128xf32>
    %c0_99 = arith.constant 0 : index
    %c0_100 = arith.constant 0 : index
    %248 = vector.load %arg9[%c0_99, %c0_100] : memref<1x128xf32, #tpu.memory_space<vmem>>, vector<1x128xf32>
    %249 = vector.broadcast %248 : vector<1x128xf32> to vector<224x128xf32>
    %250 = arith.addf %247, %249 : vector<224x128xf32>
    %cst_101 = arith.constant 0.000000e+00 : f32
    %251 = vector.broadcast %cst_101 : f32 to vector<224x128xf32>
    %252 = arith.maximumf %250, %251 : vector<224x128xf32>
    %253 = arith.truncf %252 : vector<224x128xf32> to vector<224x128xbf16>
    %c0_102 = arith.constant 0 : index
    %c0_103 = arith.constant 0 : index
    %254 = vector.load %arg10[%c0_102, %c0_103] : memref<128x32xbf16, #tpu.memory_space<vmem>>, vector<128x32xbf16>
    %cst_104 = arith.constant dense<0.000000e+00> : vector<224x32xf32>
    %255 = tpu.matmul %253, %254, %cst_104 {dimension_numbers = #tpu.dot_dimension_numbers<[1], [0], [0], [1], [0, 0, 1, 1], [], []>} : vector<224x128xbf16>, vector<128x32xbf16>, vector<224x32xf32> -> vector<224x32xf32>
    %c0_105 = arith.constant 0 : index
    %c0_106 = arith.constant 0 : index
    %256 = vector.load %arg11[%c0_105, %c0_106] : memref<1x32xf32, #tpu.memory_space<vmem>>, vector<1x32xf32>
    %257 = vector.broadcast %256 : vector<1x32xf32> to vector<224x32xf32>
    %258 = arith.addf %255, %257 : vector<224x32xf32>
    %259 = arith.addf %258, %15 : vector<224x32xf32>
    %260 = arith.addf %259, %0 : vector<224x32xf32>
    %c0_107 = arith.constant 0 : index
    %c0_108 = arith.constant 0 : index
    %261 = vector.load %arg12[%c0_107, %c0_108] : memref<1x32xf32, #tpu.memory_space<vmem>>, vector<1x32xf32>
    %262 = vector.broadcast %261 : vector<1x32xf32> to vector<224x32xf32>
    %263 = arith.mulf %260, %262 : vector<224x32xf32>
    %c0_109 = arith.constant 0 : index
    %c0_110 = arith.constant 0 : index
    %264 = vector.load %arg13[%c0_109, %c0_110] : memref<1x32xf32, #tpu.memory_space<vmem>>, vector<1x32xf32>
    %265 = vector.broadcast %264 : vector<1x32xf32> to vector<224x32xf32>
    %266 = arith.addf %263, %265 : vector<224x32xf32>
    %c0_111 = arith.constant 0 : index
    %c0_112 = arith.constant 0 : index
    %267 = vector.load %arg14[%c0_111, %c0_112] : memref<224x32xf32, #tpu.memory_space<vmem>>, vector<224x32xf32>
    tpu.vector_store %arg14[%c0_111, %c0_112], %266 {strides = array<i32>} : memref<224x32xf32, #tpu.memory_space<vmem>>, vector<224x32xf32>,
    return
  }
  func.func @transform_0(%arg0: i32) -> (i32, i32) {
    %c0_i32 = arith.constant 0 : i32
    %c0_i32_0 = arith.constant 0 : i32
    return %arg0, %c0_i32 : i32, i32
  }
  func.func @transform_1(%arg0: i32) -> (i32, i32) {
    %c0_i32 = arith.constant 0 : i32
    %c0_i32_0 = arith.constant 0 : i32
    %c0_i32_1 = arith.constant 0 : i32
    return %c0_i32, %c0_i32_0 : i32, i32
  }
  func.func @transform_2(%arg0: i32) -> (i32, i32) {
    %c0_i32 = arith.constant 0 : i32
    %c0_i32_0 = arith.constant 0 : i32
    %c0_i32_1 = arith.constant 0 : i32
    return %c0_i32, %c0_i32_0 : i32, i32
  }
  func.func @transform_3(%arg0: i32) -> (i32, i32) {
    %c0_i32 = arith.constant 0 : i32
    %c0_i32_0 = arith.constant 0 : i32
    %c0_i32_1 = arith.constant 0 : i32
    return %c0_i32, %c0_i32_0 : i32, i32
  }
  func.func @transform_4(%arg0: i32) -> (i32, i32) {
    %c0_i32 = arith.constant 0 : i32
    %c0_i32_0 = arith.constant 0 : i32
    %c0_i32_1 = arith.constant 0 : i32
    return %c0_i32, %c0_i32_0 : i32, i32
  }
  func.func @transform_5(%arg0: i32) -> (i32, i32) {
    %c0_i32 = arith.constant 0 : i32
    %c0_i32_0 = arith.constant 0 : i32
    %c0_i32_1 = arith.constant 0 : i32
    return %c0_i32, %c0_i32_0 : i32, i32
  }
  func.func @transform_6(%arg0: i32) -> (i32, i32) {
    %c0_i32 = arith.constant 0 : i32
    %c0_i32_0 = arith.constant 0 : i32
    %c0_i32_1 = arith.constant 0 : i32
    return %c0_i32, %c0_i32_0 : i32, i32
  }
  func.func @transform_7(%arg0: i32) -> (i32, i32) {
    %c0_i32 = arith.constant 0 : i32
    %c0_i32_0 = arith.constant 0 : i32
    %c0_i32_1 = arith.constant 0 : i32
    return %c0_i32, %c0_i32_0 : i32, i32
  }
  func.func @transform_8(%arg0: i32) -> (i32, i32) {
    %c0_i32 = arith.constant 0 : i32
    %c0_i32_0 = arith.constant 0 : i32
    %c0_i32_1 = arith.constant 0 : i32
    return %c0_i32, %c0_i32_0 : i32, i32
  }
  func.func @transform_9(%arg0: i32) -> (i32, i32) {
    %c0_i32 = arith.constant 0 : i32
    %c0_i32_0 = arith.constant 0 : i32
    %c0_i32_1 = arith.constant 0 : i32
    return %c0_i32, %c0_i32_0 : i32, i32
  }
  func.func @transform_10(%arg0: i32) -> (i32, i32) {
    %c0_i32 = arith.constant 0 : i32
    %c0_i32_0 = arith.constant 0 : i32
    %c0_i32_1 = arith.constant 0 : i32
    return %c0_i32, %c0_i32_0 : i32, i32
  }
  func.func @transform_11(%arg0: i32) -> (i32, i32) {
    %c0_i32 = arith.constant 0 : i32
    %c0_i32_0 = arith.constant 0 : i32
    %c0_i32_1 = arith.constant 0 : i32
    return %c0_i32, %c0_i32_0 : i32, i32
  }
  func.func @transform_12(%arg0: i32) -> (i32, i32) {
    %c0_i32 = arith.constant 0 : i32
    %c0_i32_0 = arith.constant 0 : i32
    %c0_i32_1 = arith.constant 0 : i32
    return %c0_i32, %c0_i32_0 : i32, i32
  }
  func.func @transform_13(%arg0: i32) -> (i32, i32) {
    %c0_i32 = arith.constant 0 : i32
    %c0_i32_0 = arith.constant 0 : i32
    return %arg0, %c0_i32 : i32, i32
  }
}

</mosaic_0001>

<bundles_post_ra>
// kernel: block_forward.1
= control target key start
LH: loop header
LB: loop body
LE: loop exit
PB: predicated region body
PF: predicated region fallthrough
CT: control target
= control target key end

     0   :  { %s5833_s25 = smov 0   ;;  %s10045_s0 = inlined_call_operand.vmem [shape: f32[448,32], index: 0, kind: input, shape index: {}]   ;;  %s10046_s1 = inlined_call_operand.vmem [shape: bf16[32,128], index: 1, kind: input, shape index: {}]   ;;  %s10047_s2 = inlined_call_operand.vmem [shape: f32[1,128], index: 2, kind: input, shape index: {}]   ;;  %s10048_s3 = inlined_call_operand.vmem [shape: bf16[128,32], index: 3, kind: input, shape index: {}]   ;;  %s10049_s4 = inlined_call_operand.vmem [shape: f32[1,32], index: 4, kind: input, shape index: {}]   ;;  %s10050_s5 = inlined_call_operand.vmem [shape: bf16[32,128], index: 5, kind: input, shape index: {}]   ;;  %s10051_s6 = inlined_call_operand.vmem [shape: f32[1,128], index: 6, kind: input, shape index: {}]   ;;  %s10052_s7 = inlined_call_operand.vmem [shape: bf16[1152,128], index: 7, kind: input, shape index: {}]   ;;  %s10053_s8 = inlined_call_operand.vmem [shape: f32[1,128], index: 8, kind: input, shape index: {}]   ;;  %s10054_s9 = inlined_call_operand.vmem [shape: bf16[128,32], index: 9, kind: input, shape index: {}]   ;;  %s10055_s10 = inlined_call_operand.vmem [shape: f32[1,32], index: 10, kind: input, shape index: {}]   ;;  %s10056_s11 = inlined_call_operand.vmem [shape: f32[1,32], index: 11, kind: input, shape index: {}]   ;;  %s10057_s12 = inlined_call_operand.vmem [shape: f32[1,32], index: 12, kind: input, shape index: {}]   ;;  %s10058_s13 = inlined_call_operand.vmem [shape: f32[448,32], index: 13, kind: output, shape index: {}]  }
   0x1 LB: > { %s4830_s26 = sadd.s32 4294967295, %s5761_s25   ;;  %p4834_p0 = scmp.ge.s32.totalorder %s5761_s25, 1  ;;  %s5761_s25 = sphi %s5833_s25, %s23_s25  }
   0x2   : > { %p388_p1 = scmp.lt.s32.totalorder %s5761_s25, 3 }
   0x4   : > { %p389_p2 = pnand %p4834_p0, %p388_p1 }
   0x6   : > { %392 = sbr.rel (%p389_p2) target bundleno = 1605 (0x645), region = 72 }
   0xb   : > { %v5614_v0 = vld [vmem:[%s10046_s1 + $0x8] sm:$0xff]  ;;  %s432_s29 = smul.u32 28, %s4830_s26  ;;  %v5613_v1 = vld [vmem:[%s10046_s1] sm:$0xff]  ;;  %vm10097_vm0 = vcmask 261120   ;;  %v5622_v8 = vld [vmem:[%s10048_s3 + $0x38] sm:$0xff] }
   0xc   : > { %556 = vmatpush.bf16.msra.mxu0 %v5614_v0  ;;  %5705 = vmatpush.bf16.msra.mxu1 %v5614_v0  ;;  %v5621_v9 = vld [vmem:[%s10048_s3 + $0x30] sm:$0xff]  ;;  %v5620_v16 = vld [vmem:[%s10048_s3 + $0x28] sm:$0xff]  ;;  %v5619_v20 = vld [vmem:[%s10048_s3 + $0x20] sm:$0xff] }
   0xd   : > { %p433_p3 = scmp.lt.s32.totalorder %s432_s29, 55  ;;  %5706 = vmatpush.bf16.msra.mxu2 %v5614_v0  ;;  %5707 = vmatpush.bf16.msra.mxu3 %v5614_v0  ;;  %v5618_v24 = vld [vmem:[%s10048_s3 + $0x18] sm:$0xff]  ;;  %v5617_v25 = vld [vmem:[%s10048_s3 + $0x10] sm:$0xff]  ;;  %v5616_v28 = vld [vmem:[%s10048_s3 + $0x8] sm:$0xff] }
   0xe   : > { %v5615_v39 = vld [vmem:[%s10048_s3] sm:$0xff] }
   0xf   : > { %s11467_s29 = smov (!%p433_p3, %s432_s29), 55  ;;  %v5992_v47 = vld [vmem:[%s10047_s2] ss:$0 sm:$0xff] }
  0x10   : > { %557 = vmatpush.bf16.msra.mxu0 %v5613_v1  ;;  %s4835_s15 = sshll.u32 %s11467_s29, 3  ;;  %5708 = vmatpush.bf16.msra.mxu1 %v5613_v1 }
  0x11   : > { %s5855_s18 = scalar_lea.vmem %s10045_s0, %s4835_s15  ;;  %5709 = vmatpush.bf16.msra.mxu2 %v5613_v1  ;;  %5710 = vmatpush.bf16.msra.mxu3 %v5613_v1  ;;  %s9836_s22 = scalar_lea.vmem %s10058_s13, %s4835_s15 }
  0x12   : > { %v5858_v2 = vld [vmem:[%s5855_s18] sm:$0xff]  ;;  %v5861_v3 = vld [vmem:[%s5855_s18 + $0x8] sm:$0xff]  ;;  %v5882_v10 = vld [vmem:[%s5855_s18 + $0x10] sm:$0xff] }
  0x13   : > { %v473_v4 = vpack.c.bf16 %v5861_v3, %v5858_v2  ;;  %v5866_v5 = vld [vmem:[%s5855_s18 + $0x20] sm:$0xff]  ;;  %v5869_v6 = vld [vmem:[%s5855_s18 + $0x28] sm:$0xff]  ;;  %v5885_v11 = vld [vmem:[%s5855_s18 + $0x18] sm:$0xff] }
  0x14   : > { %v475_v7 = vpack.c.bf16 %v5869_v6, %v5866_v5  ;;  %739 = vmatpush.bf16.msrb.mxu1 %v5622_v8  ;;  %v5888_v12 = vld [vmem:[%s5855_s18 + $0x30] sm:$0xff]  ;;  %v5891_v13 = vld [vmem:[%s5855_s18 + $0x38] sm:$0xff]  ;;  %v474_v14 = vpack.c.bf16 %v5885_v11, %v5882_v10  ;;  %v5903_v17 = vld [vmem:[%s5855_s18 + $0x40] sm:$0xff] }
  0x15   : > { %4845 = vmatmul.msk.bf16.vlgmr.msra.gmra.mxu0 %vm10097_vm0, %v473_v4  ;;  %v476_v15 = vpack.c.bf16 %v5891_v13, %v5888_v12  ;;  %v5906_v18 = vld [vmem:[%s5855_s18 + $0x48] sm:$0xff]  ;;  %v5915_v21 = vld [vmem:[%s5855_s18 + $0x70] sm:$0xff]  ;;  %v5918_v22 = vld [vmem:[%s5855_s18 + $0x78] sm:$0xff] }
  0x16   : > { %4847 = vmatmul.msk.bf16.vlgmr.msra.gmra.mxu1 %vm10097_vm0, %v475_v7  ;;  %v477_v19 = vpack.c.bf16 %v5906_v18, %v5903_v17  ;;  %v480_v23 = vpack.c.bf16 %v5918_v22, %v5915_v21  ;;  %v5930_v26 = vld [vmem:[%s5855_s18 + $0x50] sm:$0xff]  ;;  %v5933_v27 = vld [vmem:[%s5855_s18 + $0x58] sm:$0xff]  ;;  %v5941_v30 = vld [vmem:[%s5855_s18 + $0x80] sm:$0xff] }
  0x17   : > { %v478_v29 = vpack.c.bf16 %v5933_v27, %v5930_v26  ;;  %v5944_v31 = vld [vmem:[%s5855_s18 + $0x88] sm:$0xff]  ;;  %v5951_v33 = vld [vmem:[%s5855_s18 + $0x60] sm:$0xff]  ;;  %v5960_v36 = vld [vmem:[%s5855_s18 + $0x90] sm:$0xff] }
  0x18   : > { %740 = vmatpush.bf16.msrb.mxu1 %v5621_v9  ;;  %4852 = vmatmul.msk.bf16.vlgmr.msra.gmra.mxu2 %vm10097_vm0, %v480_v23  ;;  %v481_v32 = vpack.c.bf16 %v5944_v31, %v5941_v30  ;;  %v5954_v34 = vld [vmem:[%s5855_s18 + $0x68] sm:$0xff]  ;;  %v5963_v37 = vld [vmem:[%s5855_s18 + $0x98] sm:$0xff]  ;;  %v5972_v40 = vld [vmem:[%s5855_s18 + $0xa0] sm:$0xff] }
  0x19   : > { %v479_v35 = vpack.c.bf16 %v5954_v34, %v5951_v33  ;;  %v482_v38 = vpack.c.bf16 %v5963_v37, %v5960_v36  ;;  %v5975_v41 = vld [vmem:[%s5855_s18 + $0xa8] sm:$0xff]  ;;  %v5981_v43 = vld [vmem:[%s5855_s18 + $0xb0] sm:$0xff]  ;;  %v5984_v44 = vld [vmem:[%s5855_s18 + $0xb8] sm:$0xff] }
  0x1a   : > { %v483_v42 = vpack.c.bf16 %v5975_v41, %v5972_v40  ;;  %v484_v46 = vpack.c.bf16 %v5984_v44, %v5981_v43  ;;  %v5997_v55 = vld [vmem:[%s5855_s18 + $0xc0] sm:$0xff]  ;;  %v6000_v56 = vld [vmem:[%s5855_s18 + $0xc8] sm:$0xff]  ;;  %v6008_v7 = vld [vmem:[%s5855_s18 + $0xd0] sm:$0xff] }
  0x1b   : > { %v485_v58 = vpack.c.bf16 %v6000_v56, %v5997_v55  ;;  %v6011_v8 = vld [vmem:[%s5855_s18 + $0xd8] sm:$0xff] }
  0x1c   : > { %741 = vmatpush.bf16.msrb.mxu1 %v5620_v16  ;;  %4856 = vmatmul.msk.bf16.vlgmr.msra.gmra.mxu3 %vm10097_vm0, %v484_v46  ;;  %v486_v9 = vpack.c.bf16 %v6011_v8, %v6008_v7 }
  0x20   : > { %742 = vmatpush.bf16.msrb.mxu1 %v5619_v20 }
  0x24   : > { %743 = vmatpush.bf16.msrb.mxu1 %v5618_v24  ;;  %v5624_v24 = vld [vmem:[%s10050_s5 + $0x8] sm:$0xff] }
  0x25   : > { %4846 = vmatmul.msk.bf16.gmra.mxu0 %vm10097_vm0, %v474_v14  ;;  %928 = vmatpush.bf16.msrb.mxu2 %v5624_v24 }
  0x26   : > { %4848 = vmatmul.msk.bf16.gmra.mxu1 %vm10097_vm0, %v476_v15 }
  0x28   : > { %744 = vmatpush.bf16.msrb.mxu1 %v5617_v25  ;;  %4853 = vmatmul.msk.bf16.gmra.mxu2 %vm10097_vm0, %v481_v32 }
  0x2c   : > { %745 = vmatpush.bf16.msrb.mxu1 %v5616_v28  ;;  %4857 = vmatmul.msk.bf16.gmra.mxu3 %vm10097_vm0, %v485_v58 }
  0x30   : > { %746 = vmatpush.bf16.msrb.mxu1 %v5615_v39 }
  0x36   : > { %4849 = vmatmul.msk.bf16.gmra.mxu1 %vm10097_vm0, %v477_v19 }
  0x38   : > { %4854 = vmatmul.msk.bf16.gmra.mxu2 %vm10097_vm0, %v482_v38 }
  0x3c   : > { %4858 = vmatmul.msk.bf16.gmra.mxu3 %vm10097_vm0, %v486_v9 }
  0x46   : > { %4850 = vmatmul.msk.bf16.gmra.mxu1 %vm10097_vm0, %v478_v29 }
  0x48   : > { %4855 = vmatmul.msk.bf16.gmra.mxu2 %vm10097_vm0, %v483_v42 }
  0x56   : > { %4851 = vmatmul.msk.bf16.gmra.mxu1 %vm10097_vm0, %v479_v35 }
  0x92   : > { %v559_v45 = vpop.f32.mrf.mxu0 }
  0x93   : > { %v560_v48 = vadd.f32 %v5992_v47, %v559_v45  ;;  %v569_v50 = vpop.f32.mrf.mxu1 }
  0x94   : > { %v570_v14 = vadd.f32 %v5992_v47, %v569_v50 }
  0x95   : > { %v629_v52 = vmax.f32 %v560_v48, 0.0 }
  0x96   : > { %v633_v19 = vmax.f32 %v570_v14, 0.0 }
  0x9a   : > { %v561_v49 = vpop.f32.mrf.mxu0 }
  0x9b   : > { %v562_v51 = vadd.f32 %v5992_v47, %v561_v49  ;;  %v571_v59 = vpop.f32.mrf.mxu1 }
  0x9c   : > { %v572_v15 = vadd.f32 %v5992_v47, %v571_v59 }
  0x9d   : > { %v630_v53 = vmax.f32 %v562_v51, 0.0 }
  0x9e   : > { %v634_v20 = vmax.f32 %v572_v15, 0.0 }
  0x9f   : > { %v657_v54 = vpack.c.bf16 %v630_v53, %v629_v52  ;;  %v5623_v52 = vld [vmem:[%s10050_s5] sm:$0xff] }
  0xa0   : > { %v659_v23 = vpack.c.bf16 %v634_v20, %v633_v19  ;;  %929 = vmatpush.bf16.msrb.mxu2 %v5623_v52 }
  0xa1   : > { %747 = vmatmul.bf16.vlgmr.msrb.gmra.mxu1 %v657_v54 }
  0xa2   : > { %v564_v57 = vpop.f32.mrf.mxu0 }
  0xa3   : > { %v565_v60 = vadd.f32 %v5992_v47, %v564_v57  ;;  %v574_v1 = vpop.f32.mrf.mxu1 }
  0xa4   : > { %v575_v28 = vadd.f32 %v5992_v47, %v574_v1 }
  0xa5   : > { %v631_v63 = vmax.f32 %v565_v60, 0.0  ;;  %v594_v60 = vpop.f32.mrf.mxu2 }
  0xa6   : > { %v635_v32 = vmax.f32 %v575_v28, 0.0 }
  0xaa   : > { %v566_v61 = vpop.f32.mrf.mxu0 }
  0xab   : > { %v567_v62 = vadd.f32 %v5992_v47, %v566_v61  ;;  %v576_v16 = vpop.f32.mrf.mxu1 }
  0xac   : > { %v577_v29 = vadd.f32 %v5992_v47, %v576_v16  ;;  %v595_v16 = vadd.f32 %v5992_v47, %v594_v60 }
  0xad   : > { %v632_v0 = vmax.f32 %v567_v62, 0.0  ;;  %v596_v1 = vpop.f32.mrf.mxu2 }
  0xae   : > { %v636_v35 = vmax.f32 %v577_v29, 0.0  ;;  %v597_v19 = vadd.f32 %v5992_v47, %v596_v1  ;;  %v643_v20 = vmax.f32 %v595_v16, 0.0 }
  0xaf   : > { %v658_v4 = vpack.c.bf16 %v632_v0, %v631_v63 }
  0xb0   : > { %v660_v39 = vpack.c.bf16 %v636_v35, %v635_v32 }
  0xb1   : > { %752 = vmatmul.bf16.gmra.mxu1 %v658_v4 }
  0xb3   : > { %v579_v25 = vpop.f32.mrf.mxu1 }
  0xb4   : > { %v580_v45 = vadd.f32 %v5992_v47, %v579_v25 }
  0xb5   : > { %v599_v15 = vpop.f32.mrf.mxu2 }
  0xb6   : > { %v637_v48 = vmax.f32 %v580_v45, 0.0  ;;  %v600_v29 = vadd.f32 %v5992_v47, %v599_v15 }
  0xb8   : > { %v645_v35 = vmax.f32 %v600_v29, 0.0 }
  0xbb   : > { %v581_v38 = vpop.f32.mrf.mxu1 }
  0xbc   : > { %v582_v46 = vadd.f32 %v5992_v47, %v581_v38 }
  0xbd   : > { %v601_v24 = vpop.f32.mrf.mxu2 }
  0xbe   : > { %v638_v49 = vmax.f32 %v582_v46, 0.0  ;;  %v602_v32 = vadd.f32 %v5992_v47, %v601_v24  ;;  %v6039_v46 = vld [vmem:[%s10049_s4] ss:$0 sm:$0xff] }
  0xc0   : > { %v661_v50 = vpack.c.bf16 %v638_v49, %v637_v48  ;;  %v646_v38 = vmax.f32 %v602_v32, 0.0 }
  0xc1   : > { %757 = vmatmul.bf16.gmra.mxu1 %v659_v23  ;;  %v644_v23 = vmax.f32 %v597_v19, 0.0 }
  0xc3   : > { %v584_v42 = vpop.f32.mrf.mxu1  ;;  %v664_v25 = vpack.c.bf16 %v644_v23, %v643_v20 }
  0xc4   : > { %v585_v53 = vadd.f32 %v5992_v47, %v584_v42  ;;  %v665_v42 = vpack.c.bf16 %v646_v38, %v645_v35 }
  0xc5   : > { %v604_v28 = vpop.f32.mrf.mxu2 }
  0xc6   : > { %v639_v58 = vmax.f32 %v585_v53, 0.0 }
  0xcb   : > { %v586_v51 = vpop.f32.mrf.mxu1 }
  0xcc   : > { %v587_v54 = vadd.f32 %v5992_v47, %v586_v51 }
  0xcd   : > { %v606_v45 = vpop.f32.mrf.mxu2 }
  0xce   : > { %v640_v59 = vmax.f32 %v587_v54, 0.0  ;;  %v607_v51 = vadd.f32 %v5992_v47, %v606_v45 }
  0xd0   : > { %v662_v61 = vpack.c.bf16 %v640_v59, %v639_v58  ;;  %v648_v59 = vmax.f32 %v607_v51, 0.0 }
  0xd1   : > { %762 = vmatmul.bf16.gmra.mxu1 %v660_v39 }
  0xd3   : > { %v589_v57 = vpop.f32.mrf.mxu1 }
  0xd4   : > { %v590_v63 = vadd.f32 %v5992_v47, %v589_v57 }
  0xd5   : > { %v609_v57 = vpop.f32.mrf.mxu2 }
  0xd6   : > { %v641_v4 = vmax.f32 %v590_v63, 0.0  ;;  %v614_v63 = vpop.f32.mrf.mxu3 }
  0xdb   : > { %v591_v62 = vpop.f32.mrf.mxu1 }
  0xdc   : > { %v592_v0 = vadd.f32 %v5992_v47, %v591_v62 }
  0xde   : > { %v642_v9 = vmax.f32 %v592_v0, 0.0  ;;  %v611_v0 = vpop.f32.mrf.mxu2  ;;  %v616_v23 = vpop.f32.mrf.mxu3 }
  0xe0   : > { %v663_v14 = vpack.c.bf16 %v642_v9, %v641_v4  ;;  %v610_v4 = vadd.f32 %v5992_v47, %v609_v57 }
  0xe1   : > { %767 = vmatmul.bf16.gmra.mxu1 %v661_v50  ;;  %v605_v50 = vadd.f32 %v5992_v47, %v604_v28 }
  0xe2   : > { %v649_v16 = vmax.f32 %v610_v4, 0.0 }
  0xe3   : > { %v647_v58 = vmax.f32 %v605_v50, 0.0 }
  0xe5   : > { %v666_v62 = vpack.c.bf16 %v648_v59, %v647_v58 }
  0xe6   : > { %v619_v32 = vpop.f32.mrf.mxu3 }
  0xee   : > { %v621_v51 = vpop.f32.mrf.mxu3 }
  0xef   : > { %v622_v58 = vadd.f32 %v5992_v47, %v621_v51 }
  0xf1   : > { %772 = vmatmul.bf16.gmra.mxu1 %v662_v61 }
 0x101   : > { %777 = vmatmul.bf16.gmra.mxu1 %v663_v14 }
 0x111   : > { %782 = vmatmul.bf16.gmra.mxu1 %v664_v25 }
 0x11e   : > { %v748_v39 = vpop.f32.mrf.mxu1 }
 0x11f   : > { %v749_v48 = vadd.f32 %v6039_v46, %v748_v39 }
 0x121   : > { %787 = vmatmul.bf16.gmra.mxu1 %v665_v42  ;;  %v6046_v53 = vadd.f32 %v749_v48, %v5858_v2 }
 0x123   : > { %10414 = vst [vmem:[#allocation2_spill] sm:$0xff] %v6046_v53 }
 0x126   : > { %v750_v49 = vpop.f32.mrf.mxu1 }
 0x127   : > { %v751_v52 = vadd.f32 %v6039_v46, %v750_v49 }
 0x129   : > { %v6049_v54 = vadd.f32 %v751_v52, %v5861_v3  ;;  %v612_v3 = vadd.f32 %v5992_v47, %v611_v0 }
 0x12b   : > { %10415 = vst [vmem:[#allocation3_spill] sm:$0xff] %v6049_v54  ;;  %v846_v60 = vpack.c.bf16 %v6049_v54, %v6046_v53  ;;  %v650_v19 = vmax.f32 %v612_v3, 0.0 }
 0x12d   : > { %4899 = vmatmul.msk.bf16.vlgmr.msrb.gmra.mxu2 %vm10097_vm0, %v846_v60  ;;  %v667_v25 = vpack.c.bf16 %v650_v19, %v649_v16 }
 0x12e   : > { %v753_v61 = vpop.f32.mrf.mxu1 }
 0x12f   : > { %v754_v1 = vadd.f32 %v6039_v46, %v753_v61  ;;  %v624_v61 = vpop.f32.mrf.mxu3 }
 0x131   : > { %792 = vmatmul.bf16.gmra.mxu1 %v666_v62  ;;  %v6059_v14 = vadd.f32 %v754_v1, %v5882_v10  ;;  %v615_v10 = vadd.f32 %v5992_v47, %v614_v63  ;;  %v654_v63 = vmax.f32 %v622_v58, 0.0 }
 0x133   : > { %10416 = vst [vmem:[#allocation4_spill] sm:$0xff] %v6059_v14  ;;  %v651_v42 = vmax.f32 %v615_v10, 0.0 }
 0x136   : > { %v755_v2 = vpop.f32.mrf.mxu1 }
 0x137   : > { %v756_v9 = vadd.f32 %v6039_v46, %v755_v2  ;;  %v626_v4 = vpop.f32.mrf.mxu3 }
 0x139   : > { %v6062_v15 = vadd.f32 %v756_v9, %v5885_v11  ;;  %v617_v11 = vadd.f32 %v5992_v47, %v616_v23 }
 0x13b   : > { %10417 = vst [vmem:[#allocation5_spill] sm:$0xff] %v6062_v15  ;;  %v847_v20 = vpack.c.bf16 %v6062_v15, %v6059_v14  ;;  %v652_v45 = vmax.f32 %v617_v11, 0.0 }
 0x13d   : > { %4900 = vmatmul.msk.bf16.gmra.mxu2 %vm10097_vm0, %v847_v20  ;;  %v668_v50 = vpack.c.bf16 %v652_v45, %v651_v42 }
 0x13e   : > { %v758_v24 = vpop.f32.mrf.mxu1 }
 0x13f   : > { %v759_v28 = vadd.f32 %v6039_v46, %v758_v24 }
 0x141   : > { %797 = vmatmul.bf16.gmra.mxu1 %v667_v25  ;;  %v6072_v38 = vadd.f32 %v759_v28, %v5866_v5  ;;  %v620_v5 = vadd.f32 %v5992_v47, %v619_v32 }
 0x143   : > { %10418 = vst [vmem:[#allocation6_spill] sm:$0xff] %v6072_v38  ;;  %v653_v62 = vmax.f32 %v620_v5, 0.0 }
 0x145   : > { %v669_v2 = vpack.c.bf16 %v654_v63, %v653_v62 }
 0x146   : > { %v760_v29 = vpop.f32.mrf.mxu1 }
 0x147   : > { %v761_v35 = vadd.f32 %v6039_v46, %v760_v29 }
 0x149   : > { %v6075_v39 = vadd.f32 %v761_v35, %v5869_v6 }
 0x14b   : > { %10419 = vst [vmem:[#allocation7_spill] sm:$0xff] %v6075_v39  ;;  %v848_v48 = vpack.c.bf16 %v6075_v39, %v6072_v38 }
 0x14d   : > { %4901 = vmatmul.msk.bf16.gmra.mxu2 %vm10097_vm0, %v848_v48 }
 0x14e   : > { %v763_v49 = vpop.f32.mrf.mxu1 }
 0x14f   : > { %v764_v52 = vadd.f32 %v6039_v46, %v763_v49 }
 0x151   : > { %802 = vmatmul.bf16.gmra.mxu1 %v668_v50  ;;  %v6085_v59 = vadd.f32 %v764_v52, %v5888_v12  ;;  %v625_v12 = vadd.f32 %v5992_v47, %v624_v61 }
 0x153   : > { %10420 = vst [vmem:[#allocation8_spill] sm:$0xff] %v6085_v59  ;;  %v655_v23 = vmax.f32 %v625_v12, 0.0 }
 0x156   : > { %v765_v57 = vpop.f32.mrf.mxu1 }
 0x157   : > { %v766_v6 = vadd.f32 %v6039_v46, %v765_v57 }
 0x159   : > { %v6088_v60 = vadd.f32 %v766_v6, %v5891_v13  ;;  %v627_v13 = vadd.f32 %v5992_v47, %v626_v4 }
 0x15b   : > { %10421 = vst [vmem:[#allocation9_spill] sm:$0xff] %v6088_v60  ;;  %v849_v0 = vpack.c.bf16 %v6088_v60, %v6085_v59  ;;  %v656_v24 = vmax.f32 %v627_v13, 0.0 }
 0x15d   : > { %4902 = vmatmul.msk.bf16.gmra.mxu2 %vm10097_vm0, %v849_v0  ;;  %v670_v29 = vpack.c.bf16 %v656_v24, %v655_v23 }
 0x15e   : > { %v768_v1 = vpop.f32.mrf.mxu1 }
 0x15f   : > { %v769_v3 = vadd.f32 %v6039_v46, %v768_v1  ;;  %v6153_v1 = vld [vmem:[%s10051_s6] ss:$0 sm:$0xff] }
 0x161   : > { %807 = vmatmul.bf16.gmra.mxu1 %v669_v2  ;;  %v6098_v19 = vadd.f32 %v769_v3, %v5903_v17  ;;  %v1029_v3 = vlaneseq }
 0x163   : > { %10422 = vst [vmem:[#allocation10_spill] sm:$0xff] %v6098_v19 }
 0x166   : > { %v770_v9 = vpop.f32.mrf.mxu1 }
 0x167   : > { %v771_v16 = vadd.f32 %v6039_v46, %v770_v9 }
 0x169   : > { %v6101_v20 = vadd.f32 %v771_v16, %v5906_v18  ;;  %v6160_v16 = vshrl.u32 %v1029_v3, 7 }
 0x16b   : > { %10423 = vst [vmem:[#allocation11_spill] sm:$0xff] %v6101_v20  ;;  %v850_v25 = vpack.c.bf16 %v6101_v20, %v6098_v19  ;;  %vm10114_vm1 = vcmp.lt.s32.totalorder %v6160_v16, 1  ;;  %vm1731_vm2 = vcmp.lt.s32.totalorder %v6160_v16, 7 }
 0x16d   : > { %4903 = vmatmul.msk.bf16.gmra.mxu2 %vm10097_vm0, %v850_v25 }
 0x16e   : > { %v773_v28 = vpop.f32.mrf.mxu1 }
 0x16f   : > { %v774_v47 = vadd.f32 %v6039_v46, %v773_v28 }
 0x171   : > { %812 = vmatmul.bf16.gmra.mxu1 %v670_v29  ;;  %v6109_v17 = vadd.f32 %v774_v47, %v5930_v26 }
 0x173   : > { %10424 = vst [vmem:[#allocation12_spill] sm:$0xff] %v6109_v17 }
 0x176   : > { %v775_v32 = vpop.f32.mrf.mxu1 }
 0x177   : > { %v776_v10 = vadd.f32 %v6039_v46, %v775_v32 }
 0x179   : > { %v6112_v18 = vadd.f32 %v776_v10, %v5933_v27 }
 0x17b   : > { %10425 = vst [vmem:[#allocation13_spill] sm:$0xff] %v6112_v18  ;;  %v851_v11 = vpack.c.bf16 %v6112_v18, %v6109_v17 }
 0x17d   : > { %4904 = vmatmul.msk.bf16.gmra.mxu2 %vm10097_vm0, %v851_v11 }
 0x17e   : > { %v778_v35 = vpop.f32.mrf.mxu1 }
 0x17f   : > { %v779_v42 = vadd.f32 %v6039_v46, %v778_v35 }
 0x181   : > { %v6120_v49 = vadd.f32 %v779_v42, %v5951_v33 }
 0x183   : > { %10426 = vst [vmem:[#allocation14_spill] sm:$0xff] %v6120_v49 }
 0x186   : > { %v780_v45 = vpop.f32.mrf.mxu1 }
 0x187   : > { %v781_v48 = vadd.f32 %v6039_v46, %v780_v45 }
 0x189   : > { %v6123_v26 = vadd.f32 %v781_v48, %v5954_v34 }
 0x18b   : > { %10427 = vst [vmem:[#allocation15_spill] sm:$0xff] %v6123_v26  ;;  %v852_v27 = vpack.c.bf16 %v6123_v26, %v6120_v49 }
 0x18d   : > { %4905 = vmatmul.msk.bf16.gmra.mxu2 %vm10097_vm0, %v852_v27 }
 0x18e   : > { %v783_v50 = vpop.f32.mrf.mxu1 }
 0x18f   : > { %v784_v51 = vadd.f32 %v6039_v46, %v783_v50 }
 0x191   : > { %v6131_v5 = vadd.f32 %v784_v51, %v5915_v21 }
 0x193   : > { %10428 = vst [vmem:[#allocation16_spill] sm:$0xff] %v6131_v5 }
 0x196   : > { %v785_v52 = vpop.f32.mrf.mxu1 }
 0x197   : > { %v786_v57 = vadd.f32 %v6039_v46, %v785_v52 }
 0x199   : > { %v6134_v33 = vadd.f32 %v786_v57, %v5918_v22 }
 0x19b   : > { %10429 = vst [vmem:[#allocation17_spill] sm:$0xff] %v6134_v33  ;;  %v853_v34 = vpack.c.bf16 %v6134_v33, %v6131_v5  ;;  %v5650_v5 = vld [vmem:[%s10052_s7 + $0xc8] sm:$0xff] }
 0x19d   : > { %4906 = vmatmul.msk.bf16.gmra.mxu2 %vm10097_vm0, %v853_v34 }
 0x19e   : > { %v788_v58 = vpop.f32.mrf.mxu1 }
 0x19f   : > { %v789_v6 = vadd.f32 %v6039_v46, %v788_v58 }
 0x1a1   : > { %v6142_v63 = vadd.f32 %v789_v6, %v5941_v30 }
 0x1a3   : > { %10430 = vst [vmem:[#allocation18_spill] sm:$0xff] %v6142_v63 }
 0x1a6   : > { %v790_v61 = vpop.f32.mrf.mxu1 }
 0x1a7   : > { %v791_v62 = vadd.f32 %v6039_v46, %v790_v61 }
 0x1a9   : > { %v6145_v21 = vadd.f32 %v791_v62, %v5944_v31 }
 0x1ab   : > { %10431 = vst [vmem:[#allocation19_spill] sm:$0xff] %v6145_v21  ;;  %v854_v22 = vpack.c.bf16 %v6145_v21, %v6142_v63 }
 0x1ad   : > { %4907 = vmatmul.msk.bf16.gmra.mxu2 %vm10097_vm0, %v854_v22 }
 0x1ae   : > { %v793_v0 = vpop.f32.mrf.mxu1 }
 0x1af   : > { %v794_v30 = vadd.f32 %v6039_v46, %v793_v0 }
 0x1b0   : > { %v931_v2 = vpop.f32.mrf.mxu2 }
 0x1b1   : > { %v932_v4 = vadd.f32 %v6153_v1, %v931_v2  ;;  %v6163_v23 = vadd.f32 %v794_v30, %v5960_v36 }
 0x1b3   : > { %v6158_v12 = vmax.f32 %v932_v4, 0.0  ;;  %10432 = vst [vmem:[#allocation20_spill] sm:$0xff] %v6163_v23 }
 0x1b5   : > { %v10061_v47 = vrot.slane %v6158_v12, 7  ;;  %v10060_v32 = vrot.slane %v6158_v12, 1 }
 0x1b6   : > { %v795_v9 = vpop.f32.mrf.mxu1 }
 0x1b7   : > { %v796_v31 = vadd.f32 %v6039_v46, %v795_v9 }
 0x1b8   : > { %v933_v13 = vpop.f32.mrf.mxu2 }
 0x1b9   : > { %v6166_v24 = vadd.f32 %v796_v31, %v5963_v37  ;;  %v934_v25 = vadd.f32 %v6153_v1, %v933_v13 }
 0x1bb   : > { %10433 = vst [vmem:[#allocation21_spill] sm:$0xff] %v6166_v24  ;;  %v855_v28 = vpack.c.bf16 %v6166_v24, %v6163_v23  ;;  %v1002_v29 = vmax.f32 %v934_v25, 0.0  ;;  %v5655_v24 = vld [vmem:[%s10052_s7 + $0xf0] sm:$0xff]  ;;  %v5646_v23 = vld [vmem:[%s10052_s7 + $0xa8] sm:$0xff] }
 0x1bd   : > { %v1115_v10 = vrot.slane %v1002_v29, 7  ;;  %v1704_v36 = vrot.slane %v1002_v29, 1  ;;  %4908 = vmatmul.msk.bf16.gmra.mxu2 %vm10097_vm0, %v855_v28  ;;  %v6177_v37 = vpack.c.bf16 %v1002_v29, %v6158_v12 }
 0x1be   : > { %v798_v11 = vpop.f32.mrf.mxu1 }
 0x1bf   : > { %v6183_v35 = vsel %vm10114_vm1, %v10061_v47, %v1115_v10  ;;  %v1758_v42 = vsel %vm1731_vm2, %v10060_v32, %v1704_v36  ;;  %v799_v50 = vadd.f32 %v6039_v46, %v798_v11 }
 0x1c0   : > { %v936_v45 = vpop.f32.mrf.mxu2 }
 0x1c1   : > { %v937_v48 = vadd.f32 %v6153_v1, %v936_v45  ;;  %v6199_v22 = vadd.f32 %v799_v50, %v5972_v40 }
 0x1c3   : > { %v1003_v27 = vmax.f32 %v937_v48, 0.0  ;;  %10435 = vst [vmem:[#allocation23_spill] sm:$0xff] %v6199_v22 }
 0x1c5   : > { %v1116_v51 = vrot.slane %v1003_v27, 7  ;;  %v1705_v52 = vrot.slane %v1003_v27, 1 }
 0x1c6   : > { %v800_v57 = vpop.f32.mrf.mxu1 }
 0x1c7   : > { %v801_v34 = vadd.f32 %v6039_v46, %v800_v57  ;;  %v1757_v58 = vsel %vm1731_vm2, %v1704_v36, %v1705_v52  ;;  %v1168_v6 = vsel %vm10114_vm1, %v1115_v10, %v1116_v51 }
 0x1c8   : > { %v938_v61 = vpop.f32.mrf.mxu2  ;;  %v6196_v62 = vpack.c.bf16 %v1757_v58, %v1758_v42 }
 0x1c9   : > { %v6202_v0 = vadd.f32 %v801_v34, %v5975_v41  ;;  %v939_v2 = vadd.f32 %v6153_v1, %v938_v61 }
 0x1ca   : > { %10434 = vst [vmem:[#allocation22_spill] sm:$0xff] %v6196_v62 }
 0x1cb   : > { %10436 = vst [vmem:[#allocation24_spill] sm:$0xff] %v6202_v0  ;;  %v856_v4 = vpack.c.bf16 %v6202_v0, %v6199_v22  ;;  %v1004_v3 = vmax.f32 %v939_v2, 0.0  ;;  %v5647_v22 = vld [vmem:[%s10052_s7 + $0xb0] sm:$0xff] }
 0x1cd   : > { %v1117_v30 = vrot.slane %v1004_v3, 7  ;;  %v1706_v9 = vrot.slane %v1004_v3, 1  ;;  %4909 = vmatmul.msk.bf16.gmra.mxu2 %vm10097_vm0, %v856_v4  ;;  %v6208_v31 = vpack.c.bf16 %v1004_v3, %v1003_v27 }
 0x1ce   : > { %v803_v13 = vpop.f32.mrf.mxu1 }
 0x1cf   : > { %v1167_v40 = vsel %vm10114_vm1, %v1116_v51, %v1117_v30  ;;  %v1756_v41 = vsel %vm1731_vm2, %v1705_v52, %v1706_v9  ;;  %v804_v36 = vadd.f32 %v6039_v46, %v803_v13 }
 0x1d0   : > { %v941_v25 = vpop.f32.mrf.mxu2  ;;  %v6214_v28 = vpack.c.bf16 %v1167_v40, %v1168_v6 }
 0x1d1   : > { %v942_v29 = vadd.f32 %v6153_v1, %v941_v25  ;;  %v6230_v57 = vadd.f32 %v804_v36, %v5981_v43 }
 0x1d3   : > { %v6217_v10 = vmax.f32 %v942_v29, 0.0  ;;  %10438 = vst [vmem:[#allocation26_spill] sm:$0xff] %v6230_v57 }
 0x1d5   : > { %v1118_v11 = vrot.slane %v6217_v10, 7  ;;  %v1707_v42 = vrot.slane %v6217_v10, 1 }
 0x1d6   : > { %v805_v45 = vpop.f32.mrf.mxu1 }
 0x1d7   : > { %v806_v48 = vadd.f32 %v6039_v46, %v805_v45  ;;  %v1755_v27 = vsel %vm1731_vm2, %v1706_v9, %v1707_v42  ;;  %v1166_v50 = vsel %vm10114_vm1, %v1117_v30, %v1118_v11 }
 0x1d8   : > { %v943_v51 = vpop.f32.mrf.mxu2  ;;  %v6227_v52 = vpack.c.bf16 %v1755_v27, %v1756_v41 }
 0x1d9   : > { %v6233_v34 = vadd.f32 %v806_v48, %v5984_v44  ;;  %v944_v58 = vadd.f32 %v6153_v1, %v943_v51 }
 0x1da   : > { %10437 = vst [vmem:[#allocation25_spill] sm:$0xff] %v6227_v52 }
 0x1db   : > { %10439 = vst [vmem:[#allocation27_spill] sm:$0xff] %v6233_v34  ;;  %v857_v6 = vpack.c.bf16 %v6233_v34, %v6230_v57  ;;  %v6238_v61 = vmax.f32 %v944_v58, 0.0 }
 0x1dd   : > { %v10059_v2 = vrot.slane %v6238_v61, 7  ;;  %4910 = vmatmul.msk.bf16.gmra.mxu2 %vm10097_vm0, %v857_v6  ;;  %v1708_v9 = vrot.slane %v6238_v61, 1 }
 0x1de   : > { %v808_v4 = vpop.f32.mrf.mxu1 }
 0x1df   : > { %v1165_v43 = vsel %vm10114_vm1, %v1118_v11, %v10059_v2  ;;  %v809_v40 = vadd.f32 %v6039_v46, %v808_v4  ;;  %v1754_v11 = vsel %vm1731_vm2, %v1707_v42, %v1708_v9 }
 0x1e0   : > { %v946_v3 = vpop.f32.mrf.mxu2  ;;  %v6246_v44 = vpack.c.bf16 %v1165_v43, %v1166_v50 }
 0x1e1   : > { %v947_v30 = vadd.f32 %v6153_v1, %v946_v3  ;;  %v6262_v27 = vadd.f32 %v809_v40, %v5997_v55 }
 0x1e3   : > { %v6250_v13 = vmax.f32 %v947_v30, 0.0  ;;  %10440 = vst [vmem:[#allocation28_spill] sm:$0xff] %v6262_v27 }
 0x1e5   : > { %v1709_v41 = vrot.slane %v6250_v13, 1 }
 0x1e6   : > { %v810_v25 = vpop.f32.mrf.mxu1 }
 0x1e7   : > { %v811_v29 = vadd.f32 %v6039_v46, %v810_v25  ;;  %v1753_v36 = vsel %vm1731_vm2, %v1708_v9, %v1709_v41 }
 0x1e8   : > { %v948_v45 = vpop.f32.mrf.mxu2  ;;  %v6259_v48 = vpack.c.bf16 %v1753_v36, %v1754_v11 }
 0x1e9   : > { %v6265_v50 = vadd.f32 %v811_v29, %v6000_v56  ;;  %v949_v58 = vadd.f32 %v6153_v1, %v948_v45 }
 0x1eb   : > { %10441 = vst [vmem:[#allocation29_spill] sm:$0xff] %v6265_v50  ;;  %v858_v51 = vpack.c.bf16 %v6265_v50, %v6262_v27  ;;  %v6271_v4 = vmax.f32 %v949_v58, 0.0 }
 0x1ed   : > { %4911 = vmatmul.msk.bf16.gmra.mxu2 %vm10097_vm0, %v858_v51  ;;  %v1710_v3 = vrot.slane %v6271_v4, 1 }
 0x1ee   : > { %v813_v6 = vpop.f32.mrf.mxu1 }
 0x1ef   : > { %v814_v56 = vadd.f32 %v6039_v46, %v813_v6  ;;  %v1752_v29 = vsel %vm1731_vm2, %v1709_v41, %v1710_v3 }
 0x1f0   : > { %v951_v42 = vpop.f32.mrf.mxu2 }
 0x1f1   : > { %v952_v43 = vadd.f32 %v6153_v1, %v951_v42  ;;  %v6287_v45 = vadd.f32 %v814_v56, %v6008_v7 }
 0x1f3   : > { %v6275_v55 = vmax.f32 %v952_v43, 0.0  ;;  %10443 = vst [vmem:[#allocation31_spill] sm:$0xff] %v6287_v45 }
 0x1f5   : > { %v1711_v30 = vrot.slane %v6275_v55, 1 }
 0x1f6   : > { %v815_v9 = vpop.f32.mrf.mxu1 }
 0x1f7   : > { %v816_v40 = vadd.f32 %v6039_v46, %v815_v9  ;;  %v1751_v25 = vsel %vm1731_vm2, %v1710_v3, %v1711_v30 }
 0x1f8   : > { %v953_v36 = vpop.f32.mrf.mxu2  ;;  %v6284_v11 = vpack.c.bf16 %v1751_v25, %v1752_v29 }
 0x1f9   : > { %v6290_v51 = vadd.f32 %v816_v40, %v6011_v8  ;;  %v954_v46 = vadd.f32 %v6153_v1, %v953_v36 }
 0x1fa   : > { %10442 = vst [vmem:[#allocation30_spill] sm:$0xff] %v6284_v11 }
 0x1fb   : > { %10444 = vst [vmem:[#allocation32_spill] sm:$0xff] %v6290_v51  ;;  %v859_v58 = vpack.c.bf16 %v6290_v51, %v6287_v45  ;;  %v6296_v6 = vmax.f32 %v954_v46, 0.0 }
 0x1fd   : > { %4912 = vmatmul.msk.bf16.gmra.mxu2 %vm10097_vm0, %v859_v58  ;;  %v1712_v43 = vrot.slane %v6296_v6, 1 }
 0x1ff   : > { %v1750_v56 = vsel %vm1731_vm2, %v1711_v30, %v1712_v43 }
 0x200   : > { %v956_v42 = vpop.f32.mrf.mxu2 }
 0x201   : > { %v957_v41 = vadd.f32 %v6153_v1, %v956_v42 }
 0x203   : > { %v6300_v3 = vmax.f32 %v957_v41, 0.0 }
 0x205   : > { %v1713_v7 = vrot.slane %v6300_v3, 1 }
 0x207   : > { %v1749_v8 = vsel %vm1731_vm2, %v1712_v43, %v1713_v7 }
 0x208   : > { %v958_v9 = vpop.f32.mrf.mxu2  ;;  %v6307_v40 = vpack.c.bf16 %v1749_v8, %v1750_v56 }
 0x209   : > { %v959_v25 = vadd.f32 %v6153_v1, %v958_v9 }
 0x20b   : > { %v6310_v29 = vmax.f32 %v959_v25, 0.0 }
 0x20d   : > { %v1714_v46 = vrot.slane %v6310_v29, 1 }
 0x20f   : > { %v1748_v30 = vsel %vm1731_vm2, %v1713_v7, %v1714_v46 }
 0x210   : > { %v961_v36 = vpop.f32.mrf.mxu2 }
 0x211   : > { %v962_v58 = vadd.f32 %v6153_v1, %v961_v36 }
 0x213   : > { %v6314_v42 = vmax.f32 %v962_v58, 0.0 }
 0x215   : > { %v1715_v41 = vrot.slane %v6314_v42, 1 }
 0x217   : > { %v1747_v2 = vsel %vm1731_vm2, %v1714_v46, %v1715_v41 }
 0x218   : > { %v963_v43 = vpop.f32.mrf.mxu2  ;;  %v6321_v8 = vpack.c.bf16 %v1747_v2, %v1748_v30 }
 0x219   : > { %v964_v56 = vadd.f32 %v6153_v1, %v963_v43 }
 0x21a   : > { %10445 = vst [vmem:[#allocation33_spill] sm:$0xff] %v6321_v8 }
 0x21b   : > { %v6324_v9 = vmax.f32 %v964_v56, 0.0 }
 0x21d   : > { %v1716_v58 = vrot.slane %v6324_v9, 1 }
 0x21f   : > { %v1746_v2 = vsel %vm1731_vm2, %v1715_v41, %v1716_v58 }
 0x220   : > { %v966_v25 = vpop.f32.mrf.mxu2 }
 0x221   : > { %v967_v36 = vadd.f32 %v6153_v1, %v966_v25 }
 0x223   : > { %v6328_v32 = vmax.f32 %v967_v36, 0.0 }
 0x225   : > { %v1717_v47 = vrot.slane %v6328_v32, 1 }
 0x227   : > { %v1745_v51 = vsel %vm1731_vm2, %v1716_v58, %v1717_v47 }
 0x228   : > { %v968_v7 = vpop.f32.mrf.mxu2  ;;  %v6335_v46 = vpack.c.bf16 %v1745_v51, %v1746_v2 }
 0x229   : > { %v969_v30 = vadd.f32 %v6153_v1, %v968_v7 }
 0x22a   : > { %10446 = vst [vmem:[#allocation34_spill] sm:$0xff] %v6335_v46 }
 0x22b   : > { %v6338_v43 = vmax.f32 %v969_v30, 0.0 }
 0x22d   : > { %v1718_v36 = vrot.slane %v6338_v43, 1 }
 0x22f   : > { %v1744_v51 = vsel %vm1731_vm2, %v1717_v47, %v1718_v36  ;;  %v5632_v47 = vld [vmem:[%s10052_s7 + $0x38] sm:$0xff] }
 0x230   : > { %v971_v56 = vpop.f32.mrf.mxu2  ;;  %3726 = vmatpush.bf16.msrb.mxu3 %v5632_v47 }
 0x231   : > { %v972_v25 = vadd.f32 %v6153_v1, %v971_v56 }
 0x233   : > { %v6342_v45 = vmax.f32 %v972_v25, 0.0 }
 0x235   : > { %v1719_v50 = vrot.slane %v6342_v45, 1 }
 0x237   : > { %v1743_v27 = vsel %vm1731_vm2, %v1718_v36, %v1719_v50 }
 0x238   : > { %v973_v41 = vpop.f32.mrf.mxu2  ;;  %v6349_v58 = vpack.c.bf16 %v1743_v27, %v1744_v51 }
 0x239   : > { %v974_v2 = vadd.f32 %v6153_v1, %v973_v41 }
 0x23a   : > { %10447 = vst [vmem:[#allocation35_spill] sm:$0xff] %v6349_v58 }
 0x23b   : > { %v6352_v7 = vmax.f32 %v974_v2, 0.0 }
 0x23d   : > { %v1720_v25 = vrot.slane %v6352_v7, 1 }
 0x23f   : > { %v1742_v36 = vsel %vm1731_vm2, %v1719_v50, %v1720_v25  ;;  %v5630_v50 = vld [vmem:[%s10052_s7 + $0x28] sm:$0xff] }
 0x240   : > { %v976_v30 = vpop.f32.mrf.mxu2 }
 0x241   : > { %v977_v56 = vadd.f32 %v6153_v1, %v976_v30  ;;  %v5631_v30 = vld [vmem:[%s10052_s7 + $0x30] sm:$0xff] }
 0x242   : > { %3727 = vmatpush.bf16.msrb.mxu3 %v5631_v30 }
 0x243   : > { %v6356_v34 = vmax.f32 %v977_v56, 0.0  ;;  %v5640_v56 = vld [vmem:[%s10052_s7 + $0x78] sm:$0xff] }
 0x244   : > { %3805 = vmatpush.bf16.msrb.mxu0 %v5640_v56 }
 0x245   : > { %v1721_v57 = vrot.slane %v6356_v34, 1 }
 0x246   : > { %3728 = vmatpush.bf16.msrb.mxu3 %v5630_v50  ;;  %v5638_v50 = vld [vmem:[%s10052_s7 + $0x68] sm:$0xff] }
 0x247   : > { %v1741_v27 = vsel %vm1731_vm2, %v1720_v25, %v1721_v57 }
 0x248   : > { %v978_v51 = vpop.f32.mrf.mxu2  ;;  %v6366_v41 = vpack.c.bf16 %v1741_v27, %v1742_v36  ;;  %v5648_v36 = vld [vmem:[%s10052_s7 + $0xb8] sm:$0xff] }
 0x249   : > { %v979_v2 = vadd.f32 %v6153_v1, %v978_v51  ;;  %v5656_v51 = vld [vmem:[%s10052_s7 + $0xf8] sm:$0xff]  ;;  %3884 = vmatpush.bf16.msra.mxu2 %v5648_v36 }
 0x24a   : > { %10448 = vst [vmem:[#allocation36_spill] sm:$0xff] %v6366_v41  ;;  %3963 = vmatpush.bf16.msra.mxu1 %v5656_v51 }
 0x24b   : > { %v6375_v47 = vmax.f32 %v979_v2, 0.0  ;;  %v5639_v2 = vld [vmem:[%s10052_s7 + $0x70] sm:$0xff] }
 0x24c   : > { %3806 = vmatpush.bf16.msrb.mxu0 %v5639_v2 }
 0x24d   : > { %v1722_v30 = vrot.slane %v6375_v47, 1  ;;  %3885 = vmatpush.bf16.msra.mxu2 %v5647_v22  ;;  %v5637_v22 = vld [vmem:[%s10052_s7 + $0x60] sm:$0xff] }
 0x24e   : > { %3964 = vmatpush.bf16.msra.mxu1 %v5655_v24  ;;  %v5628_v24 = vld [vmem:[%s10052_s7 + $0x18] sm:$0xff] }
 0x24f   : > { %v1740_v36 = vsel %vm1731_vm2, %v1721_v57, %v1722_v30  ;;  %v5645_v57 = vld [vmem:[%s10052_s7 + $0xa0] sm:$0xff] }
 0x250   : > { %v981_v25 = vpop.f32.mrf.mxu2  ;;  %3807 = vmatpush.bf16.msrb.mxu0 %v5638_v50  ;;  %v5636_v50 = vld [vmem:[%s10052_s7 + $0x58] sm:$0xff] }
 0x251   : > { %v982_v27 = vadd.f32 %v6153_v1, %v981_v25  ;;  %v5629_v25 = vld [vmem:[%s10052_s7 + $0x20] sm:$0xff]  ;;  %3886 = vmatpush.bf16.msra.mxu2 %v5646_v23 }
 0x252   : > { %3729 = vmatpush.bf16.msrb.mxu3 %v5629_v25  ;;  %v5654_v25 = vld [vmem:[%s10052_s7 + $0xe8] sm:$0xff] }
 0x253   : > { %v6391_v0 = vmax.f32 %v982_v27, 0.0  ;;  %3965 = vmatpush.bf16.msra.mxu1 %v5654_v25  ;;  %v5652_v25 = vld [vmem:[%s10052_s7 + $0xd8] sm:$0xff] }
 0x254   : > { %3808 = vmatpush.bf16.msrb.mxu0 %v5637_v22 }
 0x255   : > { %v1723_v56 = vrot.slane %v6391_v0, 1  ;;  %3887 = vmatpush.bf16.msra.mxu2 %v5645_v57 }
 0x256   : > { %3730 = vmatpush.bf16.msrb.mxu3 %v5628_v24 }
 0x257   : > { %v1739_v27 = vsel %vm1731_vm2, %v1722_v30, %v1723_v56  ;;  %v5653_v30 = vld [vmem:[%s10052_s7 + $0xe0] sm:$0xff] }
 0x258   : > { %v983_v51 = vpop.f32.mrf.mxu2  ;;  %v6410_v2 = vpack.c.bf16 %v1739_v27, %v1740_v36  ;;  %3966 = vmatpush.bf16.msra.mxu1 %v5653_v30  ;;  %3809 = vmatpush.bf16.msrb.mxu0 %v5636_v50  ;;  %v5627_v30 = vld [vmem:[%s10052_s7 + $0x10] sm:$0xff] }
 0x259   : > { %v984_v21 = vadd.f32 %v6153_v1, %v983_v51  ;;  %v5644_v51 = vld [vmem:[%s10052_s7 + $0x98] sm:$0xff]  ;;  %v5643_v50 = vld [vmem:[%s10052_s7 + $0x90] sm:$0xff] }
 0x25a   : > { %10449 = vst [vmem:[#allocation37_spill] sm:$0xff] %v6410_v2  ;;  %3888 = vmatpush.bf16.msra.mxu2 %v5644_v51  ;;  %3731 = vmatpush.bf16.msrb.mxu3 %v5627_v30  ;;  %v5626_v51 = vld [vmem:[%s10052_s7 + $0x8] sm:$0xff] }
 0x25b   : > { %v6434_v27 = vmax.f32 %v984_v21, 0.0  ;;  %v5635_v21 = vld [vmem:[%s10052_s7 + $0x50] sm:$0xff]  ;;  %v5642_v30 = vld [vmem:[%s10052_s7 + $0x88] sm:$0xff] }
 0x25c   : > { %3967 = vmatpush.bf16.msra.mxu1 %v5652_v25  ;;  %3810 = vmatpush.bf16.msrb.mxu0 %v5635_v21 }
 0x25d   : > { %v1724_v22 = vrot.slane %v6434_v27, 1 }
 0x25e   : > { %3889 = vmatpush.bf16.msra.mxu2 %v5643_v50  ;;  %v5633_v50 = vld [vmem:[%s10052_s7 + $0x40] sm:$0xff]  ;;  %3732 = vmatpush.bf16.msrb.mxu3 %v5626_v51  ;;  %v1031_v51 = vadd.s32 8, %v6160_v16 }
 0x25f   : > { %v1738_v21 = vsel %vm1731_vm2, %v1723_v56, %v1724_v22  ;;  %v5625_v56 = vld [vmem:[%s10052_s7] sm:$0xff] }
 0x260   : > { %v986_v23 = vpop.f32.mrf.mxu2  ;;  %v6498_v49 = vshra.s32 %v1031_v51, 4  ;;  %v6510_v18 = vand.u32 15, %v1031_v51 }
 0x261   : > { %v987_v36 = vadd.f32 %v6153_v1, %v986_v23  ;;  %v5651_v23 = vld [vmem:[%s10052_s7 + $0xd0] sm:$0xff] }
 0x262   : > { %3968 = vmatpush.bf16.msra.mxu1 %v5651_v23  ;;  %3890 = vmatpush.bf16.msra.mxu2 %v5642_v30  ;;  %v5649_v23 = vld [vmem:[%s10052_s7 + $0xc0] sm:$0xff]  ;;  %v5664_v30 = vld [vmem:[%s10052_s7 + $0x138] sm:$0xff]  ;;  %10452 = vst [vmem:[#allocation40_spill] sm:$0xff] %v6510_v18  ;;  %v6523_v51 = vadd.s32 1, %v6510_v18  ;;  %vm10100_vm8 = vcmp.lt.s32.totalorder %v6510_v18, 14  ;;  %vm1985_vm11 = vcmp.ge.s32.totalorder %v6498_v49, 0 }
 0x263   : > { %v6447_v24 = vmax.f32 %v987_v36, 0.0  ;;  %v5634_v36 = vld [vmem:[%s10052_s7 + $0x48] sm:$0xff]  ;;  %3733 = vmatpush.bf16.msrb.mxu3 %v5625_v56  ;;  %vm2013_vm12 = vcmp.lt.s32.totalorder %v6498_v49, 14 }
 0x264   : > { %3811 = vmatpush.bf16.msrb.mxu0 %v5634_v36  ;;  %10454 = vst [vmem:[#allocation42_spill] sm:$0xff] %v6523_v51  ;;  %vm10103_vm9 = vcmp.lt.s32.totalorder %v6523_v51, 14  ;;  %vm6580_vm15 = vmand %vm1985_vm11, %vm2013_vm12 }
 0x265   : > { %v1725_v57 = vrot.slane %v6447_v24, 1 }
 0x266   : > { %3969 = vmatpush.bf16.msra.mxu1 %v5650_v5 }
 0x267   : > { %v1737_v25 = vsel %vm1731_vm2, %v1724_v22, %v1725_v57  ;;  %v5641_v22 = vld [vmem:[%s10052_s7 + $0x80] sm:$0xff]  ;;  %4042 = vmatpush.bf16.msra.mxu3 %v5664_v30  ;;  %v1172_v30 = vadd.s32 4294967295, %v6498_v49 }
 0x268   : > { %v988_v63 = vpop.f32.mrf.mxu2  ;;  %v6469_v33 = vpack.c.bf16 %v1737_v25, %v1738_v21  ;;  %3812 = vmatpush.bf16.msrb.mxu0 %v5633_v50  ;;  %3891 = vmatpush.bf16.msra.mxu2 %v5641_v22 }
 0x269   : > { %v989_v26 = vadd.f32 %v6153_v1, %v988_v63  ;;  %vm1200_vm3 = vcmp.ge.s32.totalorder %v1172_v30, 0  ;;  %vm1228_vm4 = vcmp.lt.s32.totalorder %v1172_v30, 14 }
 0x26a   : > { %10450 = vst [vmem:[#allocation38_spill] sm:$0xff] %v6469_v33  ;;  %3970 = vmatpush.bf16.msra.mxu1 %v5649_v23  ;;  %vm6536_vm7 = vmand %vm1200_vm3, %vm1228_vm4 }
 0x26b   : > { %v6490_v36 = vmax.f32 %v989_v26, 0.0  ;;  %v6501_v26 = vshra.s32 %v6160_v16, 4  ;;  %vm6563_vm13 = vmand %vm6536_vm7, %vm10100_vm8 }
 0x26c   : > { %vm6576_vm14 = vmand %vm6536_vm7, %vm10103_vm9 }
 0x26d   : > { %v1726_v25 = vrot.slane %v6490_v36, 1  ;;  %v1171_v20 = vadd.s32 4294967295, %v6501_v26  ;;  %vm1984_vm3 = vcmp.ge.s32.totalorder %v6501_v26, 0  ;;  %vm2012_vm4 = vcmp.lt.s32.totalorder %v6501_v26, 14 }
 0x26e   : > { %vm6604_vm0 = vmand %vm1984_vm3, %vm2012_vm4 }
 0x26f   : > { %v1736_v22 = vsel %vm1731_vm2, %v1725_v57, %v1726_v25  ;;  %vm1199_vm5 = vcmp.ge.s32.totalorder %v1171_v20, 0  ;;  %vm1227_vm6 = vcmp.lt.s32.totalorder %v1171_v20, 14 }
 0x270   : > { %v991_v63 = vpop.f32.mrf.mxu2  ;;  %vm6548_vm10 = vmand %vm1199_vm5, %vm1227_vm6 }
 0x271   : > { %v992_v5 = vadd.f32 %v6153_v1, %v991_v63 }
 0x273   : > { %v1025_v21 = vmax.f32 %v992_v5, 0.0 }
 0x275   : > { %v1727_v50 = vrot.slane %v1025_v21, 1  ;;  %v1138_v19 = vrot.slane %v1025_v21, 7 }
 0x277   : > { %v1735_v56 = vsel %vm1731_vm2, %v1726_v25, %v1727_v50  ;;  %v10089_v25 = vrot.slane %v6490_v36, 7 }
 0x278   : > { %v993_v23 = vpop.f32.mrf.mxu2  ;;  %v6507_v63 = vpack.c.bf16 %v1735_v56, %v1736_v22  ;;  %v1086_v56 = vand.u32 15, %v6160_v16 }
 0x279   : > { %v994_v5 = vadd.f32 %v6153_v1, %v993_v23  ;;  %v1033_v23 = vadd.s32 24, %v6160_v16 }
 0x27a   : > { %10451 = vst [vmem:[#allocation39_spill] sm:$0xff] %v6507_v63 }
 0x27b   : > { %v6513_v17 = vmax.f32 %v994_v5, 0.0  ;;  %v1146_v5 = vsel %vm10114_vm1, %v10089_v25, %v1138_v19  ;;  %v10466_v25 = vmov 0  ;;  %v6608_v63 = vand.u32 15, %v1033_v23 }
 0x27c   : > { %v10467_v25 = vsel %vm6580_vm15, 4294967295, %v10466_v25 }
 0x27d   : > { %v10087_v60 = vrot.slane %v6513_v17, 7  ;;  %v1728_v59 = vrot.slane %v6513_v17, 1  ;;  %v6519_v57 = vpack.c.bf16 %v6513_v17, %v1025_v21  ;;  %10468 = vst [vmem:[#allocation46_spill] sm:$0xff] %v10467_v25  ;;  %v6692_v20 = vadd.s32 4294967295, %v6608_v63 }
 0x27e   : > { %v6722_v33 = vadd.s32 1, %v6608_v63 }
 0x27f   : > { %10453 = vst [vmem:[#allocation41_spill] sm:$0xff] %v6519_v57  ;;  %v1145_v21 = vsel %vm10114_vm1, %v1138_v19, %v10087_v60  ;;  %v1734_v15 = vsel %vm1731_vm2, %v1727_v50, %v1728_v59  ;;  %v1032_v60 = vadd.s32 16, %v6160_v16  ;;  %v5663_v50 = vld [vmem:[%s10052_s7 + $0x130] sm:$0xff] }
 0x280   : > { %v996_v22 = vpop.f32.mrf.mxu2  ;;  %v6541_v38 = vpack.c.bf16 %v1145_v21, %v1146_v5  ;;  %v6568_v21 = vadd.s32 4294967295, %v6510_v18  ;;  %v6570_v5 = vshra.s32 %v1033_v23, 4  ;;  %4043 = vmatpush.bf16.msra.mxu3 %v5663_v50  ;;  %10492 = vst [vmem:[#allocation52_spill] sm:$0xff] %v6692_v20 }
 0x281   : > { %v997_v30 = vadd.f32 %v6153_v1, %v996_v22  ;;  %v6554_v22 = vadd.s32 4294967295, %v1086_v56  ;;  %v6586_v54 = vshra.s32 %v1032_v60, 4 }
 0x282   : > { %10457 = vst [vmem:[#allocation43_spill] sm:$0xff] %v6541_v38  ;;  %vm10111_vm12 = vcmp.lt.s32.totalorder %v6568_v21, 14  ;;  %v1174_v18 = vadd.s32 4294967295, %v6570_v5  ;;  %v10470_v38 = vmov 0 }
 0x283   : > { %v1027_v14 = vmax.f32 %v997_v30, 0.0  ;;  %10460 = vst [vmem:[#allocation44_spill] sm:$0xff] %v6554_v22  ;;  %vm10107_vm6 = vcmp.ge.s32.totalorder %v6554_v22, 0  ;;  %v10471_v38 = vsel %vm6604_vm0, 4294967295, %v10470_v38  ;;  %vm6623_vm3 = vmand %vm6536_vm7, %vm10111_vm12 }
 0x284   : > { %10463 = vst [vmem:[#allocation45_spill] sm:$0xff] %v6568_v21  ;;  %vm6614_vm8 = vmand %vm6548_vm10, %vm10107_vm6  ;;  %v10484_v21 = vrot.slane %v6158_v12, 1  ;;  %vm10486_vm5 = vcmp.lt.s32.totalorder %v1174_v18, 14 }
 0x285   : > { %v1729_v30 = vrot.slane %v1027_v14, 1  ;;  %10472 = vst [vmem:[#allocation48_spill] sm:$0xff] %v10471_v38  ;;  %vm6631_vm4 = vmand %vm6604_vm0, %vm10107_vm6  ;;  %v10482_v38 = vrot.slane %v6513_v17, 7  ;;  %vm10487_vm6 = vcmp.ge.s32.totalorder %v1174_v18, 0 }
 0x286   : > { %vm6641_vm7 = vmand %vm6580_vm15, %vm10111_vm12 }
 0x287   : > { %v1733_v50 = vsel %vm1731_vm2, %v1728_v59, %v1729_v30  ;;  %v1140_v59 = vrot.slane %v1027_v14, 7  ;;  %vm10485_vm12 = vmpackc.low %vm6563_vm13, %vm6548_vm10 }
 0x288   : > { %v998_v53 = vpop.f32.mrf.mxu2  ;;  %v6601_v51 = vpack.c.bf16 %v1733_v50, %v1734_v15  ;;  %v1173_v15 = vadd.s32 4294967295, %v6586_v54  ;;  %v1088_v50 = vand.u32 15, %v1032_v60  ;;  %vm6676_vm0 = vmand %vm10487_vm6, %vm10486_vm5 }
 0x289   : > { %v999_v57 = vadd.f32 %v6153_v1, %v998_v53  ;;  %v1144_v22 = vsel %vm10114_vm1, %v10482_v38, %v1140_v59  ;;  %vm10495_vm5 = vmpackc.low %vm6623_vm3, %vm6614_vm8  ;;  %vm2014_vm3 = vcmp.lt.s32.totalorder %v6586_v54, 14  ;;  %v10506_v1 = vmov 0 }
 0x28a   : > { %10469 = vst [vmem:[#allocation47_spill] sm:$0xff] %v6601_v51  ;;  %vm1201_vm9 = vcmp.ge.s32.totalorder %v1173_v15, 0  ;;  %vm1229_vm11 = vcmp.lt.s32.totalorder %v1173_v15, 14  ;;  %vm10496_vm6 = vmpackc.low %vm6576_vm14, %vm6548_vm10  ;;  %vm10116_vm10 = vcmp.lt.s32.totalorder %v6692_v20, 14  ;;  %v1038_v20 = vadd.s32 64, %v6160_v16 }
 0x28b   : > { %v1028_v51 = vmax.f32 %v999_v57, 0.0  ;;  %vm6694_vm13 = vmand %vm1201_vm9, %vm1229_vm11  ;;  %vm10497_vm9 = vcmp.lt.s32.totalorder %v6608_v63, 14 }
 0x28c   : > { %vm6715_vm11 = vmand %vm6676_vm0, %vm10497_vm9 }
 0x28d   : > { %v1141_v60 = vrot.slane %v1028_v51, 7  ;;  %v1730_v57 = vrot.slane %v1028_v51, 1  ;;  %v6635_v23 = vpack.c.bf16 %v1028_v51, %v1027_v14  ;;  %v6654_v14 = vadd.s32 4294967295, %v1088_v50 }
 0x28e   : > { %v10483_v51 = vrot.slane %v6158_v12, 7 }
 0x28f   : > { %10479 = vst [vmem:[#allocation49_spill] sm:$0xff] %v6635_v23  ;;  %v1732_v17 = vsel %vm1731_vm2, %v1729_v30, %v1730_v57  ;;  %v1759_v38 = vsel %vm1731_vm2, %v1730_v57, %v10484_v21  ;;  %5245 = vmatmul.msk.bf16.vlgmr.msrb.gmra.mxu0 %vm10485_vm12, %v6635_v23  ;;  %v1143_v15 = vsel %vm10114_vm1, %v1140_v59, %v1141_v60  ;;  %vm5327_vm2 = vmpackc.low %vm6641_vm7, %vm6631_vm4  ;;  %v1035_v59 = vadd.s32 40, %v6160_v16 }
 0x290   : > { %v1170_v25 = vsel %vm10114_vm1, %v1141_v60, %v10483_v51  ;;  %v6683_v21 = vpack.c.bf16 %v1759_v38, %v1732_v17  ;;  %v6685_v30 = vpack.c.bf16 %v1143_v15, %v1144_v22  ;;  %vm10115_vm8 = vcmp.ge.s32.totalorder %v6654_v14, 0 }
 0x291   : > { %v6681_v12 = vpack.c.bf16 %v6183_v35, %v1170_v25  ;;  %v1034_v25 = vadd.s32 32, %v6160_v16  ;;  %vm1986_vm12 = vcmp.ge.s32.totalorder %v6586_v54, 0  ;;  %v6732_v19 = vshra.s32 %v1035_v59, 4  ;;  %vm6738_vm4 = vmand %vm6694_vm13, %vm10115_vm8 }
 0x292   : > { %10491 = vst [vmem:[#allocation51_spill] sm:$0xff] %v6683_v21  ;;  %5203 = vmatmul.msk.bf16.vlgmr.msrb.gmra.mxu3 %vm10495_vm5, %v6685_v30  ;;  %5287 = vmatmul.msk.bf16.vlgmr.msra.gmra.mxu2 %vm10496_vm6, %v6683_v21  ;;  %vm1987_vm7 = vcmp.ge.s32.totalorder %v6570_v5, 0  ;;  %vm6748_vm5 = vmand %vm6676_vm0, %vm10116_vm10  ;;  %vm10117_vm6 = vcmp.lt.s32.totalorder %v6722_v33, 14  ;;  %v10508_v60 = vmov 0  ;;  %v6789_v15 = vand.u32 15, %v1035_v59 }
 0x293   : > { %10490 = vst [vmem:[#allocation50_spill] sm:$0xff] %v6681_v12  ;;  %5329 = vmatmul.msk.bf16.vlgmr.msra.gmra.mxu1 %vm5327_vm2, %v6681_v12  ;;  %vm2015_vm2 = vcmp.lt.s32.totalorder %v6570_v5, 14  ;;  %v6753_v53 = vshra.s32 %v1034_v25, 4  ;;  %vm6755_vm9 = vmand %vm1986_vm12, %vm2014_vm3  ;;  %v1176_v57 = vadd.s32 4294967295, %v6732_v19  ;;  %v1090_v50 = vand.u32 15, %v1034_v25 }
 0x294   : > { %10500 = vst [vmem:[#allocation53_spill] sm:$0xff] %v6732_v19  ;;  %v10507_v1 = vsel %vm6755_vm9, 4294967295, %v10506_v1  ;;  %vm6759_vm1 = vmand %vm1987_vm7, %vm2015_vm2  ;;  %v6817_v35 = vadd.s32 4294967295, %v6789_v15  ;;  %v1037_v22 = vadd.s32 56, %v6160_v16  ;;  %v6840_v39 = vadd.s32 1, %v6789_v15 }
 0x295   : > { %10505 = vst [vmem:[#allocation54_spill] sm:$0xff] %v6753_v53  ;;  %v10509_v60 = vsel %vm6759_vm1, 4294967295, %v10508_v60  ;;  %vm6768_vm14 = vmand %vm6676_vm0, %vm10117_vm6  ;;  %v1175_v17 = vadd.s32 4294967295, %v6753_v53  ;;  %vm1204_vm7 = vcmp.ge.s32.totalorder %v1176_v57, 0  ;;  %vm1232_vm2 = vcmp.lt.s32.totalorder %v1176_v57, 14  ;;  %v5662_v57 = vld [vmem:[%s10052_s7 + $0x128] sm:$0xff] }
 0x296   : > { %vm6776_vm12 = vmand %vm6755_vm9, %vm10115_vm8  ;;  %10516 = vst [vmem:[#allocation55_spill] sm:$0xff] %v6789_v15  ;;  %v6814_v25 = vadd.s32 4294967295, %v1090_v50  ;;  %v1036_v51 = vadd.s32 48, %v6160_v16  ;;  %4044 = vmatpush.bf16.msra.mxu3 %v5662_v57  ;;  %v10536_v21 = vmov 0 }
 0x297   : > { %vm6785_vm3 = vmand %vm6759_vm1, %vm10116_vm10  ;;  %10521 = vst [vmem:[#allocation57_spill] sm:$0xff] %v6817_v35 }
 0x298   : > { %vm5204_vm0 = vmpackc.low %vm6748_vm5, %vm6738_vm4  ;;  %vm1203_vm4 = vcmp.ge.s32.totalorder %v1175_v17, 0  ;;  %vm1231_vm5 = vcmp.lt.s32.totalorder %v1175_v17, 14  ;;  %10520 = vst [vmem:[#allocation56_spill] sm:$0xff] %v6814_v25  ;;  %v6850_v17 = vshra.s32 %v1037_v22, 4  ;;  %v6871_v57 = vshra.s32 %v1036_v51, 4 }
 0x299   : > { %vm5288_vm8 = vmpackc.low %vm6768_vm14, %vm6694_vm13  ;;  %vm10120_vm14 = vcmp.lt.s32.totalorder %v6789_v15, 14  ;;  %10526 = vst [vmem:[#allocation58_spill] sm:$0xff] %v6840_v39  ;;  %v1092_v15 = vand.u32 15, %v1036_v51 }
 0x29a   : > { %vm10517_vm10 = vmpackc.low %vm6715_vm11, %vm6694_vm13  ;;  %10527 = vst [vmem:[#allocation59_spill] sm:$0xff] %v6850_v17  ;;  %v1178_v23 = vadd.s32 4294967295, %v6850_v17  ;;  %v1177_v51 = vadd.s32 4294967295, %v6871_v57 }
 0x29b   : > { %vm5330_vm6 = vmpackc.low %vm6785_vm3, %vm6776_vm12  ;;  %vm1988_vm12 = vcmp.ge.s32.totalorder %v6753_v53, 0  ;;  %vm2016_vm3 = vcmp.lt.s32.totalorder %v6753_v53, 14  ;;  %10532 = vst [vmem:[#allocation60_spill] sm:$0xff] %v6871_v57  ;;  %v6890_v53 = vand.u32 15, %v1037_v22  ;;  %v6913_v22 = vadd.s32 4294967295, %v1092_v15 }
 0x29c   : > { %vm6809_vm9 = vmand %vm1204_vm7, %vm1232_vm2  ;;  %vm1989_vm7 = vcmp.ge.s32.totalorder %v6732_v19, 0  ;;  %vm2017_vm2 = vcmp.lt.s32.totalorder %v6732_v19, 14  ;;  %v7024_v15 = vpack.c.bf16 %v6238_v61, %v6217_v10 }
 0x29d   : > { %vm6821_vm13 = vmand %vm1203_vm4, %vm1231_vm5  ;;  %vm10133_vm5 = vcmp.lt.s32.totalorder %v6840_v39, 14  ;;  %10541 = vst [vmem:[#allocation63_spill] sm:$0xff] %v6890_v53  ;;  %v6926_v38 = vadd.s32 4294967295, %v6890_v53  ;;  %v6957_v56 = vadd.s32 1, %v6890_v53 }
 0x29e   : > { %vm6831_vm11 = vmand %vm6809_vm9, %vm10120_vm14  ;;  %10547 = vst [vmem:[#allocation64_spill] sm:$0xff] %v6913_v22 }
 0x29f   : > { %5248 = vmatmul.msk.bf16.gmra.mxu0 %vm10517_vm10, %v6177_v37  ;;  %vm10128_vm10 = vcmp.lt.s32.totalorder %v6817_v35, 14  ;;  %vm6873_vm14 = vmand %vm1988_vm12, %vm2016_vm3  ;;  %vm10544_vm3 = vcmp.lt.s32.totalorder %v6817_v35, 14  ;;  %10549 = vst [vmem:[#allocation65_spill] sm:$0xff] %v6926_v38 }
 0x2a0   : > { %vm6866_vm4 = vmand %vm6809_vm9, %vm10128_vm10  ;;  %10556 = vst [vmem:[#allocation66_spill] sm:$0xff] %v6957_v56 }
 0x2a1   : > { %vm6886_vm10 = vmand %vm6809_vm9, %vm10133_vm5 }
 0x2a2   : > { %5206 = vmatmul.msk.bf16.gmra.mxu3 %vm5204_vm0, %v6681_v12  ;;  %5290 = vmatmul.msk.bf16.gmra.mxu2 %vm5288_vm8, %v6196_v62  ;;  %vm10132_vm8 = vcmp.ge.s32.totalorder %v6814_v25, 0  ;;  %v10533_v12 = vmov 0  ;;  %vm10548_vm5 = vmpackc.low %vm6831_vm11, %vm6821_vm13  ;;  %vm10140_vm11 = vcmp.lt.s32.totalorder %v6890_v53, 14  ;;  %v6979_v53 = vshra.s32 %v1038_v20, 4 }
 0x2a3   : > { %5332 = vmatmul.msk.bf16.gmra.mxu1 %vm5330_vm6, %v6214_v28  ;;  %vm6856_vm0 = vmand %vm6821_vm13, %vm10132_vm8  ;;  %v10534_v12 = vsel %vm6873_vm14, 4294967295, %v10533_v12 }
 0x2a4   : > { %10535 = vst [vmem:[#allocation61_spill] sm:$0xff] %v10534_v12  ;;  %vm6877_vm6 = vmand %vm1989_vm7, %vm2017_vm2  ;;  %vm1206_vm2 = vcmp.ge.s32.totalorder %v1178_v23, 0  ;;  %v10566_v12 = vmov 0 }
 0x2a5   : > { %v10537_v21 = vsel %vm6877_vm6, 4294967295, %v10536_v21  ;;  %vm6896_vm12 = vmand %vm6873_vm14, %vm10132_vm8  ;;  %vm1234_vm8 = vcmp.lt.s32.totalorder %v1178_v23, 14  ;;  %vm1233_vm14 = vcmp.lt.s32.totalorder %v1177_v51, 14  ;;  %v1039_v23 = vadd.s32 72, %v6160_v16  ;;  %10562 = vst [vmem:[#allocation68_spill] sm:$0xff] %v6979_v53 }
 0x2a6   : > { %10538 = vst [vmem:[#allocation62_spill] sm:$0xff] %v10537_v21  ;;  %vm6905_vm9 = vmand %vm6877_vm6, %vm10544_vm3  ;;  %v10581_v21 = vrot.slane %v6238_v61, 7  ;;  %v1041_v61 = vadd.s32 88, %v6160_v16 }
 0x2a7   : > { %vm5207_vm7 = vmpackc.low %vm6866_vm4, %vm6856_vm0  ;;  %vm1205_vm4 = vcmp.ge.s32.totalorder %v1177_v51, 0  ;;  %v6959_v50 = vshra.s32 %v1039_v23, 4  ;;  %v7011_v39 = vand.u32 15, %v1039_v23  ;;  %v5661_v51 = vld [vmem:[%s10052_s7 + $0x120] sm:$0xff]  ;;  %v10592_v23 = vmov 0 }
 0x2a8   : > { %vm5291_vm3 = vmpackc.low %vm6886_vm10, %vm6821_vm13  ;;  %vm10157_vm13 = vcmp.ge.s32.totalorder %v6913_v22, 0  ;;  %v7104_v59 = vshra.s32 %v1041_v61, 4  ;;  %4045 = vmatpush.bf16.msra.mxu3 %v5661_v51  ;;  %v10600_v51 = vmov 0  ;;  %v1043_v22 = vadd.s32 104, %v6160_v16 }
 0x2a9   : > { %vm5333_vm0 = vmpackc.low %vm6905_vm9, %vm6896_vm12  ;;  %10557 = vst [vmem:[#allocation67_spill] sm:$0xff] %v6959_v50  ;;  %vm1990_vm12 = vcmp.ge.s32.totalorder %v6871_v57, 0  ;;  %vm2018_vm9 = vcmp.lt.s32.totalorder %v6871_v57, 14  ;;  %v10563_v57 = vmov 0  ;;  %v1180_v35 = vadd.s32 4294967295, %v6959_v50 }
 0x2aa   : > { %vm6933_vm6 = vmand %vm1206_vm2, %vm1234_vm8  ;;  %vm10143_vm8 = vcmp.lt.s32.totalorder %v6926_v38, 14  ;;  %10570 = vst [vmem:[#allocation70_spill] sm:$0xff] %v7011_v39  ;;  %v7090_v25 = vadd.s32 1, %v7011_v39 }
 0x2ab   : > { %vm6943_vm10 = vmand %vm1205_vm4, %vm1233_vm14  ;;  %vm10156_vm4 = vcmp.lt.s32.totalorder %v6957_v56, 14  ;;  %v1094_v56 = vand.u32 15, %v1038_v20  ;;  %10591 = vst [vmem:[#allocation74_spill] sm:$0xff] %v7104_v59 }
 0x2ac   : > { %vm6965_vm14 = vmand %vm6943_vm10, %vm10157_vm13  ;;  %10590 = vst [vmem:[#allocation73_spill] sm:$0xff] %v7090_v25 }
 0x2af   : > { %5251 = vmatmul.msk.bf16.gmra.mxu0 %vm10548_vm5, %v6208_v31  ;;  %vm6952_vm5 = vmand %vm6933_vm6, %vm10140_vm11 }
 0x2b0   : > { %vm6988_vm11 = vmand %vm1990_vm12, %vm2018_vm9 }
 0x2b1   : > { %v10564_v57 = vsel %vm6988_vm11, 4294967295, %v10563_v57  ;;  %vm7007_vm12 = vmand %vm6933_vm6, %vm10156_vm4 }
 0x2b2   : > { %5209 = vmatmul.msk.bf16.gmra.mxu3 %vm5207_vm7, %v6214_v28  ;;  %5293 = vmatmul.msk.bf16.gmra.mxu2 %vm5291_vm3, %v6227_v52  ;;  %vm6975_vm7 = vmand %vm6933_vm6, %vm10143_vm8  ;;  %vm1991_vm3 = vcmp.ge.s32.totalorder %v6850_v17, 0  ;;  %10565 = vst [vmem:[#allocation69_spill] sm:$0xff] %v10564_v57  ;;  %v1120_v52 = vrot.slane %v6250_v13, 7  ;;  %vm10573_vm6 = vcmp.lt.s32.totalorder %v6926_v38, 14  ;;  %vm10577_vm8 = vcmp.lt.s32.totalorder %v6160_v16, 1 }
 0x2b3   : > { %5335 = vmatmul.msk.bf16.gmra.mxu1 %vm5333_vm0, %v6246_v44  ;;  %vm2019_vm0 = vcmp.lt.s32.totalorder %v6850_v17, 14  ;;  %v1179_v17 = vadd.s32 4294967295, %v6979_v53  ;;  %vm7018_vm9 = vmand %vm6988_vm11, %vm10157_vm13  ;;  %v7070_v38 = vadd.s32 4294967295, %v7011_v39 }
 0x2b4   : > { %vm6998_vm2 = vmand %vm1991_vm3, %vm2019_vm0  ;;  %vm1208_vm3 = vcmp.ge.s32.totalorder %v1180_v35, 0  ;;  %vm1236_vm0 = vcmp.lt.s32.totalorder %v1180_v35, 14  ;;  %v10576_v35 = vrot.slane %v6271_v4, 7 }
 0x2b5   : > { %v10567_v12 = vsel %vm6998_vm2, 4294967295, %v10566_v12  ;;  %vm7030_vm4 = vmand %vm6998_vm2, %vm10573_vm6  ;;  %vm1207_vm11 = vcmp.ge.s32.totalorder %v1179_v17, 0  ;;  %vm1235_vm1 = vcmp.lt.s32.totalorder %v1179_v17, 14  ;;  %v7061_v17 = vadd.s32 4294967295, %v1094_v56  ;;  %10586 = vst [vmem:[#allocation72_spill] sm:$0xff] %v7070_v38 }
 0x2b6   : > { %vm5294_vm13 = vmpackc.low %vm7007_vm12, %vm6943_vm10  ;;  %v1163_v20 = vsel %vm10577_vm8, %v1120_v52, %v10576_v35  ;;  %vm10180_vm12 = vcmp.lt.s32.totalorder %v7011_v39, 14  ;;  %v1040_v56 = vadd.s32 80, %v6160_v16  ;;  %v1182_v39 = vadd.s32 4294967295, %v7104_v59 }
 0x2b7   : > { %vm10578_vm6 = vmpackc.low %vm6952_vm5, %vm6943_vm10  ;;  %10583 = vst [vmem:[#allocation71_spill] sm:$0xff] %v7061_v17  ;;  %vm2020_vm5 = vcmp.lt.s32.totalorder %v6979_v53, 14 }
 0x2b8   : > { %vm7048_vm2 = vmand %vm1208_vm3, %vm1236_vm0 }
 0x2b9   : > { %vm10582_vm15 = vmmov %vm10577_vm8 }
 0x2ba   : > { %v1164_v35 = vsel %vm10582_vm15, %v10581_v21, %v1120_v52  ;;  %vm5336_vm8 = vmpackc.low %vm7030_vm4, %vm7018_vm9  ;;  %vm1993_vm4 = vcmp.ge.s32.totalorder %v6959_v50, 0  ;;  %vm2021_vm9 = vcmp.lt.s32.totalorder %v6959_v50, 14  ;;  %v7121_v21 = vshra.s32 %v1040_v56, 4 }
 0x2bb   : > { %v7063_v19 = vpack.c.bf16 %v1163_v20, %v1164_v35  ;;  %vm7065_vm10 = vmand %vm1207_vm11, %vm1235_vm1  ;;  %vm1992_vm11 = vcmp.ge.s32.totalorder %v6979_v53, 0  ;;  %v1122_v50 = vrot.slane %v6275_v55, 7  ;;  %v10624_v20 = vmov 0 }
 0x2bc   : > { %vm10587_vm15 = vmpackc.low %vm6975_vm7, %vm6965_vm14  ;;  %vm10179_vm7 = vcmp.lt.s32.totalorder %v7070_v38, 14  ;;  %10597 = vst [vmem:[#allocation76_spill] sm:$0xff] %v7121_v21  ;;  %v1181_v57 = vadd.s32 4294967295, %v7121_v21  ;;  %v1096_v38 = vand.u32 15, %v1040_v56  ;;  %v1042_v56 = vadd.s32 96, %v6160_v16 }
 0x2bd   : > { %vm7084_vm1 = vmand %vm7048_vm2, %vm10180_vm12  ;;  %vm10611_vm12 = vcmp.lt.s32.totalorder %v6160_v16, 1 }
 0x2be   : > { %vm5255_vm14 = vmpackc.low %vm7084_vm1, %vm7065_vm10  ;;  %v7202_v52 = vadd.s32 4294967295, %v1096_v38  ;;  %v7252_v10 = vshra.s32 %v1042_v56, 4  ;;  %v5660_v38 = vld [vmem:[%s10052_s7 + $0x118] sm:$0xff] }
 0x2bf   : > { %5254 = vmatmul.msk.bf16.gmra.mxu0 %vm10578_vm6, %v7024_v15  ;;  %vm7108_vm3 = vmand %vm1992_vm11, %vm2020_vm5  ;;  %vm10183_vm6 = vcmp.lt.s32.totalorder %v7090_v25, 14  ;;  %v7163_v25 = vand.u32 15, %v1041_v61  ;;  %v10610_v61 = vrot.slane %v6296_v6, 7  ;;  %4046 = vmatpush.bf16.msra.mxu3 %v5660_v38  ;;  %v10693_v38 = vmov 0 }
 0x2c0   : > { %v10593_v23 = vsel %vm7108_vm3, 4294967295, %v10592_v23  ;;  %vm7141_vm11 = vmand %vm7048_vm2, %vm10183_vm6  ;;  %vm1237_vm6 = vcmp.lt.s32.totalorder %v1181_v57, 14  ;;  %10616 = vst [vmem:[#allocation79_spill] sm:$0xff] %v7202_v52 }
 0x2c1   : > { %10594 = vst [vmem:[#allocation75_spill] sm:$0xff] %v10593_v23  ;;  %v1161_v23 = vsel %vm10611_vm12, %v1122_v50, %v10610_v61 }
 0x2c2   : > { %5212 = vmatmul.msk.bf16.gmra.mxu3 %vm10587_vm15, %v6246_v44  ;;  %5296 = vmatmul.msk.bf16.gmra.mxu2 %vm5294_vm13, %v6259_v48  ;;  %vm10177_vm13 = vcmp.ge.s32.totalorder %v7061_v17, 0  ;;  %vm7131_vm15 = vmand %vm1993_vm4, %vm2021_vm9  ;;  %10609 = vst [vmem:[#allocation78_spill] sm:$0xff] %v7163_v25  ;;  %v7167_v17 = vpack.c.bf16 %v6271_v4, %v6250_v13  ;;  %vm1210_vm9 = vcmp.ge.s32.totalorder %v1182_v39, 0  ;;  %v10612_v13 = vrot.slane %v6271_v4, 7 }
 0x2c3   : > { %5338 = vmatmul.msk.bf16.gmra.mxu1 %vm5336_vm8, %v7063_v19  ;;  %vm7116_vm0 = vmand %vm7065_vm10, %vm10177_vm13  ;;  %v10601_v51 = vsel %vm7131_vm15, 4294967295, %v10600_v51  ;;  %v7211_v4 = vadd.s32 4294967295, %v7163_v25  ;;  %10629 = vst [vmem:[#allocation84_spill] sm:$0xff] %v7252_v10 }
 0x2c4   : > { %vm7127_vm8 = vmand %vm7048_vm2, %vm10179_vm7  ;;  %10602 = vst [vmem:[#allocation77_spill] sm:$0xff] %v10601_v51  ;;  %v7276_v51 = vand.u32 15, %v1043_v22 }
 0x2c5   : > { %vm7149_vm5 = vmand %vm7108_vm3, %vm10177_vm13  ;;  %vm1238_vm13 = vcmp.lt.s32.totalorder %v1182_v39, 14  ;;  %vm10198_vm3 = vcmp.lt.s32.totalorder %v7163_v25, 14  ;;  %10619 = vst [vmem:[#allocation80_spill] sm:$0xff] %v7211_v4  ;;  %v7290_v39 = vpack.c.bf16 %v6296_v6, %v6275_v55 }
 0x2c6   : > { %vm7159_vm2 = vmand %vm7131_vm15, %vm10179_vm7  ;;  %10637 = vst [vmem:[#allocation86_spill] sm:$0xff] %v7276_v51  ;;  %v7366_v35 = vadd.s32 1, %v7276_v51 }
 0x2c7   : > { %vm5213_vm4 = vmpackc.low %vm7127_vm8, %vm7116_vm0  ;;  %vm1209_vm8 = vcmp.ge.s32.totalorder %v1181_v57, 0 }
 0x2c8   : > { %vm5297_vm7 = vmpackc.low %vm7141_vm11, %vm7065_vm10  ;;  %10654 = vst [vmem:[#allocation89_spill] sm:$0xff] %v7366_v35 }
 0x2c9   : > { %vm5339_vm0 = vmpackc.low %vm7159_vm2, %vm7149_vm5  ;;  %vm10200_vm5 = vcmp.lt.s32.totalorder %v7211_v4, 14  ;;  %vm1995_vm2 = vcmp.ge.s32.totalorder %v7104_v59, 0  ;;  %v7321_v4 = vadd.s32 4294967295, %v7276_v51 }
 0x2ca   : > { %vm10613_vm11 = vmmov %vm10611_vm12 }
 0x2cb   : > { %v1162_v53 = vsel %vm10613_vm11, %v10612_v13, %v1122_v50  ;;  %vm7195_vm12 = vmand %vm1210_vm9, %vm1238_vm13  ;;  %v7224_v50 = vadd.s32 1, %v7163_v25  ;;  %vm1994_vm13 = vcmp.ge.s32.totalorder %v7121_v21, 0  ;;  %10645 = vst [vmem:[#allocation88_spill] sm:$0xff] %v7321_v4  ;;  %v1046_v13 = vadd.s32 128, %v6160_v16 }
 0x2cc   : > { %v7200_v18 = vpack.c.bf16 %v1161_v23, %v1162_v53  ;;  %vm7206_vm10 = vmand %vm1209_vm8, %vm1237_vm6  ;;  %v7235_v23 = vshra.s32 %v1043_v22, 4  ;;  %v10632_v53 = vmov 0 }
 0x2cd   : > { %vm7219_vm1 = vmand %vm7195_vm12, %vm10198_vm3  ;;  %10622 = vst [vmem:[#allocation81_spill] sm:$0xff] %v7224_v50  ;;  %vm10199_vm8 = vcmp.lt.s32.totalorder %v7224_v50, 14  ;;  %v1126_v50 = vrot.slane %v6314_v42, 7 }
 0x2ce   : > { %vm5258_vm6 = vmpackc.low %vm7219_vm1, %vm7206_vm10  ;;  %10623 = vst [vmem:[#allocation82_spill] sm:$0xff] %v7235_v23  ;;  %v1184_v25 = vadd.s32 4294967295, %v7235_v23 }
 0x2cf   : > { %5257 = vmatmul.msk.bf16.gmra.mxu0 %vm5255_vm14, %v7167_v17  ;;  %vm2022_vm14 = vcmp.lt.s32.totalorder %v7121_v21, 14  ;;  %vm7258_vm11 = vmand %vm7195_vm12, %vm10200_vm5  ;;  %v7433_v21 = vpack.c.bf16 %v6310_v29, %v6300_v3 }
 0x2d0   : > { %vm7239_vm9 = vmand %vm1994_vm13, %vm2022_vm14  ;;  %vm1212_vm3 = vcmp.ge.s32.totalorder %v1184_v25, 0 }
 0x2d1   : > { %v10625_v20 = vsel %vm7239_vm9, 4294967295, %v10624_v20  ;;  %vm7272_vm14 = vmand %vm7195_vm12, %vm10199_vm8  ;;  %vm1240_vm8 = vcmp.lt.s32.totalorder %v1184_v25, 14 }
 0x2d2   : > { %5215 = vmatmul.msk.bf16.gmra.mxu3 %vm5213_vm4, %v7063_v19  ;;  %5299 = vmatmul.msk.bf16.gmra.mxu2 %vm5297_vm7, %v6284_v11  ;;  %vm10195_vm7 = vcmp.ge.s32.totalorder %v7202_v52, 0  ;;  %vm2023_vm4 = vcmp.lt.s32.totalorder %v7104_v59, 14  ;;  %10626 = vst [vmem:[#allocation83_spill] sm:$0xff] %v10625_v20  ;;  %v1098_v59 = vand.u32 15, %v1042_v56  ;;  %v1124_v11 = vrot.slane %v6300_v3, 7  ;;  %v5672_v3 = vld [vmem:[%s10052_s7 + $0x178] sm:$0xff] }
 0x2d3   : > { %5341 = vmatmul.msk.bf16.gmra.mxu1 %vm5339_vm0, %v7200_v18  ;;  %vm7247_vm0 = vmand %vm7206_vm10, %vm10195_vm7  ;;  %v1183_v56 = vadd.s32 4294967295, %v7252_v10  ;;  %v10642_v52 = vrot.slane %v6310_v29, 7  ;;  %4121 = vmatpush.bf16.msra.mxu0 %v5672_v3 }
 0x2d4   : > { %vm7263_vm13 = vmand %vm1995_vm2, %vm2023_vm4  ;;  %v7308_v55 = vadd.s32 4294967295, %v1098_v59  ;;  %v1045_v59 = vadd.s32 120, %v6160_v16 }
 0x2d5   : > { %v10633_v53 = vsel %vm7263_vm13, 4294967295, %v10632_v53  ;;  %vm7283_vm2 = vmand %vm7239_vm9, %vm10195_vm7  ;;  %vm10643_vm7 = vcmp.lt.s32.totalorder %v6160_v16, 1  ;;  %vm1211_vm1 = vcmp.ge.s32.totalorder %v1183_v56, 0 }
 0x2d6   : > { %10634 = vst [vmem:[#allocation85_spill] sm:$0xff] %v10633_v53  ;;  %vm7296_vm12 = vmand %vm7263_vm13, %vm10200_vm5  ;;  %v1159_v20 = vsel %vm10643_vm7, %v1124_v11, %v10642_v52  ;;  %v10646_v52 = vrot.slane %v6296_v6, 7  ;;  %v7368_v61 = vshra.s32 %v1045_v59, 4  ;;  %v7420_v53 = vand.u32 15, %v1045_v59 }
 0x2d7   : > { %10644 = vst [vmem:[#allocation87_spill] sm:$0xff] %v7308_v55  ;;  %vm5300_vm5 = vmpackc.low %vm7272_vm14, %vm7206_vm10  ;;  %vm10202_vm14 = vcmp.lt.s32.totalorder %v7276_v51, 14  ;;  %v10664_v51 = vmov 0 }
 0x2d8   : > { %v1160_v25 = vsel %vm10643_vm7, %v10646_v52, %v1124_v11  ;;  %vm5342_vm4 = vmpackc.low %vm7296_vm12, %vm7283_vm2  ;;  %vm10203_vm2 = vcmp.ge.s32.totalorder %v7308_v55, 0  ;;  %v1044_v11 = vadd.s32 112, %v6160_v16  ;;  %10655 = vst [vmem:[#allocation90_spill] sm:$0xff] %v7368_v61  ;;  %vm2024_vm12 = vcmp.lt.s32.totalorder %v7252_v10, 14 }
 0x2d9   : > { %v7332_v57 = vpack.c.bf16 %v1159_v20, %v1160_v25  ;;  %vm7334_vm10 = vmand %vm1212_vm3, %vm1240_vm8  ;;  %vm10204_vm8 = vcmp.lt.s32.totalorder %v7321_v4, 14  ;;  %v10661_v52 = vmov 0  ;;  %v1186_v25 = vadd.s32 4294967295, %v7368_v61  ;;  %10669 = vst [vmem:[#allocation94_spill] sm:$0xff] %v7420_v53 }
 0x2da   : > { %vm10649_vm7 = vmpackc.low %vm7258_vm11, %vm7247_vm0  ;;  %vm1996_vm11 = vcmp.ge.s32.totalorder %v7252_v10, 0  ;;  %v7388_v22 = vshra.s32 %v1044_v11, 4  ;;  %v10681_v10 = vrot.slane %v6310_v29, 7  ;;  %v1047_v29 = vadd.s32 136, %v6160_v16 }
 0x2dc   : > { %10660 = vst [vmem:[#allocation91_spill] sm:$0xff] %v7388_v22 }
 0x2df   : > { %5260 = vmatmul.msk.bf16.gmra.mxu0 %vm5258_vm6, %v7290_v39  ;;  %vm1239_vm6 = vcmp.lt.s32.totalorder %v1183_v56, 14  ;;  %v7510_v56 = vshra.s32 %v1047_v29, 4 }
 0x2e0   : > { %vm7349_vm3 = vmand %vm1211_vm1, %vm1239_vm6  ;;  %vm1997_vm6 = vcmp.ge.s32.totalorder %v7235_v23, 0 }
 0x2e1   : > { %vm7374_vm0 = vmand %vm7349_vm3, %vm10203_vm2  ;;  %10692 = vst [vmem:[#allocation99_spill] sm:$0xff] %v7510_v56 }
 0x2e2   : > { %5218 = vmatmul.msk.bf16.gmra.mxu3 %vm10649_vm7, %v7200_v18  ;;  %5302 = vmatmul.msk.bf16.gmra.mxu2 %vm5300_vm5, %v6307_v40  ;;  %vm7361_vm5 = vmand %vm7334_vm10, %vm10202_vm14  ;;  %vm2025_vm7 = vcmp.lt.s32.totalorder %v7235_v23, 14  ;;  %vm10215_vm14 = vcmp.lt.s32.totalorder %v7366_v35, 14  ;;  %v1185_v23 = vadd.s32 4294967295, %v7388_v22  ;;  %v1100_v35 = vand.u32 15, %v1044_v11 }
 0x2e3   : > { %5344 = vmatmul.msk.bf16.gmra.mxu1 %vm5342_vm4, %v7332_v57  ;;  %vm7384_vm4 = vmand %vm7334_vm10, %vm10204_vm8  ;;  %vm1242_vm8 = vcmp.lt.s32.totalorder %v1186_v25, 14 }
 0x2e4   : > { %vm7397_vm2 = vmand %vm1996_vm11, %vm2024_vm12  ;;  %vm10670_vm12 = vcmp.ge.s32.totalorder %v7308_v55, 0  ;;  %vm1213_vm9 = vcmp.ge.s32.totalorder %v1185_v23, 0  ;;  %vm1241_vm13 = vcmp.lt.s32.totalorder %v1185_v23, 14  ;;  %v7470_v23 = vadd.s32 4294967295, %v1100_v35 }
 0x2e5   : > { %v10662_v52 = vsel %vm7397_vm2, 4294967295, %v10661_v52  ;;  %vm7407_vm1 = vmand %vm1997_vm6, %vm2025_vm7  ;;  %vm1214_vm7 = vcmp.ge.s32.totalorder %v1186_v25, 0  ;;  %v10676_v25 = vrot.slane %v6324_v9, 7  ;;  %v7499_v35 = vadd.s32 1, %v7420_v53 }
 0x2e6   : > { %10663 = vst [vmem:[#allocation92_spill] sm:$0xff] %v10662_v52  ;;  %v10665_v51 = vsel %vm7407_vm1, 4294967295, %v10664_v51  ;;  %vm7416_vm11 = vmand %vm7334_vm10, %vm10215_vm14  ;;  %vm10673_vm10 = vcmp.lt.s32.totalorder %v7321_v4, 14  ;;  %v7479_v4 = vadd.s32 4294967295, %v7420_v53  ;;  %v7551_v52 = vand.u32 15, %v1047_v29 }
 0x2e7   : > { %10666 = vst [vmem:[#allocation93_spill] sm:$0xff] %v10665_v51  ;;  %vm7427_vm6 = vmand %vm7397_vm2, %vm10670_vm12  ;;  %vm10677_vm2 = vcmp.lt.s32.totalorder %v6160_v16, 1  ;;  %v7573_v29 = vpack.c.bf16 %v6324_v9, %v6314_v42  ;;  %v5659_v51 = vld [vmem:[%s10052_s7 + $0x110] sm:$0xff]  ;;  %v7711_v55 = vpack.c.bf16 %v6338_v43, %v6328_v32 }
 0x2e8   : > { %vm7439_vm14 = vmand %vm7407_vm1, %vm10673_vm10  ;;  %v1157_v11 = vsel %vm10677_vm2, %v1126_v50, %v10676_v25  ;;  %10683 = vst [vmem:[#allocation95_spill] sm:$0xff] %v7470_v23  ;;  %4047 = vmatpush.bf16.msra.mxu3 %v5659_v51  ;;  %v10732_v51 = vmov 0 }
 0x2e9   : > { %vm5303_vm12 = vmpackc.low %vm7416_vm11, %vm7349_vm3  ;;  %vm10240_vm11 = vcmp.lt.s32.totalorder %v7420_v53, 14  ;;  %10687 = vst [vmem:[#allocation97_spill] sm:$0xff] %v7479_v4  ;;  %v1188_v53 = vadd.s32 4294967295, %v7510_v56 }
 0x2ea   : > { %vm10678_vm10 = vmpackc.low %vm7361_vm5, %vm7349_vm3  ;;  %10691 = vst [vmem:[#allocation98_spill] sm:$0xff] %v7499_v35 }
 0x2eb   : > { %vm7457_vm1 = vmand %vm1214_vm7, %vm1242_vm8  ;;  %vm10236_vm8 = vcmp.ge.s32.totalorder %v7470_v23, 0  ;;  %10706 = vst [vmem:[#allocation103_spill] sm:$0xff] %v7551_v52 }
 0x2ec   : > { %vm10682_vm15 = vmmov %vm10677_vm2  ;;  %10711 = vst [vmem:[#allocation104_spill] sm:$0xff] %v7573_v29 }
 0x2ed   : > { %v1158_v25 = vsel %vm10682_vm15, %v10681_v10, %v1126_v50  ;;  %vm5345_vm2 = vmpackc.low %vm7439_vm14, %vm7427_vm6  ;;  %vm2026_vm14 = vcmp.lt.s32.totalorder %v7388_v22, 14  ;;  %vm2027_vm6 = vcmp.lt.s32.totalorder %v7368_v61, 14  ;;  %v7649_v10 = vadd.s32 1, %v7551_v52  ;;  %10743 = vst [vmem:[#allocation114_spill] sm:$0xff] %v7711_v55 }
 0x2ee   : > { %v7472_v6 = vpack.c.bf16 %v1157_v11, %v1158_v25  ;;  %vm7474_vm3 = vmand %vm1213_vm9, %vm1241_vm13  ;;  %vm1998_vm13 = vcmp.ge.s32.totalorder %v7388_v22, 0  ;;  %v7527_v11 = vshra.s32 %v1046_v13, 4  ;;  %v10701_v25 = vmov 0 }
 0x2ef   : > { %5263 = vmatmul.msk.bf16.gmra.mxu0 %vm10678_vm10, %v7433_v21  ;;  %vm10688_vm15 = vmpackc.low %vm7384_vm4, %vm7374_vm0  ;;  %vm10238_vm0 = vcmp.lt.s32.totalorder %v7479_v4, 14  ;;  %vm1999_vm4 = vcmp.ge.s32.totalorder %v7368_v61, 0  ;;  %vm10243_vm10 = vcmp.lt.s32.totalorder %v7499_v35, 14  ;;  %v1102_v61 = vand.u32 15, %v1046_v13  ;;  %10727 = vst [vmem:[#allocation108_spill] sm:$0xff] %v7649_v10 }
 0x2f0   : > { %10684 = vst [vmem:[#allocation96_spill] sm:$0xff] %v7472_v6  ;;  %vm7493_vm9 = vmand %vm7457_vm1, %vm10240_vm11  ;;  %v1187_v13 = vadd.s32 4294967295, %v7527_v11  ;;  %v1128_v22 = vrot.slane %v6328_v32, 7  ;;  %v10713_v4 = vrot.slane %v6338_v43, 7  ;;  %vm10714_vm11 = vcmp.lt.s32.totalorder %v6160_v16, 1 }
 0x2f1   : > { %vm5264_vm5 = vmpackc.low %vm7493_vm9, %vm7474_vm3  ;;  %10698 = vst [vmem:[#allocation101_spill] sm:$0xff] %v7527_v11  ;;  %v7579_v23 = vadd.s32 4294967295, %v1102_v61  ;;  %v1049_v61 = vadd.s32 152, %v6160_v16 }
 0x2f2   : > { %5221 = vmatmul.msk.bf16.gmra.mxu3 %vm10688_vm15, %v7332_v57  ;;  %5305 = vmatmul.msk.bf16.gmra.mxu2 %vm5303_vm12, %v6321_v8  ;;  %vm7514_vm7 = vmand %vm1998_vm13, %vm2026_vm14  ;;  %v1155_v42 = vsel %vm10714_vm11, %v1128_v22, %v10713_v4  ;;  %v5658_v8 = vld [vmem:[%s10052_s7 + $0x108] sm:$0xff] }
 0x2f3   : > { %5347 = vmatmul.msk.bf16.gmra.mxu1 %vm5345_vm2, %v7472_v6  ;;  %v10694_v38 = vsel %vm7514_vm7, 4294967295, %v10693_v38  ;;  %vm7522_vm12 = vmand %vm7474_vm3, %vm10236_vm8  ;;  %10712 = vst [vmem:[#allocation105_spill] sm:$0xff] %v7579_v23  ;;  %4048 = vmatpush.bf16.msra.mxu3 %v5658_v8  ;;  %v10782_v8 = vrot.slane %v6375_v47, 7 }
 0x2f4   : > { %10695 = vst [vmem:[#allocation100_spill] sm:$0xff] %v10694_v38  ;;  %vm7533_vm2 = vmand %vm7457_vm1, %vm10238_vm0  ;;  %v7590_v38 = vadd.s32 4294967295, %v7551_v52 }
 0x2f5   : > { %vm7537_vm15 = vmand %vm1999_vm4, %vm2027_vm6  ;;  %vm1216_vm6 = vcmp.ge.s32.totalorder %v1188_v53, 0  ;;  %vm1243_vm4 = vcmp.lt.s32.totalorder %v1187_v13, 14 }
 0x2f6   : > { %v10702_v25 = vsel %vm7537_vm15, 4294967295, %v10701_v25  ;;  %vm7547_vm13 = vmand %vm7457_vm1, %vm10243_vm10  ;;  %10715 = vst [vmem:[#allocation106_spill] sm:$0xff] %v7590_v38  ;;  %vm1215_vm10 = vcmp.ge.s32.totalorder %v1187_v13, 0  ;;  %v7651_v13 = vshra.s32 %v1049_v61, 4 }
 0x2f7   : > { %10703 = vst [vmem:[#allocation102_spill] sm:$0xff] %v10702_v25  ;;  %vm7557_vm14 = vmand %vm7514_vm7, %vm10236_vm8  ;;  %vm1244_vm8 = vcmp.lt.s32.totalorder %v1188_v53, 14  ;;  %v10716_v53 = vrot.slane %v6324_v9, 7  ;;  %v7698_v25 = vand.u32 15, %v1049_v61 }
 0x2f8   : > { %vm7567_vm1 = vmand %vm7537_vm15, %vm10238_vm0  ;;  %vm10248_vm15 = vcmp.lt.s32.totalorder %v7551_v52, 14  ;;  %10728 = vst [vmem:[#allocation109_spill] sm:$0xff] %v7651_v13  ;;  %v10735_v52 = vmov 0 }
 0x2f9   : > { %vm5306_vm0 = vmpackc.low %vm7547_vm13, %vm7474_vm3  ;;  %v1156_v4 = vsel %vm10714_vm11, %v10716_v53, %v1128_v22  ;;  %vm10261_vm3 = vcmp.ge.s32.totalorder %v7579_v23, 0  ;;  %v1048_v22 = vadd.s32 144, %v6160_v16  ;;  %vm10262_vm11 = vcmp.lt.s32.totalorder %v7649_v10, 14  ;;  %10740 = vst [vmem:[#allocation113_spill] sm:$0xff] %v7698_v25 }
 0x2fa   : > { %vm5348_vm13 = vmpackc.low %vm7567_vm1, %vm7557_vm14  ;;  %v7612_v20 = vpack.c.bf16 %v1155_v42, %v1156_v4  ;;  %vm2028_vm14 = vcmp.lt.s32.totalorder %v7527_v11, 14  ;;  %v1190_v4 = vadd.s32 4294967295, %v7651_v13  ;;  %v7751_v50 = vadd.s32 4294967295, %v7698_v25 }
 0x2fb   : > { %vm7606_vm7 = vmand %vm1216_vm6, %vm1244_vm8  ;;  %v7666_v53 = vshra.s32 %v1048_v22, 4  ;;  %vm2029_vm6 = vcmp.lt.s32.totalorder %v7510_v56, 14  ;;  %v1104_v35 = vand.u32 15, %v1048_v22  ;;  %v10746_v22 = vrot.slane %v6352_v7, 7 }
 0x2fc   : > { %10719 = vst [vmem:[#allocation107_spill] sm:$0xff] %v7612_v20  ;;  %vm10720_vm9 = vmpackc.low %vm7533_vm2, %vm7522_vm12  ;;  %vm2000_vm2 = vcmp.ge.s32.totalorder %v7527_v11, 0  ;;  %v7788_v11 = vadd.s32 1, %v7698_v25  ;;  %v10767_v10 = vmov 0 }
 0x2fd   : > { %vm7622_vm8 = vmand %vm1215_vm10, %vm1243_vm4  ;;  %10731 = vst [vmem:[#allocation110_spill] sm:$0xff] %v7666_v53  ;;  %vm2001_vm4 = vcmp.ge.s32.totalorder %v7510_v56, 0  ;;  %v1189_v56 = vadd.s32 4294967295, %v7666_v53 }
 0x2fe   : > { %vm7636_vm12 = vmand %vm7606_vm7, %vm10248_vm15  ;;  %10753 = vst [vmem:[#allocation116_spill] sm:$0xff] %v7751_v50 }
 0x2ff   : > { %5266 = vmatmul.msk.bf16.gmra.mxu0 %vm5264_vm5, %v7573_v29  ;;  %vm10263_vm5 = vcmp.lt.s32.totalorder %v7590_v38, 14  ;;  %vm7685_vm15 = vmand %vm2001_vm4, %vm2029_vm6  ;;  %vm1246_vm4 = vcmp.lt.s32.totalorder %v1190_v4, 14  ;;  %vm1245_vm1 = vcmp.lt.s32.totalorder %v1189_v56, 14  ;;  %vm10277_vm6 = vcmp.lt.s32.totalorder %v7698_v25, 14  ;;  %10760 = vst [vmem:[#allocation117_spill] sm:$0xff] %v7788_v11 }
 0x300   : > { %vm7660_vm10 = vmand %vm7606_vm7, %vm10263_vm5  ;;  %v10736_v52 = vsel %vm7685_vm15, 4294967295, %v10735_v52  ;;  %v7740_v38 = vadd.s32 4294967295, %v1104_v35  ;;  %v1051_v35 = vadd.s32 168, %v6160_v16  ;;  %v1050_v29 = vadd.s32 160, %v6160_v16 }
 0x301   : > { %10737 = vst [vmem:[#allocation112_spill] sm:$0xff] %v10736_v52 }
 0x302   : > { %5224 = vmatmul.msk.bf16.gmra.mxu3 %vm10720_vm9, %v7472_v6  ;;  %5308 = vmatmul.msk.bf16.gmra.mxu2 %vm5306_vm0, %v6335_v46  ;;  %vm7644_vm0 = vmand %vm7622_vm8, %vm10261_vm3  ;;  %v1130_v46 = vrot.slane %v6342_v45, 7  ;;  %10751 = vst [vmem:[#allocation115_spill] sm:$0xff] %v7740_v38  ;;  %v7798_v61 = vshra.s32 %v1051_v35, 4 }
 0x303   : > { %5350 = vmatmul.msk.bf16.gmra.mxu1 %vm5348_vm13, %v7612_v20  ;;  %vm7680_vm9 = vmand %vm2000_vm2, %vm2028_vm14  ;;  %vm1218_vm14 = vcmp.ge.s32.totalorder %v1190_v4, 0 }
 0x304   : > { %v10733_v51 = vsel %vm7680_vm9, 4294967295, %v10732_v51  ;;  %vm7694_vm13 = vmand %vm7606_vm7, %vm10262_vm11  ;;  %vm1217_vm11 = vcmp.ge.s32.totalorder %v1189_v56, 0  ;;  %10761 = vst [vmem:[#allocation118_spill] sm:$0xff] %v7798_v61 }
 0x305   : > { %10734 = vst [vmem:[#allocation111_spill] sm:$0xff] %v10733_v51  ;;  %vm7705_vm2 = vmand %vm7680_vm9, %vm10261_vm3  ;;  %vm10747_vm3 = vcmp.lt.s32.totalorder %v6160_v16, 1 }
 0x306   : > { %vm7717_vm7 = vmand %vm7685_vm15, %vm10263_vm5  ;;  %v1153_v4 = vsel %vm10747_vm3, %v1130_v46, %v10746_v22  ;;  %v10752_v22 = vrot.slane %v6338_v43, 7 }
 0x307   : > { %vm10748_vm5 = vmpackc.low %vm7636_vm12, %vm7622_vm8 }
 0x308   : > { %vm7735_vm9 = vmand %vm1218_vm14, %vm1246_vm4  ;;  %v1154_v56 = vsel %vm10747_vm3, %v10752_v22, %v1130_v46  ;;  %v7775_v46 = vld [vmem:[%s10053_s8] ss:$0 sm:$0xff]  ;;  %vm2031_vm3 = vcmp.lt.s32.totalorder %v7651_v13, 14 }
 0x309   : > { %vm5351_vm12 = vmpackc.low %vm7717_vm7, %vm7705_vm2  ;;  %v7753_v51 = vpack.c.bf16 %v1153_v4, %v1154_v56  ;;  %vm2003_vm7 = vcmp.ge.s32.totalorder %v7651_v13, 0  ;;  %v10770_v13 = vmov 0 }
 0x30a   : > { %vm10756_vm14 = vmpackc.low %vm7660_vm10, %vm7644_vm0  ;;  %vm10296_vm0 = vcmp.ge.s32.totalorder %v7740_v38, 0 }
 0x30b   : > { %vm10757_vm2 = vmpackc.low %vm7694_vm13, %vm7622_vm8  ;;  %vm10295_vm8 = vcmp.lt.s32.totalorder %v7751_v50, 14  ;;  %vm2002_vm13 = vcmp.ge.s32.totalorder %v7666_v53, 0 }
 0x30c   : > { %v3814_v3 = vpop.f32.mrf.mxu0 }
 0x30f   : > { %5269 = vmatmul.msk.bf16.gmra.mxu0 %vm10748_vm5, %v7711_v55  ;;  %vm7755_vm5 = vmand %vm1217_vm11, %vm1245_vm1  ;;  %vm2030_vm11 = vcmp.lt.s32.totalorder %v7666_v53, 14  ;;  %v1106_v55 = vand.u32 15, %v1050_v29 }
 0x310   : > { %v3972_v23 = vpop.f32.mrf.mxu1  ;;  %vm7781_vm1 = vmand %vm7735_vm9, %vm10277_vm6 }
 0x311   : > { %vm7805_vm4 = vmand %vm7755_vm5, %vm10296_vm0  ;;  %v7873_v50 = vadd.s32 4294967295, %v1106_v55 }
 0x312   : > { %5227 = vmatmul.msk.bf16.gmra.mxu3 %vm10756_vm14, %v7612_v20  ;;  %5311 = vmatmul.msk.bf16.gmra.mxu2 %vm10757_vm2, %v6349_v58  ;;  %vm10297_vm14 = vcmp.lt.s32.totalorder %v7788_v11, 14  ;;  %vm7822_vm2 = vmand %vm2002_vm13, %vm2030_vm11  ;;  %v1192_v58 = vadd.s32 4294967295, %v7798_v61  ;;  %v7867_v11 = vpack.c.bf16 %v6352_v7, %v6342_v45 }
 0x313   : > { %5353 = vmatmul.msk.bf16.gmra.mxu1 %vm5351_vm12, %v7753_v51  ;;  %vm7815_vm12 = vmand %vm7735_vm9, %vm10295_vm8  ;;  %v10768_v10 = vsel %vm7822_vm2, 4294967295, %v10767_v10  ;;  %10781 = vst [vmem:[#allocation124_spill] sm:$0xff] %v7873_v50 }
 0x314   : > { %v3816_v9 = vpop.f32.mrf.mxu0  ;;  %10769 = vst [vmem:[#allocation120_spill] sm:$0xff] %v10768_v10  ;;  %vm7826_vm6 = vmand %vm2003_vm7, %vm2031_vm3  ;;  %vm1220_vm7 = vcmp.ge.s32.totalorder %v1192_v58, 0  ;;  %vm1248_vm3 = vcmp.lt.s32.totalorder %v1192_v58, 14 }
 0x315   : > { %v3735_v59 = vpop.f32.mrf.mxu3  ;;  %v3893_v42 = vpop.f32.mrf.mxu2  ;;  %v10771_v13 = vsel %vm7826_vm6, 4294967295, %v10770_v13  ;;  %vm7836_vm10 = vmand %vm7735_vm9, %vm10297_vm14 }
 0x316   : > { %v3736_v4 = vadd.f32 %v7775_v46, %v3735_v59  ;;  %v7820_v59 = vshra.s32 %v1050_v29, 4  ;;  %10772 = vst [vmem:[#allocation121_spill] sm:$0xff] %v10771_v13  ;;  %vm7849_vm13 = vmand %vm7822_vm2, %vm10296_vm0  ;;  %v1132_v29 = vrot.slane %v6356_v34, 7  ;;  %vm10783_vm0 = vcmp.lt.s32.totalorder %v6160_v16, 1 }
 0x317   : > { %vm7859_vm9 = vmand %vm7826_vm6, %vm10295_vm8 }
 0x318   : > { %10766 = vst [vmem:[#allocation119_spill] sm:$0xff] %v7820_v59  ;;  %v3815_v25 = vadd.f32 %v3814_v3, %v3736_v4  ;;  %v3974_v53 = vpop.f32.mrf.mxu1  ;;  %v7840_v4 = vand.u32 15, %v1051_v35  ;;  %v1191_v32 = vadd.s32 4294967295, %v7820_v59  ;;  %v1151_v45 = vsel %vm10783_vm0, %v1132_v29, %v10782_v8  ;;  %vm10785_vm14 = vmpackc.low %vm7781_vm1, %vm7755_vm5 }
 0x319   : > { %vm7901_vm6 = vmand %vm1220_vm7, %vm1248_vm3  ;;  %v1053_v8 = vadd.s32 184, %v6160_v16 }
 0x31a   : > { %v3894_v6 = vadd.f32 %v3893_v42, %v3815_v25  ;;  %10775 = vst [vmem:[#allocation122_spill] sm:$0xff] %v7840_v4  ;;  %vm1219_vm11 = vcmp.ge.s32.totalorder %v1191_v32, 0  ;;  %vm1247_vm2 = vcmp.lt.s32.totalorder %v1191_v32, 14  ;;  %vm10302_vm1 = vcmp.lt.s32.totalorder %v7840_v4, 14  ;;  %vm10789_vm8 = vmpackc.low %vm7815_vm12, %vm7805_vm4 }
 0x31b   : > { %vm10790_vm7 = vmpackc.low %vm7836_vm10, %vm7755_vm5  ;;  %v7954_v56 = vadd.s32 1, %v7840_v4  ;;  %v7956_v3 = vshra.s32 %v1053_v8, 4  ;;  %vm2004_vm12 = vcmp.ge.s32.totalorder %v7820_v59, 0 }
 0x31c   : > { %v3819_v42 = vpop.f32.mrf.mxu0  ;;  %v7863_v20 = vadd.f32 %v3972_v23, %v3894_v6  ;;  %v7885_v23 = vadd.s32 4294967295, %v7840_v4  ;;  %vm7922_vm3 = vmand %vm1219_vm11, %vm1247_vm2  ;;  %vm2032_vm2 = vcmp.lt.s32.totalorder %v7820_v59, 14  ;;  %vm2033_vm11 = vcmp.lt.s32.totalorder %v7798_v61, 14 }
 0x31d   : > { %v3737_v38 = vpop.f32.mrf.mxu3  ;;  %v3895_v10 = vpop.f32.mrf.mxu2  ;;  %vm7941_vm5 = vmand %vm7901_vm6, %vm10302_vm1  ;;  %10798 = vst [vmem:[#allocation126_spill] sm:$0xff] %v7954_v56  ;;  %v8003_v59 = vand.u32 15, %v1053_v8  ;;  %v8018_v8 = vpack.c.bf16 %v6375_v47, %v6356_v34  ;;  %v10819_v34 = vrot.slane %v6434_v27, 7 }
 0x31e   : > { %10780 = vst [vmem:[#allocation123_spill] sm:$0xff] %v7863_v20  ;;  %v3738_v13 = vadd.f32 %v7775_v46, %v3737_v38  ;;  %v10786_v38 = vrot.slane %v6352_v7, 7  ;;  %vm7985_vm1 = vmand %vm2004_vm12, %vm2032_vm2  ;;  %v5680_v7 = vld [vmem:[%s10052_s7 + $0x1b8] sm:$0xff] }
 0x31f   : > { %10784 = vst [vmem:[#allocation125_spill] sm:$0xff] %v7885_v23  ;;  %5272 = vmatmul.msk.bf16.gmra.mxu0 %vm10785_vm14, %v7867_v11  ;;  %vm10312_vm14 = vcmp.ge.s32.totalorder %v7873_v50, 0  ;;  %v8093_v22 = vadd.s32 1, %v8003_v59  ;;  %4200 = vmatpush.bf16.msrb.mxu2 %v5680_v7  ;;  %v5687_v7 = vld [vmem:[%s10052_s7 + $0x1f0] sm:$0xff] }
 0x320   : > { %v3817_v58 = vadd.f32 %v3816_v9, %v3738_v13  ;;  %v3977_v6 = vpop.f32.mrf.mxu1  ;;  %v1152_v55 = vsel %vm10783_vm0, %v10786_v38, %v1132_v29  ;;  %vm10316_vm0 = vcmp.lt.s32.totalorder %v7885_v23, 14  ;;  %v5671_v13 = vld [vmem:[%s10052_s7 + $0x170] sm:$0xff]  ;;  %vm7949_vm10 = vmand %vm7922_vm3, %vm10312_vm14  ;;  %10799 = vst [vmem:[#allocation127_spill] sm:$0xff] %v7956_v3 }
 0x321   : > { %v7907_v20 = vpack.c.bf16 %v1151_v45, %v1152_v55  ;;  %4122 = vmatpush.bf16.msra.mxu0 %v5671_v13  ;;  %vm7964_vm4 = vmand %vm7901_vm6, %vm10316_vm0  ;;  %v10804_v13 = vmov 0  ;;  %10812 = vst [vmem:[#allocation132_spill] sm:$0xff] %v8003_v59  ;;  %v5688_v45 = vld [vmem:[%s10052_s7 + $0x1f8] sm:$0xff] }
 0x322   : > { %v3896_v32 = vadd.f32 %v3895_v10, %v3817_v58  ;;  %5230 = vmatmul.msk.bf16.gmra.mxu3 %vm10789_vm8, %v7753_v51  ;;  %5314 = vmatmul.msk.bf16.gmra.mxu2 %vm10790_vm7, %v6366_v41  ;;  %v1052_v10 = vadd.s32 176, %v6160_v16  ;;  %vm10793_vm8 = vmpackc.low %vm7859_vm9, %vm7849_vm13  ;;  %vm2005_vm9 = vcmp.ge.s32.totalorder %v7798_v61, 0  ;;  %v10805_v13 = vsel %vm7985_vm1, 4294967295, %v10804_v13  ;;  %10816 = vst [vmem:[#allocation134_spill] sm:$0xff] %v8018_v8 }
 0x323   : > { %5356 = vmatmul.msk.bf16.gmra.mxu1 %vm10793_vm8, %v7907_v20  ;;  %vm10313_vm8 = vcmp.lt.s32.totalorder %v7954_v56, 14  ;;  %10806 = vst [vmem:[#allocation130_spill] sm:$0xff] %v10805_v13  ;;  %vm7990_vm13 = vmand %vm2005_vm9, %vm2033_vm11  ;;  %v10807_v61 = vmov 0  ;;  %vm10323_vm11 = vcmp.lt.s32.totalorder %v8003_v59, 14 }
 0x324   : > { %v3821_v9 = vpop.f32.mrf.mxu0  ;;  %v7958_v25 = vadd.f32 %v3974_v53, %v3896_v32  ;;  %v7971_v38 = vshra.s32 %v1052_v10, 4  ;;  %v1194_v32 = vadd.s32 4294967295, %v7956_v3  ;;  %v10808_v61 = vsel %vm7990_vm13, 4294967295, %v10807_v61  ;;  %vm7999_vm7 = vmand %vm7901_vm6, %vm10313_vm8  ;;  %10833 = vst [vmem:[#allocation137_spill] sm:$0xff] %v8093_v22  ;;  %4279 = vmatpush.bf16.msrb.mxu1 %v5688_v45 }
 0x325   : > { %v3740_v29 = vpop.f32.mrf.mxu3  ;;  %v3898_v35 = vpop.f32.mrf.mxu2  ;;  %10809 = vst [vmem:[#allocation131_spill] sm:$0xff] %v10808_v61  ;;  %vm8010_vm12 = vmand %vm7985_vm1, %vm10312_vm14  ;;  %vm10820_vm14 = vcmp.lt.s32.totalorder %v6160_v16, 1  ;;  %v10844_v61 = vmov 0 }
 0x326   : > { %10800 = vst [vmem:[#allocation128_spill] sm:$0xff] %v7958_v25  ;;  %v3741_v58 = vadd.f32 %v7775_v46, %v3740_v29  ;;  %v1108_v25 = vand.u32 15, %v1052_v10  ;;  %v1134_v29 = vrot.slane %v6391_v0, 7  ;;  %vm1222_vm2 = vcmp.ge.s32.totalorder %v1194_v32, 0  ;;  %vm8024_vm6 = vmand %vm7990_vm13, %vm10316_vm0 }
 0x327   : > { %10803 = vst [vmem:[#allocation129_spill] sm:$0xff] %v7971_v38  ;;  %vm1250_vm9 = vcmp.lt.s32.totalorder %v1194_v32, 14  ;;  %vm10821_vm0 = vmpackc.low %vm7941_vm5, %vm7922_vm3 }
 0x328   : > { %v3820_v53 = vadd.f32 %v3819_v42, %v3741_v58  ;;  %v3979_v55 = vpop.f32.mrf.mxu1  ;;  %v1193_v42 = vadd.s32 4294967295, %v7971_v38  ;;  %vm8043_vm13 = vmand %vm1222_vm2, %vm1250_vm9  ;;  %v8048_v32 = vadd.s32 4294967295, %v1108_v25  ;;  %4280 = vmatpush.bf16.msrb.mxu1 %v5687_v7  ;;  %v5684_v25 = vld [vmem:[%s10052_s7 + $0x1d8] sm:$0xff] }
 0x329   : > { %vm10829_vm2 = vmpackc.low %vm7964_vm4, %vm7949_vm10 }
 0x32a   : > { %v3899_v4 = vadd.f32 %v3898_v35, %v3820_v53  ;;  %vm1221_vm8 = vcmp.ge.s32.totalorder %v1193_v42, 0  ;;  %vm1249_vm1 = vcmp.lt.s32.totalorder %v1193_v42, 14  ;;  %10824 = vst [vmem:[#allocation135_spill] sm:$0xff] %v8048_v32  ;;  %v10825_v42 = vrot.slane %v6375_v47, 7 }
 0x32b   : > { %vm8065_vm5 = vmand %vm1221_vm8, %vm1249_vm1  ;;  %vm10338_vm10 = vcmp.ge.s32.totalorder %v8048_v32, 0  ;;  %vm2034_vm8 = vcmp.lt.s32.totalorder %v7971_v38, 14  ;;  %v5669_v32 = vld [vmem:[%s10052_s7 + $0x160] sm:$0xff] }
 0x32c   : > { %v3824_v35 = vpop.f32.mrf.mxu0  ;;  %v8014_v43 = vadd.f32 %v3977_v6, %v3899_v4  ;;  %v1149_v4 = vsel %vm10820_vm14, %v1134_v29, %v10819_v34  ;;  %v1150_v52 = vsel %vm10820_vm14, %v10825_v42, %v1134_v29  ;;  %v8061_v34 = vadd.s32 4294967295, %v8003_v59  ;;  %vm8086_vm1 = vmand %vm8043_vm13, %vm10323_vm11 }
 0x32d   : > { %v3742_v10 = vpop.f32.mrf.mxu3  ;;  %v3900_v56 = vpop.f32.mrf.mxu2  ;;  %vm8121_vm9 = vmand %vm8065_vm5, %vm10338_vm10  ;;  %vm2035_vm14 = vcmp.lt.s32.totalorder %v7956_v3, 14  ;;  %v10841_v59 = vmov 0 }
 0x32e   : > { %10815 = vst [vmem:[#allocation133_spill] sm:$0xff] %v8014_v43  ;;  %v3743_v13 = vadd.f32 %v7775_v46, %v3742_v10  ;;  %v8063_v43 = vpack.c.bf16 %v1149_v4, %v1150_v52 }
 0x32f   : > { %5275 = vmatmul.msk.bf16.gmra.mxu0 %vm10821_vm0, %v8018_v8  ;;  %vm5357_vm0 = vmpackc.low %vm8024_vm6, %vm8010_vm12  ;;  %10826 = vst [vmem:[#allocation136_spill] sm:$0xff] %v8061_v34  ;;  %vm2007_vm6 = vcmp.ge.s32.totalorder %v7956_v3, 0  ;;  %v5670_v3 = vld [vmem:[%s10052_s7 + $0x168] sm:$0xff]  ;;  %v5657_v8 = vld [vmem:[%s10052_s7 + $0x100] sm:$0xff] }
 0x330   : > { %v3822_v10 = vadd.f32 %v3821_v9, %v3743_v13  ;;  %v8050_v23 = vpop.f32.mrf.mxu1  ;;  %v1055_v9 = vadd.s32 200, %v6160_v16  ;;  %vm10830_vm12 = vmpackc.low %vm7999_vm7, %vm7922_vm3  ;;  %vm10337_vm3 = vcmp.lt.s32.totalorder %v8061_v34, 14  ;;  %vm2006_vm7 = vcmp.ge.s32.totalorder %v7971_v38, 0  ;;  %4123 = vmatpush.bf16.msra.mxu0 %v5670_v3  ;;  %v5686_v3 = vld [vmem:[%s10052_s7 + $0x1e8] sm:$0xff]  ;;  %4049 = vmatpush.bf16.msra.mxu3 %v5657_v8 }
 0x331   : > { %vm8158_vm11 = vmand %vm2007_vm6, %vm2035_vm14  ;;  %v10858_v8 = vrot.slane %v6490_v36, 7  ;;  %4281 = vmatpush.bf16.msrb.mxu1 %v5686_v3 }
 0x332   : > { %v3901_v47 = vadd.f32 %v3900_v56, %v3822_v10  ;;  %5233 = vmatmul.msk.bf16.gmra.mxu3 %vm10829_vm2, %v7907_v20  ;;  %5317 = vmatmul.msk.bf16.gmra.mxu2 %vm10830_vm12, %v6410_v2  ;;  %v1054_v56 = vadd.s32 192, %v6160_v16  ;;  %v8113_v4 = vshra.s32 %v1055_v9, 4  ;;  %v2489_v10 = vadd.s32 1, %v6498_v49  ;;  %vm8150_vm12 = vmand %vm2006_vm7, %vm2034_vm8 }
 0x333   : > { %5359 = vmatmul.msk.bf16.gmra.mxu1 %vm5357_vm0, %v8063_v43  ;;  %vm8131_vm0 = vmand %vm8043_vm13, %vm10337_vm3  ;;  %vm10341_vm2 = vcmp.lt.s32.totalorder %v8093_v22, 14  ;;  %v10842_v59 = vsel %vm8150_vm12, 4294967295, %v10841_v59  ;;  %v10845_v61 = vsel %vm8158_vm11, 4294967295, %v10844_v61 }
 0x334   : > { %v8102_v13 = vpop.f32.mrf.mxu0  ;;  %v8105_v29 = vadd.f32 %v3979_v55, %v3901_v47  ;;  %10835 = vst [vmem:[#allocation139_spill] sm:$0xff] %v8113_v4  ;;  %v8136_v52 = vshra.s32 %v1054_v56, 4  ;;  %v5679_v47 = vld [vmem:[%s10052_s7 + $0x1b0] sm:$0xff]  ;;  %vm2517_vm4 = vcmp.ge.s32.totalorder %v2489_v10, 0  ;;  %vm2545_vm7 = vcmp.lt.s32.totalorder %v2489_v10, 14  ;;  %vm8167_vm8 = vmand %vm8043_vm13, %vm10341_vm2  ;;  %4124 = vmatpush.bf16.msra.mxu0 %v5669_v32  ;;  %v5685_v32 = vld [vmem:[%s10052_s7 + $0x1e0] sm:$0xff] }
 0x335   : > { %v3745_v58 = vpop.f32.mrf.mxu3  ;;  %v3903_v53 = vpop.f32.mrf.mxu2  ;;  %10843 = vst [vmem:[#allocation141_spill] sm:$0xff] %v10842_v59  ;;  %4201 = vmatpush.bf16.msrb.mxu2 %v5679_v47  ;;  %vm8184_vm13 = vmand %vm8150_vm12, %vm10338_vm10  ;;  %v8194_v47 = vpack.c.bf16 %v6434_v27, %v6391_v0  ;;  %v10856_v0 = vmov 0  ;;  %vm10859_vm10 = vcmp.lt.s32.totalorder %v6160_v16, 1  ;;  %4282 = vmatpush.bf16.msrb.mxu1 %v5685_v32 }
 0x336   : > { %10834 = vst [vmem:[#allocation138_spill] sm:$0xff] %v8105_v29  ;;  %v3746_v55 = vadd.f32 %v7775_v46, %v3745_v58  ;;  %v2488_v29 = vadd.s32 1, %v6501_v26  ;;  %v8171_v26 = vand.u32 15, %v1055_v9  ;;  %v1195_v9 = vadd.s32 4294967295, %v8136_v52  ;;  %vm8202_vm6 = vmand %vm8158_vm11, %vm10337_vm3 }
 0x337   : > { %10840 = vst [vmem:[#allocation140_spill] sm:$0xff] %v8136_v52  ;;  %vm8214_vm14 = vmand %vm2517_vm4, %vm2545_vm7 }
 0x338   : > { %v3825_v45 = vadd.f32 %v3824_v35, %v3746_v55  ;;  %v8144_v58 = vpop.f32.mrf.mxu1  ;;  %10846 = vst [vmem:[#allocation142_spill] sm:$0xff] %v10845_v61  ;;  %v1196_v35 = vadd.s32 4294967295, %v8113_v4  ;;  %v1110_v55 = vand.u32 15, %v1054_v56  ;;  %v5678_v56 = vld [vmem:[%s10052_s7 + $0x1a8] sm:$0xff]  ;;  %v10857_v0 = vsel %vm8214_vm14, 4294967295, %v10856_v0 }
 0x339   : > { %10849 = vst [vmem:[#allocation143_spill] sm:$0xff] %v8171_v26  ;;  %4202 = vmatpush.bf16.msrb.mxu2 %v5678_v56  ;;  %v8234_v10 = vadd.s32 4294967295, %v8171_v26  ;;  %v10862_v56 = vrot.slane %v6434_v27, 7  ;;  %vm10867_vm2 = vcmp.lt.s32.totalorder %v2488_v29, 14  ;;  %vm10868_vm3 = vcmp.ge.s32.totalorder %v2488_v29, 0  ;;  %4283 = vmatpush.bf16.msrb.mxu1 %v5684_v25  ;;  %v10893_v25 = vld [vmem:[#allocation45_spill] sm:$0xff] }
 0x33a   : > { %v3904_v38 = vadd.f32 %v3903_v53, %v3825_v45  ;;  %v1136_v53 = vrot.slane %v6447_v24, 7  ;;  %10852 = vst [vmem:[#allocation144_spill] sm:$0xff] %v8194_v47  ;;  %vm1252_vm12 = vcmp.lt.s32.totalorder %v1196_v35, 14  ;;  %vm8272_vm11 = vmand %vm10868_vm3, %vm10867_vm2  ;;  %v10869_v27 = vmov 0 }
 0x33b   : > { %v10870_v27 = vsel %vm8272_vm11, 4294967295, %v10869_v27  ;;  %vm10873_vm3 = vmpackc.low %vm8167_vm8, %vm8065_vm5  ;;  %vm10874_vm2 = vcmp.lt.s32.totalorder %v1195_v9, 14  ;;  %vm10346_vm7 = vcmp.lt.s32.totalorder %v8234_v10, 14  ;;  %v8330_v49 = vadd.s32 1, %v8171_v26 }
 0x33c   : > { %v8196_v7 = vpop.f32.mrf.mxu0  ;;  %v8210_v59 = vadd.f32 %v8050_v23, %v3904_v38  ;;  %v1147_v22 = vsel %vm10859_vm10, %v1136_v53, %v10858_v8  ;;  %v8226_v23 = vadd.s32 4294967295, %v1110_v55  ;;  %vm10861_vm10 = vmpackc.low %vm8086_vm1, %vm8065_vm5  ;;  %vm10863_vm1 = vcmp.lt.s32.totalorder %v6160_v16, 1 }
 0x33d   : > { %v3747_v34 = vpop.f32.mrf.mxu3  ;;  %v3905_v61 = vpop.f32.mrf.mxu2  ;;  %v1148_v3 = vsel %vm10863_vm1, %v10862_v56, %v1136_v53  ;;  %vm10871_vm1 = vmpackc.low %vm8131_vm0, %vm8121_vm9  ;;  %vm10879_vm5 = vcmp.lt.s32.totalorder %v8171_v26, 14  ;;  %10885 = vst [vmem:[#allocation147_spill] sm:$0xff] %v8330_v49 }
 0x33e   : > { %10855 = vst [vmem:[#allocation145_spill] sm:$0xff] %v8210_v59  ;;  %v3748_v38 = vadd.f32 %v7775_v46, %v3747_v34  ;;  %v5677_v34 = vld [vmem:[%s10052_s7 + $0x1a0] sm:$0xff]  ;;  %v1057_v59 = vadd.s32 216, %v6160_v16  ;;  %v8276_v53 = vpack.c.bf16 %v1147_v22, %v1148_v3  ;;  %vm10878_vm9 = vmpackc.low %vm8202_vm6, %vm8184_vm13  ;;  %vm10882_vm8 = vcmp.ge.s32.totalorder %v8226_v23, 0  ;;  %v5675_v3 = vld [vmem:[%s10052_s7 + $0x190] sm:$0xff] }
 0x33f   : > { %10860 = vst [vmem:[#allocation146_spill] sm:$0xff] %v8226_v23  ;;  %5278 = vmatmul.msk.bf16.gmra.mxu0 %vm10861_vm10, %v8194_v47  ;;  %vm10864_vm10 = vcmp.ge.s32.totalorder %v1196_v35, 0  ;;  %4203 = vmatpush.bf16.msrb.mxu2 %v5677_v34  ;;  %v5696_v22 = vld [vmem:[%s10052_s7 + $0x238] sm:$0xff] }
 0x340   : > { %v3827_v50 = vadd.f32 %v8102_v13, %v3748_v38  ;;  %v8253_v55 = vpop.f32.mrf.mxu1  ;;  %vm8261_vm4 = vmand %vm10864_vm10, %vm1252_vm12  ;;  %v5668_v13 = vld [vmem:[%s10052_s7 + $0x158] sm:$0xff]  ;;  %v10872_v38 = vld [vmem:[#allocation38_spill] sm:$0xff]  ;;  %vm10875_vm10 = vcmp.ge.s32.totalorder %v1195_v9, 0  ;;  %v8332_v6 = vshra.s32 %v1057_v59, 4  ;;  %4358 = vmatpush.bf16.msrb.mxu3 %v5696_v22 }
 0x341   : > { %vm8293_vm12 = vmand %vm10875_vm10, %vm10874_vm2  ;;  %4125 = vmatpush.bf16.msra.mxu0 %v5668_v13  ;;  %v5667_v9 = vld [vmem:[%s10052_s7 + $0x150] sm:$0xff]  ;;  %vm10894_vm2 = vcmp.lt.s32.totalorder %v10893_v25, 14  ;;  %v5666_v25 = vld [vmem:[%s10052_s7 + $0x148] sm:$0xff]  ;;  %vm10900_vm10 = vcmp.ge.s32.totalorder %v8113_v4, 0 }
 0x342   : > { %v3906_v35 = vadd.f32 %v3905_v61, %v3827_v50  ;;  %5236 = vmatmul.msk.bf16.gmra.mxu3 %vm10871_vm1, %v8063_v43  ;;  %5320 = vmatmul.msk.bf16.gmra.mxu2 %vm10873_vm3, %v10872_v38  ;;  %v8299_v61 = vadd.s32 208, %v6160_v16  ;;  %vm8311_vm0 = vmand %vm8261_vm4, %vm10879_vm5  ;;  %v5676_v16 = vld [vmem:[%s10052_s7 + $0x198] sm:$0xff]  ;;  %vm2008_vm1 = vcmp.ge.s32.totalorder %v8136_v52, 0  ;;  %vm2036_vm3 = vcmp.lt.s32.totalorder %v8136_v52, 14  ;;  %v5683_v13 = vld [vmem:[%s10052_s7 + $0x1d0] sm:$0xff] }
 0x343   : > { %5362 = vmatmul.msk.bf16.gmra.mxu1 %vm10878_vm9, %v8276_v53  ;;  %vm8325_vm13 = vmand %vm8293_vm12, %vm10882_vm8  ;;  %4204 = vmatpush.bf16.msrb.mxu2 %v5676_v16  ;;  %vm2037_vm9 = vcmp.lt.s32.totalorder %v8113_v4, 14  ;;  %v5674_v52 = vld [vmem:[%s10052_s7 + $0x188] sm:$0xff] }
 0x344   : > { %v3831_v29 = vpop.f32.mrf.mxu0  ;;  %v8338_v45 = vadd.f32 %v8144_v58, %v3906_v35  ;;  %vm8344_vm6 = vmand %vm8261_vm4, %vm10346_vm7  ;;  %v8352_v58 = vshra.s32 %v8299_v61, 4  ;;  %v10889_v35 = vld [vmem:[#allocation44_spill] sm:$0xff]  ;;  %4284 = vmatpush.bf16.msrb.mxu1 %v5683_v13  ;;  %v8423_v13 = vand.u32 15, %v1057_v59  ;;  %v1112_v8 = vand.u32 15, %v8299_v61  ;;  %v10923_v4 = vld [vmem:[#allocation39_spill] sm:$0xff] }
 0x345   : > { %v3750_v34 = vpop.f32.mrf.mxu3  ;;  %v3908_v32 = vpop.f32.mrf.mxu2  ;;  %4126 = vmatpush.bf16.msra.mxu0 %v5667_v9  ;;  %vm10890_vm5 = vcmp.ge.s32.totalorder %v10889_v35, 0  ;;  %vm8378_vm7 = vmand %vm8214_vm14, %vm10894_vm2  ;;  %v10895_v9 = vmov 0  ;;  %v1198_v35 = vadd.s32 4294967295, %v8332_v6 }
 0x346   : > { %10886 = vst [vmem:[#allocation148_spill] sm:$0xff] %v8338_v45  ;;  %v3751_v56 = vadd.f32 %v7775_v46, %v3750_v34  ;;  %vm8370_vm8 = vmand %vm8272_vm11, %vm10890_vm5  ;;  %v10896_v9 = vsel %vm8378_vm7, 4294967295, %v10895_v9  ;;  %v10901_v45 = vmov 0  ;;  %v1197_v38 = vadd.s32 4294967295, %v8352_v58 }
 0x347   : > { %vm8396_vm2 = vmand %vm2008_vm1, %vm2036_vm3  ;;  %4205 = vmatpush.bf16.msrb.mxu2 %v5675_v3  ;;  %v5682_v3 = vld [vmem:[%s10052_s7 + $0x1c8] sm:$0xff]  ;;  %vm10903_vm1 = vcmp.lt.s32.totalorder %v8330_v49, 14  ;;  %10906 = vst [vmem:[#allocation45_spill] sm:$0xff] %v8423_v13  ;;  %v5665_v49 = vld [vmem:[%s10052_s7 + $0x140] sm:$0xff]  ;;  %vm10369_vm7 = vcmp.lt.s32.totalorder %v8423_v13, 14 }
 0x348   : > { %v3830_v34 = vadd.f32 %v8196_v7, %v3751_v56  ;;  %v3989_v26 = vpop.f32.mrf.mxu1  ;;  %v10897_v7 = vmov 0  ;;  %vm8404_vm5 = vmand %vm10900_vm10, %vm2037_vm9  ;;  %vm10907_vm10 = vcmp.ge.s32.totalorder %v8226_v23, 0  ;;  %4285 = vmatpush.bf16.msrb.mxu1 %v5682_v3  ;;  %vm1225_vm15 = vcmp.ge.s32.totalorder %v1197_v38, 0 }
 0x349   : > { %v10898_v7 = vsel %vm8396_vm2, 4294967295, %v10897_v7  ;;  %v10902_v45 = vsel %vm8404_vm5, 4294967295, %v10901_v45  ;;  %vm8419_vm3 = vmand %vm8261_vm4, %vm10903_vm1  ;;  %4127 = vmatpush.bf16.msra.mxu0 %v5666_v25  ;;  %v8442_v25 = vpack.c.bf16 %v6490_v36, %v6447_v24  ;;  %vm10910_vm4 = vcmp.lt.s32.totalorder %v8234_v10, 14  ;;  %v5673_v36 = vld [vmem:[%s10052_s7 + $0x180] sm:$0xff] }
 0x34a   : > { %10899 = vst [vmem:[#allocation44_spill] sm:$0xff] %v10898_v7  ;;  %v3909_v56 = vadd.f32 %v3908_v32, %v3830_v34  ;;  %vm8429_vm9 = vmand %vm8396_vm2, %vm10907_vm10  ;;  %vm1253_vm11 = vcmp.lt.s32.totalorder %v1197_v38, 14  ;;  %vm10914_vm2 = vcmp.lt.s32.totalorder %v1198_v35, 14  ;;  %v8480_v38 = vadd.s32 4294967295, %v1112_v8 }
 0x34b   : > { %vm8448_vm1 = vmand %vm8404_vm5, %vm10910_vm4  ;;  %4206 = vmatpush.bf16.msrb.mxu2 %v5674_v52  ;;  %vm10915_vm5 = vcmp.ge.s32.totalorder %v1198_v35, 0  ;;  %v5681_v52 = vld [vmem:[%s10052_s7 + $0x1c0] sm:$0xff]  ;;  %v8487_v35 = vadd.s32 4294967295, %v8423_v13 }
 0x34c   : > { %v3834_v34 = vpop.f32.mrf.mxu0  ;;  %v8438_v59 = vadd.f32 %v8253_v55, %v3909_v56  ;;  %vm5321_vm10 = vmpackc.low %vm8419_vm3, %vm8293_vm12  ;;  %10918 = vst [vmem:[#allocation149_spill] sm:$0xff] %v8480_v38  ;;  %4286 = vmatpush.bf16.msrb.mxu1 %v5681_v52  ;;  %v10932_v52 = vmov 0 }
 0x34d   : > { %v3752_v23 = vpop.f32.mrf.mxu3  ;;  %v3910_v7 = vpop.f32.mrf.mxu2  ;;  %vm10913_vm4 = vmpackc.low %vm8311_vm0, %vm8293_vm12  ;;  %4128 = vmatpush.bf16.msra.mxu0 %v5665_v49  ;;  %10921 = vst [vmem:[#allocation150_spill] sm:$0xff] %v8487_v35  ;;  %vm10370_vm12 = vcmp.ge.s32.totalorder %v8480_v38, 0  ;;  %v8519_v49 = vadd.s32 1, %v8423_v13 }
 0x34e   : > { %v3753_v61 = vadd.f32 %v7775_v46, %v3752_v23  ;;  %vm8465_vm14 = vmand %vm10915_vm5, %vm10914_vm2 }
 0x34f   : > { %5281 = vmatmul.msk.bf16.gmra.mxu0 %vm10913_vm4, %v8442_v25  ;;  %vm5363_vm0 = vmpackc.low %vm8448_vm1, %vm8429_vm9  ;;  %4207 = vmatpush.bf16.msrb.mxu2 %v5673_v36  ;;  %vm2010_vm9 = vcmp.ge.s32.totalorder %v8352_v58, 0  ;;  %vm2038_vm1 = vcmp.lt.s32.totalorder %v8352_v58, 14  ;;  %vm2011_vm4 = vcmp.ge.s32.totalorder %v8332_v6, 0  ;;  %v10945_v36 = vld [vmem:[#allocation47_spill] sm:$0xff] }
 0x350   : > { %v3832_v23 = vadd.f32 %v3831_v29, %v3753_v61  ;;  %v3992_v55 = vpop.f32.mrf.mxu1  ;;  %vm8482_vm5 = vmand %vm1225_vm15, %vm1253_vm11  ;;  %v10926_v29 = vld [vmem:[#allocation43_spill] sm:$0xff]  ;;  %vm10927_vm11 = vnez %v10896_v9 }
 0x351   : > { %vm10922_vm2 = vmpackc.low %vm8344_vm6, %vm8325_vm13  ;;  %vm10371_vm6 = vcmp.lt.s32.totalorder %v8487_v35, 14 }
 0x352   : > { %v3911_v56 = vadd.f32 %v3910_v7, %v3832_v23  ;;  %5239 = vmatmul.msk.bf16.gmra.mxu3 %vm10922_vm2, %v8276_v53  ;;  %5323 = vmatmul.msk.bf16.gmra.mxu2 %vm5321_vm10, %v10923_v4  ;;  %vm8505_vm15 = vmand %vm8465_vm14, %vm10369_vm7  ;;  %vm10378_vm7 = vcmp.lt.s32.totalorder %v8519_v49, 14 }
 0x353   : > { %5365 = vmatmul.msk.bf16.gmra.mxu1 %vm5363_vm0, %v10926_v29  ;;  %vm8535_vm10 = vmand %vm8482_vm5, %vm10370_vm12  ;;  %vm2039_vm0 = vcmp.lt.s32.totalorder %v8332_v6, 14 }
 0x354   : > { %v3836_v42 = vpop.f32.mrf.mxu0  ;;  %v8521_v50 = vadd.f32 %v3989_v26, %v3911_v56  ;;  %vm8545_vm2 = vmand %vm8465_vm14, %vm10371_vm6  ;;  %vm10939_vm6 = vcmp.ge.s32.totalorder %v8480_v38, 0  ;;  %v10943_v38 = vld [vmem:[#allocation41_spill] sm:$0xff] }
 0x355   : > { %v3755_v7 = vpop.f32.mrf.mxu3  ;;  %v3913_v3 = vpop.f32.mrf.mxu2  ;;  %vm8550_vm13 = vmand %vm2010_vm9, %vm2038_vm1  ;;  %vm10942_vm1 = vcmp.lt.s32.totalorder %v8487_v35, 14 }
 0x356   : > { %v3756_v32 = vadd.f32 %v7775_v46, %v3755_v7  ;;  %v10933_v52 = vsel %vm8550_vm13, 4294967295, %v10932_v52  ;;  %vm8554_vm3 = vmand %vm2011_vm4, %vm2039_vm0  ;;  %v10948_v7 = vld [vmem:[#allocation46_spill] sm:$0xff] }
 0x357   : > { %10934 = vst [vmem:[#allocation39_spill] sm:$0xff] %v10933_v52  ;;  %vm8562_vm12 = vmand %vm8465_vm14, %vm10378_vm7  ;;  %v2491_v52 = vadd.s32 1, %v6570_v5 }
 0x358   : > { %v3835_v8 = vadd.f32 %v3834_v34, %v3756_v32  ;;  %v3994_v61 = vpop.f32.mrf.mxu1  ;;  %vm8570_vm9 = vmand %vm8550_vm13, %vm10939_vm6 }
 0x359   : > { %vm2123_vm14 = vmand %vm8554_vm3, %vm10942_vm1 }
 0x35a   : > { %v3914_v23 = vadd.f32 %v3913_v3, %v3835_v8  ;;  %vm5240_vm4 = vmpackc.low %vm8545_vm2, %vm8535_vm10 }
 0x35b   : > { %vm10944_vm6 = vmpackc.low %vm8505_vm15, %vm8482_vm5  ;;  %vm10949_vm15 = vnez %v10948_v7 }
 0x35c   : > { %v3839_v22 = vpop.f32.mrf.mxu0  ;;  %v8574_v3 = vadd.f32 %v3992_v55, %v3914_v23  ;;  %vm5324_vm0 = vmpackc.low %vm8562_vm12, %vm8482_vm5 }
 0x35d   : > { %v3757_v32 = vpop.f32.mrf.mxu3  ;;  %v3915_v8 = vpop.f32.mrf.mxu2  ;;  %vm5366_vm1 = vmpackc.low %vm2123_vm14, %vm8570_vm9 }
 0x35e   : > { %v3758_v24 = vadd.f32 %v7775_v46, %v3757_v32 }
 0x35f   : > { %5284 = vmatmul.msk.bf16.gmra.mxu0 %vm10944_vm6, %v10943_v38  ;;  %vm10957_vm6 = vnez %v10857_v0 }
 0x360   : > { %v3837_v55 = vadd.f32 %v3836_v42, %v3758_v24  ;;  %v3997_v23 = vpop.f32.mrf.mxu1  ;;  %v10946_v24 = vld [vmem:[#allocation42_spill] sm:$0xff] }
 0x361   : > { %vm10947_vm5 = vcmp.lt.s32.totalorder %v10946_v24, 14 }
 0x362   : > { %v3916_v26 = vadd.f32 %v3915_v8, %v3837_v55  ;;  %5242 = vmatmul.msk.bf16.gmra.mxu3 %vm5240_vm4, %v10926_v29  ;;  %5326 = vmatmul.msk.bf16.gmra.mxu2 %vm5324_vm0, %v10945_v36  ;;  %vm2377_vm12 = vmand %vm10949_vm15, %vm10947_vm5  ;;  %v10950_v55 = vld [vmem:[#allocation40_spill] sm:$0xff]  ;;  %vm10960_vm5 = vnez %v10870_v27 }
 0x363   : > { %5368 = vmatmul.msk.bf16.gmra.mxu1 %vm5366_vm1, %v6685_v30  ;;  %vm10951_vm10 = vcmp.lt.s32.totalorder %v10950_v55, 14 }
 0x364   : > { %v3841_v47 = vpop.f32.mrf.mxu0  ;;  %v8600_v32 = vadd.f32 %v3994_v61, %v3916_v26  ;;  %vm8611_vm2 = vmand %vm10949_vm15, %vm10951_vm10  ;;  %v10954_v26 = vld [vmem:[#allocation48_spill] sm:$0xff] }
 0x365   : > { %v3760_v35 = vpop.f32.mrf.mxu3  ;;  %v3918_v2 = vpop.f32.mrf.mxu2  ;;  %vm10955_vm9 = vnez %v10954_v26  ;;  %vm10956_vm4 = vmmov %vm10951_vm10  ;;  %vm10962_vm10 = vcmp.lt.s32.totalorder %v6722_v33, 14 }
 0x366   : > { %v3761_v34 = vadd.f32 %v7775_v46, %v3760_v35  ;;  %vm5411_vm14 = vmpackc.low %vm2377_vm12, %vm10955_vm9 }
 0x367   : > { %vm8623_vm0 = vmand %vm10957_vm6, %vm10956_vm4  ;;  %vm2547_vm4 = vcmp.lt.s32.totalorder %v2491_v52, 14 }
 0x368   : > { %v3840_v13 = vadd.f32 %v3839_v22, %v3761_v34  ;;  %v3999_v42 = vpop.f32.mrf.mxu1  ;;  %vm5369_vm1 = vmpackc.low %vm8611_vm2, %vm10955_vm9  ;;  %vm10963_vm2 = vnez %v10509_v60 }
 0x369   : > { %vm5495_vm15 = vmpackc.low %vm8623_vm0, %vm10960_vm5  ;;  %vm10966_vm0 = vnez %v10507_v1  ;;  %v10985_v1 = vld [vmem:[#allocation53_spill] sm:$0xff] }
 0x36a   : > { %v3919_v8 = vadd.f32 %v3918_v2, %v3840_v13  ;;  %vm10961_vm12 = vmpackc.low %vm10927_vm11, %vm8370_vm8 }
 0x36b   : > { %vm8654_vm9 = vmand %vm10963_vm2, %vm10962_vm10  ;;  %vm10971_vm10 = vcmp.lt.s32.totalorder %v6608_v63, 14 }
 0x36c   : > { %v3844_v61 = vpop.f32.mrf.mxu0  ;;  %v8617_v35 = vadd.f32 %v3997_v23, %v3919_v8  ;;  %v2490_v8 = vadd.s32 1, %v6586_v54  ;;  %vm8677_vm7 = vmand %vm10963_vm2, %vm10971_vm10  ;;  %v2493_v54 = vadd.s32 1, %v10985_v1 }
 0x36d   : > { %v3762_v22 = vpop.f32.mrf.mxu3  ;;  %v3920_v2 = vpop.f32.mrf.mxu2  ;;  %vm10981_vm2 = vmmov %vm10971_vm10 }
 0x36e   : > { %v3763_v34 = vadd.f32 %v7775_v46, %v3762_v22  ;;  %vm2518_vm8 = vcmp.ge.s32.totalorder %v2490_v8, 0  ;;  %vm2546_vm11 = vcmp.lt.s32.totalorder %v2490_v8, 14  ;;  %vm10983_vm10 = vmpackc.low %vm8654_vm9, %vm10966_vm0 }
 0x36f   : > { %5413 = vmatmul.msk.bf16.vlgmr.msra.gmra.mxu0 %vm5411_vm14, %v6196_v62  ;;  %vm2519_vm14 = vcmp.ge.s32.totalorder %v2491_v52, 0 }
 0x370   : > { %v3842_v23 = vadd.f32 %v3841_v47, %v3763_v34  ;;  %v4002_v7 = vpop.f32.mrf.mxu1  ;;  %v5695_v47 = vld [vmem:[%s10052_s7 + $0x230] sm:$0xff] }
 0x371   : > { %4359 = vmatpush.bf16.msrb.mxu3 %v5695_v47 }
 0x372   : > { %v3921_v55 = vadd.f32 %v3920_v2, %v3842_v23  ;;  %5371 = vmatmul.msk.bf16.vlgmr.msra.gmra.mxu3 %vm5369_vm1, %v6177_v37  ;;  %5455 = vmatmul.msk.bf16.vlgmr.msrb.gmra.mxu2 %vm10961_vm12, %v6214_v28  ;;  %v10967_v2 = vmov 0  ;;  %vm8669_vm12 = vmand %vm2519_vm14, %vm2547_vm4  ;;  %vm10974_vm1 = vcmp.ge.s32.totalorder %v6654_v14, 0 }
 0x373   : > { %5497 = vmatmul.msk.bf16.vlgmr.msrb.gmra.mxu1 %vm5495_vm15, %v6208_v31  ;;  %vm8665_vm15 = vmand %vm2518_vm8, %vm2546_vm11 }
 0x374   : > { %v3846_v26 = vpop.f32.mrf.mxu0  ;;  %v8658_v16 = vadd.f32 %v3999_v42, %v3921_v55  ;;  %v10968_v2 = vsel %vm8665_vm15, 4294967295, %v10967_v2  ;;  %v10969_v42 = vmov 0  ;;  %vm8685_vm8 = vmand %vm8665_vm15, %vm10974_vm1  ;;  %v10977_v55 = vld [vmem:[#allocation52_spill] sm:$0xff] }
 0x375   : > { %v3765_v28 = vpop.f32.mrf.mxu3  ;;  %v3923_v5 = vpop.f32.mrf.mxu2  ;;  %v10970_v42 = vsel %vm8669_vm12, 4294967295, %v10969_v42  ;;  %vm10978_vm11 = vcmp.lt.s32.totalorder %v10977_v55, 14  ;;  %vm2771_vm4 = vmand %vm8669_vm12, %vm10981_vm2  ;;  %v10988_v55 = vld [vmem:[#allocation62_spill] sm:$0xff] }
 0x376   : > { %v3766_v9 = vadd.f32 %v7775_v46, %v3765_v28  ;;  %vm8693_vm14 = vmand %vm8669_vm12, %vm10978_vm11  ;;  %vm10989_vm9 = vnez %v10988_v55 }
 0x377   : > { %vm5372_vm1 = vmpackc.low %vm8677_vm7, %vm10966_vm0 }
 0x378   : > { %v3845_v13 = vadd.f32 %v3844_v61, %v3766_v9  ;;  %v4004_v22 = vpop.f32.mrf.mxu1  ;;  %vm5456_vm11 = vmpackc.low %vm8693_vm14, %vm8685_vm8  ;;  %v10984_v9 = vld [vmem:[#allocation54_spill] sm:$0xff] }
 0x379   : > { %vm5498_vm2 = vmpackc.low %vm2771_vm4, %vm8665_vm15  ;;  %v10986_v61 = vld [vmem:[#allocation58_spill] sm:$0xff]  ;;  %vm2521_vm4 = vcmp.ge.s32.totalorder %v2493_v54, 0 }
 0x37a   : > { %v3924_v34 = vadd.f32 %v3923_v5, %v3845_v13  ;;  %v10982_v5 = vld [vmem:[#allocation25_spill] sm:$0xff]  ;;  %v2492_v13 = vadd.s32 1, %v10984_v9  ;;  %vm10987_vm7 = vcmp.lt.s32.totalorder %v10986_v61, 14  ;;  %v10994_v9 = vmov 0 }
 0x37b   : > { %vm8729_vm0 = vmand %vm10989_vm9, %vm10987_vm7 }
 0x37c   : > { %v3849_v8 = vpop.f32.mrf.mxu0  ;;  %v8697_v60 = vadd.f32 %v4002_v7, %v3924_v34  ;;  %vm2520_vm8 = vcmp.ge.s32.totalorder %v2492_v13, 0  ;;  %vm2548_vm14 = vcmp.lt.s32.totalorder %v2492_v13, 14 }
 0x37d   : > { %v3767_v47 = vpop.f32.mrf.mxu3  ;;  %v3925_v28 = vpop.f32.mrf.mxu2 }
 0x37e   : > { %v3768_v14 = vadd.f32 %v7775_v46, %v3767_v47 }
 0x37f   : > { %5416 = vmatmul.msk.bf16.gmra.mxu0 %vm10983_vm10, %v10982_v5 }
 0x380   : > { %v3847_v63 = vadd.f32 %v3846_v26, %v3768_v14  ;;  %v4007_v7 = vpop.f32.mrf.mxu1  ;;  %v11012_v26 = vld [vmem:[#allocation59_spill] sm:$0xff] }
 0x382   : > { %v3926_v34 = vadd.f32 %v3925_v28, %v3847_v63  ;;  %5374 = vmatmul.msk.bf16.gmra.mxu3 %vm5372_vm1, %v6208_v31  ;;  %5458 = vmatmul.msk.bf16.gmra.mxu2 %vm5456_vm11, %v6246_v44  ;;  %vm2549_vm1 = vcmp.lt.s32.totalorder %v2493_v54, 14  ;;  %v10992_v44 = vld [vmem:[#allocation61_spill] sm:$0xff]  ;;  %v11002_v54 = vld [vmem:[#allocation56_spill] sm:$0xff] }
 0x383   : > { %5500 = vmatmul.msk.bf16.gmra.mxu1 %vm5498_vm2, %v7024_v15  ;;  %vm10993_vm10 = vnez %v10992_v44  ;;  %vm8740_vm2 = vmand %vm2520_vm8, %vm2548_vm14  ;;  %vm11003_vm8 = vcmp.ge.s32.totalorder %v11002_v54, 0  ;;  %v2495_v44 = vadd.s32 1, %v11012_v26 }
 0x384   : > { %v3851_v23 = vpop.f32.mrf.mxu0  ;;  %v8733_v52 = vadd.f32 %v4004_v22, %v3926_v34  ;;  %vm5417_vm11 = vmpackc.low %vm8729_vm0, %vm10993_vm10  ;;  %v10995_v9 = vsel %vm8740_vm2, 4294967295, %v10994_v9  ;;  %v10996_v22 = vmov 0  ;;  %v10998_v34 = vld [vmem:[#allocation55_spill] sm:$0xff]  ;;  %vm11015_vm0 = vnez %v10567_v12 }
 0x385   : > { %v3770_v47 = vpop.f32.mrf.mxu3  ;;  %v3928_v28 = vpop.f32.mrf.mxu2  ;;  %vm8744_vm7 = vmand %vm2521_vm4, %vm2549_vm1  ;;  %vm10999_vm15 = vcmp.lt.s32.totalorder %v10998_v34, 14 }
 0x386   : > { %v3771_v31 = vadd.f32 %v7775_v46, %v3770_v47  ;;  %v10997_v22 = vsel %vm8744_vm7, 4294967295, %v10996_v22  ;;  %vm8752_vm12 = vmand %vm10989_vm9, %vm10999_vm15  ;;  %vm11010_vm9 = vcmp.lt.s32.totalorder %v10998_v34, 14  ;;  %v11013_v47 = vld [vmem:[#allocation66_spill] sm:$0xff] }
 0x387   : > { %vm8763_vm14 = vmand %vm8740_vm2, %vm11003_vm8 }
 0x388   : > { %v3850_v14 = vadd.f32 %v3849_v8, %v3771_v31  ;;  %v4009_v63 = vpop.f32.mrf.mxu1  ;;  %v5694_v8 = vld [vmem:[%s10052_s7 + $0x228] sm:$0xff]  ;;  %v11006_v31 = vld [vmem:[#allocation57_spill] sm:$0xff]  ;;  %vm2773_vm1 = vmand %vm8744_vm7, %vm11010_vm9 }
 0x389   : > { %vm11007_vm4 = vcmp.lt.s32.totalorder %v11006_v31, 14  ;;  %4360 = vmatpush.bf16.msrb.mxu3 %v5694_v8  ;;  %vm5375_vm8 = vmpackc.low %vm8752_vm12, %vm10993_vm10  ;;  %vm11014_vm12 = vcmp.lt.s32.totalorder %v11013_v47, 14 }
 0x38a   : > { %v3929_v13 = vadd.f32 %v3928_v28, %v3850_v14  ;;  %vm8771_vm15 = vmand %vm8744_vm7, %vm11007_vm4 }
 0x38b   : > { %vm5459_vm4 = vmpackc.low %vm8771_vm15, %vm8763_vm14  ;;  %vm2523_vm15 = vcmp.ge.s32.totalorder %v2495_v44, 0 }
 0x38c   : > { %v3854_v28 = vpop.f32.mrf.mxu0  ;;  %v8775_v14 = vadd.f32 %v4007_v7, %v3929_v13  ;;  %vm5501_vm9 = vmpackc.low %vm2773_vm1, %vm8740_vm2  ;;  %vm2551_vm1 = vcmp.lt.s32.totalorder %v2495_v44, 14  ;;  %v11030_v44 = vld [vmem:[#allocation64_spill] sm:$0xff] }
 0x38d   : > { %v3772_v62 = vpop.f32.mrf.mxu3  ;;  %v3930_v54 = vpop.f32.mrf.mxu2  ;;  %vm8807_vm10 = vmand %vm11015_vm0, %vm11014_vm12 }
 0x38e   : > { %v3773_v61 = vadd.f32 %v7775_v46, %v3772_v62  ;;  %v11011_v62 = vld [vmem:[#allocation60_spill] sm:$0xff]  ;;  %vm8822_vm12 = vmand %vm2523_vm15, %vm2551_vm1 }
 0x38f   : > { %5419 = vmatmul.msk.bf16.gmra.mxu0 %vm5417_vm11, %v6259_v48  ;;  %v2494_v34 = vadd.s32 1, %v11011_v62  ;;  %v11020_v62 = vmov 0 }
 0x390   : > { %v3852_v7 = vadd.f32 %v3851_v23, %v3773_v61  ;;  %v4012_v13 = vpop.f32.mrf.mxu1  ;;  %v11041_v23 = vld [vmem:[#allocation67_spill] sm:$0xff] }
 0x391   : > { %vm2522_vm11 = vcmp.ge.s32.totalorder %v2494_v34, 0  ;;  %vm2550_vm14 = vcmp.lt.s32.totalorder %v2494_v34, 14 }
 0x392   : > { %v3931_v1 = vadd.f32 %v3930_v54, %v3852_v7  ;;  %5377 = vmatmul.msk.bf16.gmra.mxu3 %vm5375_vm8, %v7024_v15  ;;  %5461 = vmatmul.msk.bf16.gmra.mxu2 %vm5459_vm4, %v7063_v19  ;;  %v11018_v19 = vld [vmem:[#allocation69_spill] sm:$0xff]  ;;  %vm11031_vm4 = vcmp.ge.s32.totalorder %v11030_v44, 0 }
 0x393   : > { %5503 = vmatmul.msk.bf16.gmra.mxu1 %vm5501_vm9, %v7167_v17  ;;  %vm11019_vm8 = vnez %v11018_v19  ;;  %vm8818_vm9 = vmand %vm2522_vm11, %vm2550_vm14  ;;  %v2497_v19 = vadd.s32 1, %v11041_v23 }
 0x394   : > { %v3856_v8 = vpop.f32.mrf.mxu0  ;;  %v8811_v61 = vadd.f32 %v4009_v63, %v3931_v1  ;;  %v11021_v62 = vsel %vm8818_vm9, 4294967295, %v11020_v62  ;;  %v11023_v63 = vmov 0  ;;  %v11026_v1 = vld [vmem:[#allocation63_spill] sm:$0xff]  ;;  %vm8838_vm11 = vmand %vm8818_vm9, %vm11031_vm4 }
 0x395   : > { %v3775_v31 = vpop.f32.mrf.mxu3  ;;  %v3933_v55 = vpop.f32.mrf.mxu2  ;;  %11022 = vst [vmem:[#allocation43_spill] sm:$0xff] %v11021_v62  ;;  %v11024_v63 = vsel %vm8822_vm12, 4294967295, %v11023_v63  ;;  %vm11027_vm2 = vcmp.lt.s32.totalorder %v11026_v1, 14  ;;  %vm11039_vm4 = vmpackc.low %vm8807_vm10, %vm11019_vm8  ;;  %v11040_v1 = vld [vmem:[#allocation68_spill] sm:$0xff] }
 0x396   : > { %v3776_v15 = vadd.f32 %v7775_v46, %v3775_v31  ;;  %11025 = vst [vmem:[#allocation41_spill] sm:$0xff] %v11024_v63  ;;  %vm8830_vm7 = vmand %vm11015_vm0, %vm11027_vm2  ;;  %v2496_v26 = vadd.s32 1, %v11040_v1  ;;  %v11042_v63 = vld [vmem:[#allocation73_spill] sm:$0xff] }
 0x397   : > { %vm2775_vm0 = vmand %vm8822_vm12, %vm11027_vm2 }
 0x398   : > { %v3855_v54 = vadd.f32 %v3854_v28, %v3776_v15  ;;  %v4014_v7 = vpop.f32.mrf.mxu1  ;;  %v11034_v15 = vld [vmem:[#allocation65_spill] sm:$0xff]  ;;  %vm5378_vm1 = vmpackc.low %vm8830_vm7, %vm11019_vm8  ;;  %vm11043_vm7 = vcmp.lt.s32.totalorder %v11042_v63, 14  ;;  %v11051_v63 = vmov 0 }
 0x399   : > { %vm11035_vm14 = vcmp.lt.s32.totalorder %v11034_v15, 14  ;;  %v11038_v15 = vld [vmem:[#allocation30_spill] sm:$0xff]  ;;  %vm5504_vm2 = vmpackc.low %vm2775_vm0, %vm8818_vm9  ;;  %vm2525_vm0 = vcmp.ge.s32.totalorder %v2497_v19, 0 }
 0x39a   : > { %v3934_v34 = vadd.f32 %v3933_v55, %v3855_v54  ;;  %vm8846_vm15 = vmand %vm8822_vm12, %vm11035_vm14  ;;  %v11044_v55 = vld [vmem:[#allocation77_spill] sm:$0xff] }
 0x39b   : > { %vm5462_vm14 = vmpackc.low %vm8846_vm15, %vm8838_vm11  ;;  %vm11045_vm10 = vnez %v11044_v55  ;;  %vm2524_vm11 = vcmp.ge.s32.totalorder %v2496_v26, 0  ;;  %vm2552_vm15 = vcmp.lt.s32.totalorder %v2496_v26, 14  ;;  %v11073_v55 = vld [vmem:[#allocation85_spill] sm:$0xff] }
 0x39c   : > { %v3859_v31 = vpop.f32.mrf.mxu0  ;;  %v8850_v12 = vadd.f32 %v4012_v13, %v3934_v34  ;;  %vm8882_vm8 = vmand %vm11045_vm10, %vm11043_vm7 }
 0x39d   : > { %v3777_v54 = vpop.f32.mrf.mxu3  ;;  %v3935_v47 = vpop.f32.mrf.mxu2 }
 0x39e   : > { %v3778_v44 = vadd.f32 %v7775_v46, %v3777_v54 }
 0x39f   : > { %5422 = vmatmul.msk.bf16.gmra.mxu0 %vm11039_vm4, %v11038_v15 }
 0x3a0   : > { %v3857_v13 = vadd.f32 %v3856_v8, %v3778_v44  ;;  %v4017_v34 = vpop.f32.mrf.mxu1  ;;  %v11070_v8 = vld [vmem:[#allocation74_spill] sm:$0xff] }
 0x3a2   : > { %v3936_v54 = vadd.f32 %v3935_v47, %v3857_v13  ;;  %5380 = vmatmul.msk.bf16.gmra.mxu3 %vm5378_vm1, %v7167_v17  ;;  %5464 = vmatmul.msk.bf16.gmra.mxu2 %vm5462_vm14, %v7200_v18  ;;  %vm2553_vm1 = vcmp.lt.s32.totalorder %v2497_v19, 14  ;;  %v11049_v18 = vld [vmem:[#allocation75_spill] sm:$0xff] }
 0x3a3   : > { %5506 = vmatmul.msk.bf16.gmra.mxu1 %vm5504_vm2, %v7290_v39  ;;  %vm11050_vm4 = vnez %v11049_v18  ;;  %vm8893_vm2 = vmand %vm2524_vm11, %vm2552_vm15  ;;  %v11060_v19 = vld [vmem:[#allocation71_spill] sm:$0xff]  ;;  %v2499_v18 = vadd.s32 1, %v11070_v8 }
 0x3a4   : > { %v3861_v28 = vpop.f32.mrf.mxu0  ;;  %v8886_v44 = vadd.f32 %v4014_v7, %v3936_v54  ;;  %vm5423_vm14 = vmpackc.low %vm8882_vm8, %vm11050_vm4  ;;  %v11052_v63 = vsel %vm8893_vm2, 4294967295, %v11051_v63  ;;  %v11054_v7 = vmov 0  ;;  %v11056_v54 = vld [vmem:[#allocation70_spill] sm:$0xff]  ;;  %vm11061_vm11 = vcmp.ge.s32.totalorder %v11060_v19, 0 }
 0x3a5   : > { %v3780_v47 = vpop.f32.mrf.mxu3  ;;  %v3938_v13 = vpop.f32.mrf.mxu2  ;;  %11053 = vst [vmem:[#allocation42_spill] sm:$0xff] %v11052_v63  ;;  %vm8897_vm7 = vmand %vm2525_vm0, %vm2553_vm1  ;;  %vm11057_vm9 = vcmp.lt.s32.totalorder %v11056_v54, 14  ;;  %vm11074_vm8 = vnez %v11073_v55  ;;  %v11094_v63 = vld [vmem:[#allocation80_spill] sm:$0xff] }
 0x3a6   : > { %11048 = vst [vmem:[#allocation47_spill] sm:$0xff] %v8886_v44  ;;  %v3781_v17 = vadd.f32 %v7775_v46, %v3780_v47  ;;  %v11055_v7 = vsel %vm8897_vm7, 4294967295, %v11054_v7  ;;  %vm8905_vm12 = vmand %vm11045_vm10, %vm11057_vm9  ;;  %vm11068_vm10 = vcmp.lt.s32.totalorder %v11056_v54, 14  ;;  %v11071_v47 = vld [vmem:[#allocation81_spill] sm:$0xff] }
 0x3a7   : > { %vm8916_vm15 = vmand %vm8893_vm2, %vm11061_vm11 }
 0x3a8   : > { %v3860_v1 = vadd.f32 %v3859_v31, %v3781_v17  ;;  %v4019_v23 = vpop.f32.mrf.mxu1  ;;  %v5693_v31 = vld [vmem:[%s10052_s7 + $0x220] sm:$0xff]  ;;  %v11064_v17 = vld [vmem:[#allocation72_spill] sm:$0xff]  ;;  %vm2777_vm1 = vmand %vm8897_vm7, %vm11068_vm10 }
 0x3a9   : > { %vm11065_vm0 = vcmp.lt.s32.totalorder %v11064_v17, 14  ;;  %4361 = vmatpush.bf16.msrb.mxu3 %v5693_v31  ;;  %v8937_v17 = vld [vmem:[%s10053_s8] ss:$0 sm:$0xff]  ;;  %vm5381_vm11 = vmpackc.low %vm8905_vm12, %vm11050_vm4  ;;  %vm11072_vm12 = vcmp.lt.s32.totalorder %v11071_v47, 14  ;;  %v11080_v47 = vmov 0 }
 0x3aa   : > { %v3939_v26 = vadd.f32 %v3938_v13, %v3860_v1  ;;  %vm8924_vm9 = vmand %vm8897_vm7, %vm11065_vm0 }
 0x3ab   : > { %vm5465_vm0 = vmpackc.low %vm8924_vm9, %vm8916_vm15  ;;  %vm2527_vm9 = vcmp.ge.s32.totalorder %v2499_v18, 0 }
 0x3ac   : > { %v3864_v13 = vpop.f32.mrf.mxu0  ;;  %v8928_v1 = vadd.f32 %v4017_v34, %v3939_v26  ;;  %vm5507_vm10 = vmpackc.low %vm2777_vm1, %vm8893_vm2  ;;  %vm2555_vm1 = vcmp.lt.s32.totalorder %v2499_v18, 14 }
 0x3ad   : > { %v3782_v62 = vpop.f32.mrf.mxu3  ;;  %v3940_v19 = vpop.f32.mrf.mxu2  ;;  %vm8965_vm4 = vmand %vm11074_vm8, %vm11072_vm12 }
 0x3ae   : > { %v3783_v44 = vadd.f32 %v8937_v17, %v3782_v62  ;;  %v11069_v62 = vld [vmem:[#allocation76_spill] sm:$0xff]  ;;  %vm8980_vm12 = vmand %vm2527_vm9, %vm2555_vm1 }
 0x3af   : > { %5425 = vmatmul.msk.bf16.gmra.mxu0 %vm5423_vm14, %v6307_v40  ;;  %v2498_v54 = vadd.s32 1, %v11069_v62 }
 0x3b0   : > { %v3862_v34 = vadd.f32 %v3861_v28, %v3783_v44  ;;  %v4022_v26 = vpop.f32.mrf.mxu1  ;;  %v11102_v28 = vld [vmem:[#allocation96_spill] sm:$0xff] }
 0x3b1   : > { %vm2526_vm14 = vcmp.ge.s32.totalorder %v2498_v54, 0  ;;  %vm2554_vm15 = vcmp.lt.s32.totalorder %v2498_v54, 14 }
 0x3b2   : > { %v3941_v46 = vadd.f32 %v3940_v19, %v3862_v34  ;;  %5383 = vmatmul.msk.bf16.gmra.mxu3 %vm5381_vm11, %v7290_v39  ;;  %5467 = vmatmul.msk.bf16.gmra.mxu2 %vm5465_vm0, %v7332_v57  ;;  %v11078_v57 = vld [vmem:[#allocation83_spill] sm:$0xff] }
 0x3b3   : > { %5509 = vmatmul.msk.bf16.gmra.mxu1 %vm5507_vm10, %v7433_v21  ;;  %vm11079_vm11 = vnez %v11078_v57  ;;  %vm8976_vm10 = vmand %vm2526_vm14, %vm2554_vm15  ;;  %vm11095_vm15 = vcmp.lt.s32.totalorder %v11094_v63, 14  ;;  %v11099_v63 = vld [vmem:[#allocation33_spill] sm:$0xff]  ;;  %v11103_v57 = vld [vmem:[#allocation82_spill] sm:$0xff] }
 0x3b4   : > { %v3866_v31 = vpop.f32.mrf.mxu0  ;;  %v8969_v44 = vadd.f32 %v4019_v23, %v3941_v46  ;;  %v11081_v47 = vsel %vm8976_vm10, 4294967295, %v11080_v47  ;;  %v11083_v23 = vmov 0  ;;  %v11086_v46 = vld [vmem:[#allocation78_spill] sm:$0xff]  ;;  %vm9004_vm9 = vmand %vm8980_vm12, %vm11095_vm15 }
 0x3b5   : > { %v3785_v19 = vpop.f32.mrf.mxu3  ;;  %v3943_v34 = vpop.f32.mrf.mxu2  ;;  %11082 = vst [vmem:[#allocation40_spill] sm:$0xff] %v11081_v47  ;;  %v11084_v23 = vsel %vm8980_vm12, 4294967295, %v11083_v23  ;;  %vm11087_vm2 = vcmp.lt.s32.totalorder %v11086_v46, 14  ;;  %v11101_v46 = vld [vmem:[#allocation84_spill] sm:$0xff] }
 0x3b6   : > { %11077 = vst [vmem:[#allocation46_spill] sm:$0xff] %v8969_v44  ;;  %v3786_v39 = vadd.f32 %v8937_v17, %v3785_v19  ;;  %vm8988_vm7 = vmand %vm11074_vm8, %vm11087_vm2  ;;  %v11090_v19 = vld [vmem:[#allocation79_spill] sm:$0xff]  ;;  %v2500_v18 = vadd.s32 1, %v11101_v46 }
 0x3b7   : > { %11085 = vst [vmem:[#allocation48_spill] sm:$0xff] %v11084_v23  ;;  %vm11091_vm0 = vcmp.ge.s32.totalorder %v11090_v19, 0  ;;  %vm2779_vm8 = vmand %vm8980_vm12, %vm11087_vm2  ;;  %v2501_v23 = vadd.s32 1, %v11103_v57  ;;  %v11112_v57 = vld [vmem:[#allocation92_spill] sm:$0xff]  ;;  %v11136_v46 = vld [vmem:[#allocation107_spill] sm:$0xff] }
 0x3b8   : > { %v3865_v62 = vadd.f32 %v3864_v13, %v3786_v39  ;;  %v4024_v8 = vpop.f32.mrf.mxu1  ;;  %vm8996_vm14 = vmand %vm8976_vm10, %vm11091_vm0  ;;  %v5692_v13 = vld [vmem:[%s10052_s7 + $0x218] sm:$0xff] }
 0x3b9   : > { %vm5384_vm1 = vmpackc.low %vm8988_vm7, %vm11079_vm11  ;;  %4362 = vmatpush.bf16.msrb.mxu3 %v5692_v13  ;;  %v11124_v13 = vld [vmem:[#allocation87_spill] sm:$0xff] }
 0x3ba   : > { %v3944_v54 = vadd.f32 %v3943_v34, %v3865_v62  ;;  %vm11100_vm0 = vmpackc.low %vm8965_vm4, %vm11079_vm11  ;;  %v11105_v34 = vld [vmem:[#allocation89_spill] sm:$0xff] }
 0x3bb   : > { %vm5468_vm15 = vmpackc.low %vm9004_vm9, %vm8996_vm14  ;;  %vm11106_vm7 = vcmp.lt.s32.totalorder %v11105_v34, 14  ;;  %vm2528_vm14 = vcmp.ge.s32.totalorder %v2500_v18, 0  ;;  %vm2556_vm9 = vcmp.lt.s32.totalorder %v2500_v18, 14 }
 0x3bc   : > { %v3869_v39 = vpop.f32.mrf.mxu0  ;;  %v9008_v55 = vadd.f32 %v4022_v26, %v3944_v54  ;;  %vm5510_vm2 = vmpackc.low %vm2779_vm8, %vm8976_vm10  ;;  %vm2529_vm8 = vcmp.ge.s32.totalorder %v2501_v23, 0 }
 0x3bd   : > { %v3787_v62 = vpop.f32.mrf.mxu3  ;;  %v3945_v44 = vpop.f32.mrf.mxu2 }
 0x3be   : > { %11098 = vst [vmem:[#allocation52_spill] sm:$0xff] %v9008_v55  ;;  %v3788_v19 = vadd.f32 %v8937_v17, %v3787_v62  ;;  %v11104_v55 = vld [vmem:[#allocation104_spill] sm:$0xff] }
 0x3bf   : > { %5428 = vmatmul.msk.bf16.gmra.mxu0 %vm11100_vm0, %v11099_v63  ;;  %vm11113_vm0 = vnez %v11112_v57  ;;  %v11114_v63 = vmov 0  ;;  %v11137_v57 = vld [vmem:[#allocation90_spill] sm:$0xff] }
 0x3c0   : > { %v3867_v26 = vadd.f32 %v3866_v31, %v3788_v19  ;;  %v4027_v54 = vpop.f32.mrf.mxu1  ;;  %v11107_v19 = vld [vmem:[#allocation93_spill] sm:$0xff] }
 0x3c1   : > { %vm11108_vm4 = vnez %v11107_v19 }
 0x3c2   : > { %v3946_v62 = vadd.f32 %v3945_v44, %v3867_v26  ;;  %5386 = vmatmul.msk.bf16.gmra.mxu3 %vm5384_vm1, %v7433_v21  ;;  %5470 = vmatmul.msk.bf16.gmra.mxu2 %vm5468_vm15, %v11102_v28  ;;  %vm9043_vm11 = vmand %vm11108_vm4, %vm11106_vm7  ;;  %vm2557_vm1 = vcmp.lt.s32.totalorder %v2501_v23, 14  ;;  %vm11125_vm15 = vcmp.ge.s32.totalorder %v11124_v13, 0 }
 0x3c3   : > { %5512 = vmatmul.msk.bf16.gmra.mxu1 %vm5510_vm2, %v11104_v55  ;;  %vm9054_vm2 = vmand %vm2528_vm14, %vm2556_vm9 }
 0x3c4   : > { %v3871_v31 = vpop.f32.mrf.mxu0  ;;  %v9047_v21 = vadd.f32 %v4024_v8, %v3946_v62  ;;  %v11115_v63 = vsel %vm9054_vm2, 4294967295, %v11114_v63  ;;  %vm9058_vm7 = vmand %vm2529_vm8, %vm2557_vm1  ;;  %v11117_v8 = vmov 0  ;;  %v11120_v62 = vld [vmem:[#allocation86_spill] sm:$0xff] }
 0x3c5   : > { %v3790_v44 = vpop.f32.mrf.mxu3  ;;  %v3948_v26 = vpop.f32.mrf.mxu2  ;;  %11116 = vst [vmem:[#allocation54_spill] sm:$0xff] %v11115_v63  ;;  %v11118_v8 = vsel %vm9058_vm7, 4294967295, %v11117_v8  ;;  %vm11121_vm10 = vcmp.lt.s32.totalorder %v11120_v62, 14  ;;  %vm9074_vm14 = vmand %vm9054_vm2, %vm11125_vm15  ;;  %v11135_v62 = vld [vmem:[#allocation91_spill] sm:$0xff]  ;;  %v11161_v63 = vld [vmem:[#allocation97_spill] sm:$0xff] }
 0x3c6   : > { %11111 = vst [vmem:[#allocation25_spill] sm:$0xff] %v9047_v21  ;;  %v3791_v28 = vadd.f32 %v8937_v17, %v3790_v44  ;;  %vm9066_vm12 = vmand %vm11108_vm4, %vm11121_vm10  ;;  %v2502_v23 = vadd.s32 1, %v11135_v62  ;;  %v11146_v62 = vld [vmem:[#allocation100_spill] sm:$0xff] }
 0x3c7   : > { %11119 = vst [vmem:[#allocation53_spill] sm:$0xff] %v11118_v8  ;;  %vm2781_vm4 = vmand %vm9058_vm7, %vm11121_vm10  ;;  %v2503_v8 = vadd.s32 1, %v11137_v57 }
 0x3c8   : > { %v3870_v34 = vadd.f32 %v3869_v39, %v3791_v28  ;;  %v4029_v47 = vpop.f32.mrf.mxu1  ;;  %v11128_v28 = vld [vmem:[#allocation88_spill] sm:$0xff]  ;;  %vm5387_vm1 = vmpackc.low %vm9066_vm12, %vm11113_vm0 }
 0x3c9   : > { %vm11129_vm9 = vcmp.lt.s32.totalorder %v11128_v28, 14  ;;  %v11133_v28 = vld [vmem:[#allocation34_spill] sm:$0xff]  ;;  %vm11134_vm15 = vmpackc.low %vm9043_vm11, %vm11113_vm0 }
 0x3ca   : > { %v3949_v18 = vadd.f32 %v3948_v26, %v3870_v34  ;;  %vm9082_vm8 = vmand %vm9058_vm7, %vm11129_vm9  ;;  %v11141_v34 = vld [vmem:[#allocation102_spill] sm:$0xff] }
 0x3cb   : > { %vm5471_vm9 = vmpackc.low %vm9082_vm8, %vm9074_vm14  ;;  %vm11142_vm11 = vnez %v11141_v34  ;;  %vm2530_vm14 = vcmp.ge.s32.totalorder %v2502_v23, 0  ;;  %vm2558_vm8 = vcmp.lt.s32.totalorder %v2502_v23, 14 }
 0x3cc   : > { %v3874_v44 = vpop.f32.mrf.mxu0  ;;  %v9086_v19 = vadd.f32 %v4027_v54, %v3949_v18  ;;  %vm5513_vm10 = vmpackc.low %vm2781_vm4, %vm9054_vm2  ;;  %vm2531_vm4 = vcmp.ge.s32.totalorder %v2503_v8, 0 }
 0x3cd   : > { %v3792_v26 = vpop.f32.mrf.mxu3  ;;  %v3950_v21 = vpop.f32.mrf.mxu2 }
 0x3ce   : > { %11132 = vst [vmem:[#allocation62_spill] sm:$0xff] %v9086_v19  ;;  %v3793_v13 = vadd.f32 %v8937_v17, %v3792_v26  ;;  %v11138_v19 = vld [vmem:[#allocation114_spill] sm:$0xff] }
 0x3cf   : > { %5431 = vmatmul.msk.bf16.gmra.mxu0 %vm11134_vm15, %v11133_v28  ;;  %v11139_v28 = vld [vmem:[#allocation98_spill] sm:$0xff]  ;;  %vm11147_vm15 = vnez %v11146_v62 }
 0x3d0   : > { %v3872_v54 = vadd.f32 %v3871_v31, %v3793_v13  ;;  %v4032_v18 = vpop.f32.mrf.mxu1  ;;  %vm11140_vm12 = vcmp.lt.s32.totalorder %v11139_v28, 14  ;;  %v11148_v28 = vmov 0  ;;  %v11168_v31 = vld [vmem:[#allocation99_spill] sm:$0xff] }
 0x3d1   : > { %vm9118_vm0 = vmand %vm11142_vm11, %vm11140_vm12  ;;  %v2505_v62 = vadd.s32 1, %v11168_v31 }
 0x3d2   : > { %v3951_v26 = vadd.f32 %v3950_v21, %v3872_v54  ;;  %5389 = vmatmul.msk.bf16.gmra.mxu3 %vm5387_vm1, %v11104_v55  ;;  %5473 = vmatmul.msk.bf16.gmra.mxu2 %vm5471_vm9, %v11136_v46  ;;  %vm2559_vm1 = vcmp.lt.s32.totalorder %v2503_v8, 14 }
 0x3d3   : > { %5515 = vmatmul.msk.bf16.gmra.mxu1 %vm5513_vm10, %v11138_v19  ;;  %vm9129_vm10 = vmand %vm2530_vm14, %vm2558_vm8  ;;  %vm11162_vm8 = vcmp.lt.s32.totalorder %v11161_v63, 14  ;;  %v11165_v63 = vld [vmem:[#allocation35_spill] sm:$0xff] }
 0x3d4   : > { %v3876_v39 = vpop.f32.mrf.mxu0  ;;  %v9122_v13 = vadd.f32 %v4029_v47, %v3951_v26  ;;  %v11149_v28 = vsel %vm9129_vm10, 4294967295, %v11148_v28  ;;  %vm9133_vm12 = vmand %vm2531_vm4, %vm2559_vm1  ;;  %v11151_v47 = vmov 0  ;;  %v11153_v26 = vld [vmem:[#allocation94_spill] sm:$0xff] }
 0x3d5   : > { %v3795_v21 = vpop.f32.mrf.mxu3  ;;  %v3953_v54 = vpop.f32.mrf.mxu2  ;;  %11150 = vst [vmem:[#allocation55_spill] sm:$0xff] %v11149_v28  ;;  %v11152_v47 = vsel %vm9133_vm12, 4294967295, %v11151_v47  ;;  %vm11154_vm2 = vcmp.lt.s32.totalorder %v11153_v26, 14  ;;  %vm9157_vm4 = vmand %vm9133_vm12, %vm11162_vm8  ;;  %v11167_v26 = vld [vmem:[#allocation101_spill] sm:$0xff]  ;;  %v11178_v28 = vmov 0 }
 0x3d6   : > { %11145 = vst [vmem:[#allocation61_spill] sm:$0xff] %v9122_v13  ;;  %v3796_v55 = vadd.f32 %v8937_v17, %v3795_v21  ;;  %vm9141_vm7 = vmand %vm11142_vm11, %vm11154_vm2  ;;  %v11157_v21 = vld [vmem:[#allocation95_spill] sm:$0xff]  ;;  %v2504_v8 = vadd.s32 1, %v11167_v26 }
 0x3d7   : > { %vm11158_vm9 = vcmp.ge.s32.totalorder %v11157_v21, 0  ;;  %vm2783_vm11 = vmand %vm9133_vm12, %vm11154_vm2 }
 0x3d8   : > { %v3875_v46 = vadd.f32 %v3874_v44, %v3796_v55  ;;  %v4034_v57 = vpop.f32.mrf.mxu1  ;;  %vm9149_vm14 = vmand %vm9129_vm10, %vm11158_vm9  ;;  %v5691_v44 = vld [vmem:[%s10052_s7 + $0x210] sm:$0xff] }
 0x3d9   : > { %vm5390_vm1 = vmpackc.low %vm9141_vm7, %vm11147_vm15  ;;  %4363 = vmatpush.bf16.msrb.mxu3 %v5691_v44 }
 0x3da   : > { %v3954_v23 = vadd.f32 %v3953_v54, %v3875_v46  ;;  %vm11166_vm9 = vmpackc.low %vm9118_vm0, %vm11147_vm15  ;;  %v11169_v54 = vld [vmem:[#allocation108_spill] sm:$0xff] }
 0x3db   : > { %vm5474_vm8 = vmpackc.low %vm9157_vm4, %vm9149_vm14  ;;  %vm11170_vm7 = vcmp.lt.s32.totalorder %v11169_v54, 14  ;;  %vm2532_vm14 = vcmp.ge.s32.totalorder %v2504_v8, 0  ;;  %vm2560_vm4 = vcmp.lt.s32.totalorder %v2504_v8, 14  ;;  %v11176_v54 = vld [vmem:[#allocation111_spill] sm:$0xff] }
 0x3dc   : > { %v3879_v55 = vpop.f32.mrf.mxu0  ;;  %v9161_v34 = vadd.f32 %v4032_v18, %v3954_v23  ;;  %vm5516_vm2 = vmpackc.low %vm2783_vm11, %vm9129_vm10  ;;  %vm2533_vm11 = vcmp.ge.s32.totalorder %v2505_v62, 0 }
 0x3dd   : > { %v3797_v46 = vpop.f32.mrf.mxu3  ;;  %v3955_v13 = vpop.f32.mrf.mxu2 }
 0x3de   : > { %v3798_v21 = vadd.f32 %v8937_v17, %v3797_v46 }
 0x3df   : > { %5434 = vmatmul.msk.bf16.gmra.mxu0 %vm11166_vm9, %v11165_v63  ;;  %vm11177_vm9 = vnez %v11176_v54 }
 0x3e0   : > { %v3877_v18 = vadd.f32 %v3876_v39, %v3798_v21  ;;  %v4037_v23 = vpop.f32.mrf.mxu1  ;;  %v11171_v21 = vld [vmem:[#allocation112_spill] sm:$0xff] }
 0x3e1   : > { %vm11172_vm0 = vnez %v11171_v21 }
 0x3e2   : > { %v3956_v46 = vadd.f32 %v3955_v13, %v3877_v18  ;;  %5392 = vmatmul.msk.bf16.gmra.mxu3 %vm5390_vm1, %v11138_v19  ;;  %5476 = vmatmul.msk.bf16.gmra.mxu2 %vm5474_vm8, %v7753_v51  ;;  %vm9196_vm15 = vmand %vm11172_vm0, %vm11170_vm7  ;;  %v5704_v51 = vld [vmem:[%s10054_s9 + $0x38] sm:$0xff]  ;;  %vm2561_vm1 = vcmp.lt.s32.totalorder %v2505_v62, 14  ;;  %v11198_v62 = vld [vmem:[#allocation134_spill] sm:$0xff] }
 0x3e3   : > { %5518 = vmatmul.msk.bf16.gmra.mxu1 %vm5516_vm2, %v7867_v11  ;;  %4547 = vmatpush.bf16.msrb.mxu0 %v5704_v51  ;;  %vm9210_vm2 = vmand %vm2532_vm14, %vm2560_vm4  ;;  %v11188_v51 = vld [vmem:[#allocation105_spill] sm:$0xff] }
 0x3e4   : > { %v3881_v39 = vpop.f32.mrf.mxu0  ;;  %v9203_v19 = vadd.f32 %v4034_v57, %v3956_v46  ;;  %v11179_v28 = vsel %vm9210_vm2, 4294967295, %v11178_v28  ;;  %vm9214_vm7 = vmand %vm2533_vm11, %vm2561_vm1  ;;  %v11181_v57 = vmov 0  ;;  %vm11189_vm8 = vcmp.ge.s32.totalorder %v11188_v51, 0 }
 0x3e5   : > { %v3800_v13 = vpop.f32.mrf.mxu3  ;;  %v3958_v18 = vpop.f32.mrf.mxu2  ;;  %11180 = vst [vmem:[#allocation57_spill] sm:$0xff] %v11179_v28  ;;  %v11182_v57 = vsel %vm9214_vm7, 4294967295, %v11181_v57  ;;  %vm9230_vm14 = vmand %vm9210_vm2, %vm11189_vm8 }
 0x3e6   : > { %11175 = vst [vmem:[#allocation56_spill] sm:$0xff] %v9203_v19  ;;  %v3801_v31 = vadd.f32 %v8937_v17, %v3800_v13  ;;  %v11184_v13 = vld [vmem:[#allocation103_spill] sm:$0xff]  ;;  %v11192_v19 = vld [vmem:[#allocation106_spill] sm:$0xff]  ;;  %vm11195_vm8 = vmpackc.low %vm9196_vm15, %vm11177_vm9 }
 0x3e7   : > { %11183 = vst [vmem:[#allocation60_spill] sm:$0xff] %v11182_v57  ;;  %vm11185_vm10 = vcmp.lt.s32.totalorder %v11184_v13, 14  ;;  %vm11193_vm4 = vcmp.lt.s32.totalorder %v11192_v19, 14  ;;  %v11197_v13 = vld [vmem:[#allocation109_spill] sm:$0xff] }
 0x3e8   : > { %v3880_v44 = vadd.f32 %v3879_v55, %v3801_v31  ;;  %v4039_v46 = vpop.f32.mrf.mxu1  ;;  %vm9222_vm12 = vmand %vm11172_vm0, %vm11185_vm10  ;;  %v2507_v26 = vadd.s32 1, %v11197_v13  ;;  %v11199_v57 = vld [vmem:[#allocation117_spill] sm:$0xff] }
 0x3e9   : > { %vm2645_vm11 = vmand %vm9214_vm7, %vm11193_vm4  ;;  %v11201_v55 = vld [vmem:[#allocation121_spill] sm:$0xff] }
 0x3ea   : > { %v3959_v8 = vadd.f32 %v3958_v18, %v3880_v44  ;;  %vm2785_vm0 = vmand %vm9214_vm7, %vm11185_vm10  ;;  %vm11202_vm15 = vnez %v11201_v55  ;;  %v11238_v55 = vld [vmem:[#allocation133_spill] sm:$0xff] }
 0x3eb   : > { %vm5393_vm1 = vmpackc.low %vm9222_vm12, %vm11177_vm9  ;;  %vm11200_vm12 = vcmp.lt.s32.totalorder %v11199_v57, 14  ;;  %v11209_v57 = vmov 0 }
 0x3ec   : > { %v4130_v31 = vpop.f32.mrf.mxu0  ;;  %v9238_v18 = vadd.f32 %v4037_v23, %v3959_v8  ;;  %vm5477_vm4 = vmpackc.low %vm2645_vm11, %vm9230_vm14 }
 0x3ed   : > { %v3802_v21 = vpop.f32.mrf.mxu3  ;;  %v3960_v44 = vpop.f32.mrf.mxu2  ;;  %vm5519_vm10 = vmpackc.low %vm2785_vm0, %vm9210_vm2  ;;  %vm2535_vm0 = vcmp.ge.s32.totalorder %v2507_v26, 0 }
 0x3ee   : > { %11194 = vst [vmem:[#allocation59_spill] sm:$0xff] %v9238_v18  ;;  %v3803_v51 = vadd.f32 %v8937_v17, %v3802_v21  ;;  %v11196_v17 = vld [vmem:[#allocation110_spill] sm:$0xff]  ;;  %vm9268_vm9 = vmand %vm11202_vm15, %vm11200_vm12 }
 0x3ef   : > { %5437 = vmatmul.msk.bf16.gmra.mxu0 %vm11195_vm8, %v6366_v41  ;;  %v2506_v19 = vadd.s32 1, %v11196_v17  ;;  %v11207_v17 = vld [vmem:[#allocation120_spill] sm:$0xff]  ;;  %v11228_v41 = vld [vmem:[#allocation37_spill] sm:$0xff] }
 0x3f0   : > { %v3882_v23 = vadd.f32 %v3881_v39, %v3803_v51  ;;  %v4288_v54 = vpop.f32.mrf.mxu1  ;;  %vm11208_vm8 = vnez %v11207_v17  ;;  %v11230_v39 = vld [vmem:[#allocation118_spill] sm:$0xff] }
 0x3f1   : > { %vm2534_vm14 = vcmp.ge.s32.totalorder %v2506_v19, 0  ;;  %vm2562_vm11 = vcmp.lt.s32.totalorder %v2506_v19, 14  ;;  %v11214_v19 = vld [vmem:[#allocation113_spill] sm:$0xff]  ;;  %v2509_v17 = vadd.s32 1, %v11230_v39 }
 0x3f2   : > { %v3961_v8 = vadd.f32 %v3960_v44, %v3882_v23  ;;  %5395 = vmatmul.msk.bf16.gmra.mxu3 %vm5393_vm1, %v7867_v11  ;;  %5479 = vmatmul.msk.bf16.gmra.mxu2 %vm5477_vm4, %v7907_v20  ;;  %v11206_v20 = vld [vmem:[#allocation123_spill] sm:$0xff]  ;;  %vm2563_vm1 = vcmp.lt.s32.totalorder %v2507_v26, 14  ;;  %vm5438_vm4 = vmpackc.low %vm9268_vm9, %vm11208_vm8  ;;  %vm11215_vm2 = vcmp.lt.s32.totalorder %v11214_v19, 14  ;;  %v11231_v26 = vld [vmem:[#allocation144_spill] sm:$0xff] }
 0x3f3   : > { %5521 = vmatmul.msk.bf16.gmra.mxu1 %vm5519_vm10, %v11198_v62  ;;  %vm9279_vm10 = vmand %vm2534_vm14, %vm2562_vm11 }
 0x3f4   : > { %v4132_v21 = vpop.f32.mrf.mxu0  ;;  %v9272_v51 = vadd.f32 %v4039_v46, %v3961_v8  ;;  %v11210_v57 = vsel %vm9279_vm10, 4294967295, %v11209_v57  ;;  %vm9283_vm12 = vmand %vm2535_vm0, %vm2563_vm1  ;;  %v11212_v46 = vmov 0 }
 0x3f5   : > { %v4051_v44 = vpop.f32.mrf.mxu3  ;;  %v4209_v11 = vpop.f32.mrf.mxu2  ;;  %11211 = vst [vmem:[#allocation63_spill] sm:$0xff] %v11210_v57  ;;  %v11213_v46 = vsel %vm9283_vm12, 4294967295, %v11212_v46  ;;  %vm9291_vm7 = vmand %vm11202_vm15, %vm11215_vm2  ;;  %vm11226_vm15 = vcmp.lt.s32.totalorder %v11214_v19, 14  ;;  %v5703_v19 = vld [vmem:[%s10054_s9 + $0x30] sm:$0xff]  ;;  %v11256_v57 = vld [vmem:[#allocation38_spill] sm:$0xff] }
 0x3f6   : > { %11205 = vst [vmem:[#allocation69_spill] sm:$0xff] %v9272_v51  ;;  %v4052_v23 = vadd.f32 %v4051_v44, %v11206_v20  ;;  %v11218_v44 = vld [vmem:[#allocation115_spill] sm:$0xff]  ;;  %vm2787_vm1 = vmand %vm9283_vm12, %vm11226_vm15  ;;  %v11227_v51 = vld [vmem:[#allocation128_spill] sm:$0xff]  ;;  %4548 = vmatpush.bf16.msrb.mxu0 %v5703_v19 }
 0x3f7   : > { %vm11219_vm14 = vcmp.ge.s32.totalorder %v11218_v44, 0  ;;  %vm5522_vm15 = vmpackc.low %vm2787_vm1, %vm9279_vm10  ;;  %vm2565_vm1 = vcmp.lt.s32.totalorder %v2509_v17, 14  ;;  %v11245_v19 = vld [vmem:[#allocation122_spill] sm:$0xff]  ;;  %v11259_v20 = vld [vmem:[#allocation127_spill] sm:$0xff] }
 0x3f8   : > { %v4131_v13 = vadd.f32 %v4130_v31, %v4052_v23  ;;  %v5690_v31 = vld [vmem:[%s10052_s7 + $0x208] sm:$0xff]  ;;  %vm9302_vm11 = vmand %vm9279_vm10, %vm11219_vm14  ;;  %v11222_v23 = vld [vmem:[#allocation116_spill] sm:$0xff]  ;;  %vm11246_vm10 = vcmp.lt.s32.totalorder %v11245_v19, 14 }
 0x3f9   : > { %vm11223_vm0 = vcmp.lt.s32.totalorder %v11222_v23, 14  ;;  %4364 = vmatpush.bf16.msrb.mxu3 %v5690_v31  ;;  %vm5396_vm14 = vmpackc.low %vm9291_vm7, %vm11208_vm8  ;;  %v4290_v23 = vpop.f32.mrf.mxu1  ;;  %v11258_v19 = vld [vmem:[#allocation129_spill] sm:$0xff] }
 0x3fa   : > { %v4210_v8 = vadd.f32 %v4209_v11, %v4131_v13  ;;  %vm9310_vm2 = vmand %vm9283_vm12, %vm11223_vm0 }
 0x3fb   : > { %vm5480_vm0 = vmpackc.low %vm9310_vm2, %vm9302_vm11  ;;  %vm2537_vm2 = vcmp.ge.s32.totalorder %v2509_v17, 0  ;;  %v2511_v17 = vadd.s32 1, %v11259_v20 }
 0x3fc   : > { %v4135_v11 = vpop.f32.mrf.mxu0  ;;  %v9314_v13 = vadd.f32 %v4288_v54, %v4210_v8 }
 0x3fd   : > { %v4053_v28 = vpop.f32.mrf.mxu3  ;;  %v4211_v44 = vpop.f32.mrf.mxu2 }
 0x3fe   : > { %v4054_v18 = vadd.f32 %v4053_v28, %v11227_v51  ;;  %v11229_v28 = vld [vmem:[#allocation119_spill] sm:$0xff] }
 0x3ff   : > { %5440 = vmatmul.msk.bf16.gmra.mxu0 %vm5438_vm4, %v11228_v41  ;;  %v2508_v51 = vadd.s32 1, %v11229_v28  ;;  %v11239_v28 = vld [vmem:[#allocation130_spill] sm:$0xff] }
 0x400   : > { %v4133_v54 = vadd.f32 %v4132_v21, %v4054_v18  ;;  %v11232_v18 = vld [vmem:[#allocation126_spill] sm:$0xff]  ;;  %v11234_v21 = vld [vmem:[#allocation131_spill] sm:$0xff] }
 0x401   : > { %vm11233_vm7 = vcmp.lt.s32.totalorder %v11232_v18, 14  ;;  %vm11235_vm9 = vnez %v11234_v21  ;;  %vm2536_vm4 = vcmp.ge.s32.totalorder %v2508_v51, 0  ;;  %vm2564_vm11 = vcmp.lt.s32.totalorder %v2508_v51, 14 }
 0x402   : > { %v4212_v8 = vadd.f32 %v4211_v44, %v4133_v54  ;;  %5398 = vmatmul.msk.bf16.gmra.mxu3 %vm5396_vm14, %v11198_v62  ;;  %5482 = vmatmul.msk.bf16.gmra.mxu2 %vm5480_vm0, %v8063_v43  ;;  %vm9349_vm8 = vmand %vm11235_vm9, %vm11233_vm7  ;;  %vm11240_vm14 = vnez %v11239_v28  ;;  %v11241_v18 = vmov 0 }
 0x403   : > { %5524 = vmatmul.msk.bf16.gmra.mxu1 %vm5522_vm15, %v11231_v26  ;;  %vm9360_vm15 = vmand %vm2536_vm4, %vm2564_vm11 }
 0x404   : > { %v4137_v31 = vpop.f32.mrf.mxu0  ;;  %v9353_v62 = vadd.f32 %v4290_v23, %v4212_v8  ;;  %v11242_v18 = vsel %vm9360_vm15, 4294967295, %v11241_v18  ;;  %v4293_v23 = vpop.f32.mrf.mxu1  ;;  %vm9364_vm7 = vmand %vm2537_vm2, %vm2565_vm1  ;;  %v11243_v8 = vmov 0 }
 0x405   : > { %v4056_v43 = vpop.f32.mrf.mxu3  ;;  %v4214_v54 = vpop.f32.mrf.mxu2  ;;  %v11244_v8 = vsel %vm9364_vm7, 4294967295, %v11243_v8  ;;  %vm9372_vm12 = vmand %vm11235_vm9, %vm11246_vm10 }
 0x406   : > { %v4057_v44 = vadd.f32 %v4056_v43, %v11238_v55  ;;  %v11249_v43 = vld [vmem:[#allocation124_spill] sm:$0xff]  ;;  %vm2789_vm9 = vmand %vm9364_vm7, %vm11246_vm10 }
 0x407   : > { %vm11250_vm0 = vcmp.ge.s32.totalorder %v11249_v43, 0  ;;  %vm5399_vm1 = vmpackc.low %vm9372_vm12, %vm11240_vm14 }
 0x408   : > { %v4136_v39 = vadd.f32 %v4135_v11, %v4057_v44  ;;  %vm9380_vm4 = vmand %vm9360_vm15, %vm11250_vm0  ;;  %v11253_v44 = vld [vmem:[#allocation125_spill] sm:$0xff] }
 0x409   : > { %vm11254_vm11 = vcmp.lt.s32.totalorder %v11253_v44, 14  ;;  %vm11257_vm0 = vmpackc.low %vm9349_vm8, %vm11240_vm14  ;;  %v2510_v44 = vadd.s32 1, %v11258_v19  ;;  %v11261_v11 = vld [vmem:[#allocation137_spill] sm:$0xff] }
 0x40a   : > { %v4215_v51 = vadd.f32 %v4214_v54, %v4136_v39  ;;  %vm2649_vm2 = vmand %vm9364_vm7, %vm11254_vm11  ;;  %v11255_v39 = vld [vmem:[#allocation138_spill] sm:$0xff]  ;;  %vm11262_vm12 = vcmp.lt.s32.totalorder %v11261_v11, 14  ;;  %v11268_v19 = vld [vmem:[#allocation141_spill] sm:$0xff]  ;;  %v11271_v11 = vmov 0 }
 0x40b   : > { %vm5483_vm11 = vmpackc.low %vm2649_vm2, %vm9380_vm4  ;;  %vm2538_vm4 = vcmp.ge.s32.totalorder %v2510_v44, 0  ;;  %vm2566_vm2 = vcmp.lt.s32.totalorder %v2510_v44, 14  ;;  %v11275_v44 = vld [vmem:[#allocation132_spill] sm:$0xff] }
 0x40c   : > { %v4140_v55 = vpop.f32.mrf.mxu0  ;;  %v9388_v54 = vadd.f32 %v4293_v23, %v4215_v51  ;;  %vm5525_vm10 = vmpackc.low %vm2789_vm9, %vm9360_vm15  ;;  %v4295_v28 = vpop.f32.mrf.mxu1  ;;  %vm2539_vm9 = vcmp.ge.s32.totalorder %v2511_v17, 0  ;;  %vm11276_vm15 = vcmp.lt.s32.totalorder %v11275_v44, 14 }
 0x40d   : > { %v4058_v21 = vpop.f32.mrf.mxu3  ;;  %v4216_v51 = vpop.f32.mrf.mxu2 }
 0x40e   : > { %v4059_v43 = vadd.f32 %v4058_v21, %v11255_v39 }
 0x40f   : > { %5443 = vmatmul.msk.bf16.gmra.mxu0 %vm11257_vm0, %v11256_v57  ;;  %vm11269_vm0 = vnez %v11268_v19  ;;  %v11289_v19 = vld [vmem:[#allocation147_spill] sm:$0xff] }
 0x410   : > { %v4138_v23 = vadd.f32 %v4137_v31, %v4059_v43  ;;  %v11263_v31 = vld [vmem:[#allocation142_spill] sm:$0xff] }
 0x411   : > { %vm11264_vm8 = vnez %v11263_v31  ;;  %v5702_v31 = vld [vmem:[%s10054_s9 + $0x28] sm:$0xff] }
 0x412   : > { %v4217_v21 = vadd.f32 %v4216_v51, %v4138_v23  ;;  %5401 = vmatmul.msk.bf16.gmra.mxu3 %vm5399_vm1, %v11231_v26  ;;  %5485 = vmatmul.msk.bf16.gmra.mxu2 %vm5483_vm11, %v8276_v53  ;;  %vm9420_vm14 = vmand %vm11264_vm8, %vm11262_vm12  ;;  %v11267_v53 = vld [vmem:[#allocation145_spill] sm:$0xff]  ;;  %vm2567_vm1 = vcmp.lt.s32.totalorder %v2511_v17, 14  ;;  %v11288_v17 = vld [vmem:[#allocation139_spill] sm:$0xff] }
 0x413   : > { %5527 = vmatmul.msk.bf16.gmra.mxu1 %vm5525_vm10, %v8442_v25  ;;  %vm5444_vm11 = vmpackc.low %vm9420_vm14, %vm11269_vm0  ;;  %4549 = vmatpush.bf16.msrb.mxu0 %v5702_v31  ;;  %vm11291_vm14 = vnez %v10902_v45 }
 0x414   : > { %v9414_v39 = vpop.f32.mrf.mxu0  ;;  %v9424_v23 = vadd.f32 %v4295_v28, %v4217_v21  ;;  %vm9433_vm10 = vmand %vm2538_vm4, %vm2566_vm2  ;;  %v11273_v21 = vmov 0  ;;  %v11279_v28 = vld [vmem:[#allocation135_spill] sm:$0xff] }
 0x415   : > { %11260 = vst [vmem:[#allocation64_spill] sm:$0xff] %v9414_v39  ;;  %v4061_v26 = vpop.f32.mrf.mxu3  ;;  %v11272_v11 = vsel %vm9433_vm10, 4294967295, %v11271_v11  ;;  %vm9437_vm12 = vmand %vm2539_vm9, %vm2567_vm1  ;;  %vm11280_vm4 = vcmp.ge.s32.totalorder %v11279_v28, 0  ;;  %v11286_v28 = vld [vmem:[#allocation148_spill] sm:$0xff] }
 0x416   : > { %v4062_v51 = vadd.f32 %v4061_v26, %v11267_v53  ;;  %v11274_v21 = vsel %vm9437_vm12, 4294967295, %v11273_v21  ;;  %vm9445_vm7 = vmand %vm11264_vm8, %vm11276_vm15  ;;  %vm11285_vm8 = vcmp.lt.s32.totalorder %v11275_v44, 14  ;;  %v11306_v26 = vld [vmem:[#allocation49_spill] sm:$0xff] }
 0x417   : > { %vm9456_vm2 = vmand %vm9433_vm10, %vm11280_vm4 }
 0x418   : > { %v9431_v20 = vadd.f32 %v4140_v55, %v4062_v51  ;;  %v5689_v55 = vld [vmem:[%s10052_s7 + $0x200] sm:$0xff]  ;;  %v11283_v51 = vld [vmem:[#allocation136_spill] sm:$0xff]  ;;  %vm2791_vm1 = vmand %vm9437_vm12, %vm11285_vm8 }
 0x419   : > { %vm11284_vm9 = vcmp.lt.s32.totalorder %v11283_v51, 14  ;;  %4365 = vmatpush.bf16.msrb.mxu3 %v5689_v55  ;;  %vm5402_vm4 = vmpackc.low %vm9445_vm7, %vm11269_vm0  ;;  %v2513_v55 = vadd.s32 1, %v11288_v17  ;;  %vm11290_vm7 = vcmp.lt.s32.totalorder %v11289_v19, 14 }
 0x41a   : > { %11270 = vst [vmem:[#allocation65_spill] sm:$0xff] %v9431_v20  ;;  %vm2651_vm15 = vmand %vm9437_vm12, %vm11284_vm9 }
 0x41b   : > { %vm5486_vm9 = vmpackc.low %vm2651_vm15, %vm9456_vm2  ;;  %vm2541_vm15 = vcmp.ge.s32.totalorder %v2513_v55, 0 }
 0x41c   : > { %v4145_v53 = vpop.f32.mrf.mxu0  ;;  %vm5528_vm8 = vmpackc.low %vm2791_vm1, %vm9433_vm10  ;;  %vm2569_vm1 = vcmp.lt.s32.totalorder %v2513_v55, 14  ;;  %v2515_v55 = vadd.s32 1, %v8332_v6 }
 0x41d   : > { %v4063_v20 = vpop.f32.mrf.mxu3  ;;  %vm9499_vm0 = vmand %vm11291_vm14, %vm11290_vm7 }
 0x41e   : > { %v9472_v39 = vadd.f32 %v4063_v20, %v11286_v28  ;;  %v11287_v20 = vld [vmem:[#allocation140_spill] sm:$0xff]  ;;  %vm9514_vm7 = vmand %vm2541_vm15, %vm2569_vm1 }
 0x41f   : > { %5446 = vmatmul.msk.bf16.gmra.mxu0 %vm5444_vm11, %v10923_v4  ;;  %v2512_v44 = vadd.s32 1, %v11287_v20 }
 0x421   : > { %vm2540_vm11 = vcmp.ge.s32.totalorder %v2512_v44, 0  ;;  %vm2568_vm2 = vcmp.lt.s32.totalorder %v2512_v44, 14  ;;  %v11300_v44 = vld [vmem:[#allocation143_spill] sm:$0xff] }
 0x422   : > { %5404 = vmatmul.msk.bf16.gmra.mxu3 %vm5402_vm4, %v8442_v25  ;;  %5488 = vmatmul.msk.bf16.gmra.mxu2 %vm5486_vm9, %v10926_v29  ;;  %v11294_v29 = vld [vmem:[#allocation44_spill] sm:$0xff]  ;;  %vm11301_vm10 = vcmp.lt.s32.totalorder %v11300_v44, 14  ;;  %v11315_v44 = vld [vmem:[#allocation45_spill] sm:$0xff] }
 0x423   : > { %5530 = vmatmul.msk.bf16.gmra.mxu1 %vm5528_vm8, %v10943_v38  ;;  %vm11295_vm4 = vnez %v11294_v29  ;;  %vm9510_vm8 = vmand %vm2540_vm11, %vm2568_vm2  ;;  %vm11304_vm11 = vcmp.lt.s32.totalorder %v8234_v10, 14  ;;  %v2514_v10 = vadd.s32 1, %v8352_v58 }
 0x424   : > { %v9493_v43 = vpop.f32.mrf.mxu0  ;;  %vm5447_vm9 = vmpackc.low %vm9499_vm0, %vm11295_vm4 }
 0x425   : > { %v4066_v51 = vpop.f32.mrf.mxu3  ;;  %vm2261_vm12 = vmand %vm11291_vm14, %vm11301_vm10 }
 0x426   : > { %v4067_v25 = vadd.f32 %v4066_v51, %v8438_v59  ;;  %v11302_v59 = vld [vmem:[#allocation146_spill] sm:$0xff]  ;;  %vm2653_vm2 = vmand %vm9514_vm7, %vm11304_vm11  ;;  %vm2543_vm11 = vcmp.ge.s32.totalorder %v2515_v55, 0 }
 0x427   : > { %vm11303_vm5 = vcmp.ge.s32.totalorder %v11302_v59, 0  ;;  %vm11305_vm15 = vmmov %vm11301_vm10  ;;  %v11317_v59 = vld [vmem:[#allocation149_spill] sm:$0xff]  ;;  %v11323_v51 = vld [vmem:[#allocation50_spill] sm:$0xff] }
 0x428   : > { %v9508_v31 = vadd.f32 %v4145_v53, %v4067_v25  ;;  %vm2624_vm0 = vmand %vm9510_vm8, %vm11303_vm5 }
 0x429   : > { %vm2793_vm1 = vmand %vm9514_vm7, %vm11305_vm15 }
 0x42a   : > { %vm5405_vm10 = vmpackc.low %vm2261_vm12, %vm11295_vm4  ;;  %vm11307_vm12 = vcmp.lt.s32.totalorder %v8519_v49, 14 }
 0x42b   : > { %vm5489_vm5 = vmpackc.low %vm2653_vm2, %vm2624_vm0  ;;  %vm2570_vm0 = vcmp.lt.s32.totalorder %v2514_v10, 14  ;;  %vm2571_vm2 = vcmp.lt.s32.totalorder %v2515_v55, 14  ;;  %v11322_v55 = vld [vmem:[#allocation51_spill] sm:$0xff] }
 0x42c   : > { %v4150_v53 = vpop.f32.mrf.mxu0  ;;  %vm5531_vm14 = vmpackc.low %vm2793_vm1, %vm9510_vm8 }
 0x42d   : > { %v4068_v17 = vpop.f32.mrf.mxu3  ;;  %vm9553_vm4 = vmand %vm8554_vm3, %vm11307_vm12  ;;  %vm11318_vm12 = vcmp.ge.s32.totalorder %v11317_v59, 0 }
 0x42e   : > { %v9535_v45 = vadd.f32 %v4068_v17, %v8521_v50  ;;  %vm5450_vm15 = vmpackc.low %vm9553_vm4, %vm8550_vm13  ;;  %v11319_v17 = vld [vmem:[#allocation150_spill] sm:$0xff] }
 0x42f   : > { %5449 = vmatmul.msk.bf16.gmra.mxu0 %vm5447_vm9, %v10945_v36  ;;  %vm2542_vm9 = vcmp.ge.s32.totalorder %v2514_v10, 0 }
 0x430   : > { %vm9564_vm1 = vmand %vm2542_vm9, %vm2570_vm0  ;;  %vm11320_vm9 = vcmp.lt.s32.totalorder %v11319_v17, 14 }
 0x431   : > { %vm2626_vm4 = vmand %vm9564_vm1, %vm11318_vm12 }
 0x432   : > { %5407 = vmatmul.msk.bf16.gmra.mxu3 %vm5405_vm10, %v10943_v38  ;;  %5491 = vmatmul.msk.bf16.gmra.mxu2 %vm5489_vm5, %v6685_v30  ;;  %vm9568_vm10 = vmand %vm2543_vm11, %vm2571_vm2  ;;  %vm11316_vm5 = vcmp.lt.s32.totalorder %v11315_v44, 14 }
 0x433   : > { %5533 = vmatmul.msk.bf16.gmra.mxu1 %vm5531_vm14, %v11306_v26  ;;  %vm2263_vm14 = vmand %vm8554_vm3, %vm11316_vm5 }
 0x434   : > { %v9547_v50 = vpop.f32.mrf.mxu0  ;;  %vm2655_vm0 = vmand %vm9568_vm10, %vm11320_vm9  ;;  %vm11327_vm9 = vnez %v10970_v42 }
 0x435   : > { %v4071_v25 = vpop.f32.mrf.mxu3  ;;  %vm11321_vm11 = vmmov %vm11316_vm5 }
 0x436   : > { %v4072_v58 = vadd.f32 %v4071_v25, %v8574_v3  ;;  %v5701_v3 = vld [vmem:[%s10054_s9 + $0x20] sm:$0xff]  ;;  %vm2795_vm3 = vmand %vm9568_vm10, %vm11321_vm11  ;;  %vm11328_vm11 = vnez %v10968_v2 }
 0x437   : > { %4550 = vmatpush.bf16.msrb.mxu0 %v5701_v3  ;;  %vm5408_vm2 = vmpackc.low %vm2263_vm14, %vm8550_vm13  ;;  %vm11324_vm13 = vcmp.lt.s32.totalorder %v10946_v24, 14  ;;  %vm11325_vm14 = vnez %v10870_v27 }
 0x438   : > { %v9562_v6 = vadd.f32 %v4150_v53, %v4072_v58  ;;  %vm5492_vm5 = vmpackc.low %vm2655_vm0, %vm2626_vm4 }
 0x439   : > { %vm5534_vm12 = vmpackc.low %vm2795_vm3, %vm9564_vm1 }
 0x43c   : > { %v4155_v53 = vpop.f32.mrf.mxu0 }
 0x43d   : > { %v4073_v10 = vpop.f32.mrf.mxu3 }
 0x43e   : > { %v9592_v56 = vadd.f32 %v4073_v10, %v8600_v32 }
 0x43f   : > { %5452 = vmatmul.msk.bf16.gmra.mxu0 %vm5450_vm15, %v11322_v55  ;;  %vm2909_vm15 = vmand %vm10957_vm6, %vm11324_vm13  ;;  %vm11326_vm6 = vcmp.lt.s32.totalorder %v6722_v33, 14  ;;  %vm11332_vm13 = vnez %v10995_v9 }
 0x440   : > { %vm5537_vm4 = vmpackc.low %vm2909_vm15, %vm11325_vm14 }
 0x441   : > { %vm2911_vm0 = vmand %vm11327_vm9, %vm11326_vm6 }
 0x442   : > { %5410 = vmatmul.msk.bf16.gmra.mxu3 %vm5408_vm2, %v11306_v26  ;;  %5494 = vmatmul.msk.bf16.gmra.mxu2 %vm5492_vm5, %v11323_v51  ;;  %vm5540_vm3 = vmpackc.low %vm2911_vm0, %vm11328_vm11  ;;  %v11329_v51 = vld [vmem:[#allocation58_spill] sm:$0xff]  ;;  %vm11331_vm5 = vnez %v10997_v22 }
 0x443   : > { %5536 = vmatmul.msk.bf16.gmra.mxu1 %vm5534_vm12, %v6177_v37  ;;  %vm11330_vm2 = vcmp.lt.s32.totalorder %v11329_v51, 14  ;;  %v11343_v51 = vld [vmem:[#allocation46_spill] sm:$0xff] }
 0x444   : > { %v9602_v25 = vpop.f32.mrf.mxu0  ;;  %vm2913_vm12 = vmand %vm11331_vm5, %vm11330_vm2 }
 0x445   : > { %v4076_v58 = vpop.f32.mrf.mxu3  ;;  %vm5543_vm15 = vmpackc.low %vm2913_vm12, %vm11332_vm13 }
 0x446   : > { %v4077_v32 = vadd.f32 %v4076_v58, %v8617_v35  ;;  %v5700_v35 = vld [vmem:[%s10054_s9 + $0x18] sm:$0xff] }
 0x447   : > { %4551 = vmatpush.bf16.msrb.mxu0 %v5700_v35  ;;  %v11338_v35 = vld [vmem:[#allocation43_spill] sm:$0xff] }
 0x448   : > { %v9605_v44 = vadd.f32 %v4155_v53, %v4077_v32  ;;  %vm11339_vm9 = vnez %v11338_v35 }
 0x44c   : > { %v4160_v30 = vpop.f32.mrf.mxu0 }
 0x44d   : > { %v4078_v3 = vpop.f32.mrf.mxu3 }
 0x44e   : > { %v9612_v26 = vadd.f32 %v4078_v3, %v8658_v16 }
 0x452   : > { %5539 = vmatmul.msk.bf16.vlgmr.msrb.gmra.mxu3 %vm5537_vm4, %v10982_v5 }
 0x454   : > { %v9617_v37 = vpop.f32.mrf.mxu0 }
 0x455   : > { %v4081_v59 = vpop.f32.mrf.mxu3 }
 0x456   : > { %v4082_v24 = vadd.f32 %v4081_v59, %v8697_v60 }
 0x458   : > { %v9623_v0 = vadd.f32 %v4160_v30, %v4082_v24  ;;  %v11335_v30 = vld [vmem:[#allocation41_spill] sm:$0xff] }
 0x459   : > { %vm11336_vm4 = vnez %v11335_v30  ;;  %v11350_v30 = vld [vmem:[#allocation48_spill] sm:$0xff] }
 0x45c   : > { %v4165_v53 = vpop.f32.mrf.mxu0 }
 0x45d   : > { %v4083_v27 = vpop.f32.mrf.mxu3 }
 0x45e   : > { %v9630_v16 = vadd.f32 %v4083_v27, %v8733_v52 }
 0x462   : > { %5542 = vmatmul.msk.bf16.gmra.mxu3 %vm5540_vm3, %v6259_v48  ;;  %v5699_v48 = vld [vmem:[%s10054_s9 + $0x10] sm:$0xff]  ;;  %vm11342_vm3 = vnez %v11055_v7 }
 0x463   : > { %4552 = vmatpush.bf16.msrb.mxu0 %v5699_v48 }
 0x464   : > { %v9635_v5 = vpop.f32.mrf.mxu0 }
 0x465   : > { %v4086_v60 = vpop.f32.mrf.mxu3 }
 0x466   : > { %v4087_v17 = vadd.f32 %v4086_v60, %v8775_v14  ;;  %v11340_v60 = vld [vmem:[#allocation73_spill] sm:$0xff] }
 0x467   : > { %vm11341_vm11 = vcmp.lt.s32.totalorder %v11340_v60, 14  ;;  %v11355_v60 = vld [vmem:[#allocation34_spill] sm:$0xff] }
 0x468   : > { %v9638_v10 = vadd.f32 %v4165_v53, %v4087_v17  ;;  %vm2917_vm2 = vmand %vm11342_vm3, %vm11341_vm11  ;;  %v5698_v17 = vld [vmem:[%s10054_s9 + $0x8] sm:$0xff] }
 0x469   : > { %4553 = vmatpush.bf16.msrb.mxu0 %v5698_v17 }
 0x46c   : > { %v4170_v33 = vpop.f32.mrf.mxu0 }
 0x46d   : > { %v4088_v42 = vpop.f32.mrf.mxu3 }
 0x46e   : > { %v9645_v52 = vadd.f32 %v4088_v42, %v8811_v61  ;;  %v11333_v61 = vld [vmem:[#allocation66_spill] sm:$0xff] }
 0x46f   : > { %vm11334_vm14 = vcmp.lt.s32.totalorder %v11333_v61, 14  ;;  %v11344_v42 = vld [vmem:[#allocation42_spill] sm:$0xff]  ;;  %v11348_v61 = vld [vmem:[#allocation81_spill] sm:$0xff] }
 0x470   : > { %vm2915_vm6 = vmand %vm11336_vm4, %vm11334_vm14  ;;  %vm11345_vm5 = vnez %v11344_v42  ;;  %vm11349_vm13 = vcmp.lt.s32.totalorder %v11348_v61, 14  ;;  %v11363_v61 = vld [vmem:[#allocation61_spill] sm:$0xff] }
 0x471   : > { %vm5546_vm0 = vmpackc.low %vm2915_vm6, %vm11339_vm9 }
 0x472   : > { %5545 = vmatmul.msk.bf16.gmra.mxu3 %vm5543_vm15, %v11038_v15  ;;  %v11337_v15 = vld [vmem:[#allocation47_spill] sm:$0xff]  ;;  %vm5549_vm12 = vmpackc.low %vm2917_vm2, %vm11345_vm5  ;;  %vm11351_vm15 = vnez %v11350_v30 }
 0x473   : > { %vm2919_vm14 = vmand %vm11351_vm15, %vm11349_vm13 }
 0x474   : > { %v9653_v2 = vpop.f32.mrf.mxu0 }
 0x475   : > { %v4091_v14 = vpop.f32.mrf.mxu3 }
 0x476   : > { %v4092_v22 = vadd.f32 %v4091_v14, %v8850_v12 }
 0x478   : > { %v9656_v58 = vadd.f32 %v4170_v33, %v4092_v22  ;;  %v11347_v22 = vld [vmem:[#allocation52_spill] sm:$0xff] }
 0x47c   : > { %v4175_v32 = vpop.f32.mrf.mxu0 }
 0x47d   : > { %v4093_v9 = vpop.f32.mrf.mxu3 }
 0x47e   : > { %v9663_v3 = vadd.f32 %v4093_v9, %v11337_v15  ;;  %v11352_v15 = vld [vmem:[#allocation25_spill] sm:$0xff] }
 0x482   : > { %5548 = vmatmul.msk.bf16.gmra.mxu3 %vm5546_vm0, %v6307_v40 }
 0x484   : > { %v9668_v59 = vpop.f32.mrf.mxu0 }
 0x485   : > { %v4096_v12 = vpop.f32.mrf.mxu3 }
 0x486   : > { %v4097_v24 = vadd.f32 %v4096_v12, %v8928_v1  ;;  %v11346_v1 = vld [vmem:[#allocation33_spill] sm:$0xff] }
 0x488   : > { %v9671_v53 = vadd.f32 %v4175_v32, %v4097_v24  ;;  %v11353_v24 = vld [vmem:[#allocation40_spill] sm:$0xff] }
 0x489   : > { %vm11354_vm4 = vnez %v11353_v24 }
 0x48a   : > { %vm5552_vm6 = vmpackc.low %vm2919_vm14, %vm11354_vm4 }
 0x48c   : > { %v4180_v27 = vpop.f32.mrf.mxu0 }
 0x48d   : > { %v4098_v33 = vpop.f32.mrf.mxu3 }
 0x48e   : > { %v9681_v40 = vadd.f32 %v4098_v33, %v11343_v51  ;;  %v11356_v33 = vld [vmem:[#allocation62_spill] sm:$0xff] }
 0x492   : > { %5551 = vmatmul.msk.bf16.gmra.mxu3 %vm5549_vm12, %v11346_v1  ;;  %v5697_v1 = vld [vmem:[%s10054_s9] sm:$0xff]  ;;  %vm11369_vm12 = vnez %v11152_v47 }
 0x493   : > { %4554 = vmatpush.bf16.msrb.mxu0 %v5697_v1  ;;  %v11371_v1 = vld [vmem:[#allocation56_spill] sm:$0xff] }
 0x494   : > { %v9686_v48 = vpop.f32.mrf.mxu0 }
 0x495   : > { %v4101_v14 = vpop.f32.mrf.mxu3 }
 0x496   : > { %v4102_v7 = vadd.f32 %v4101_v14, %v11347_v22  ;;  %v11359_v14 = vld [vmem:[#allocation89_spill] sm:$0xff] }
 0x497   : > { %vm11360_vm9 = vcmp.lt.s32.totalorder %v11359_v14, 14  ;;  %v11361_v22 = vld [vmem:[#allocation53_spill] sm:$0xff] }
 0x498   : > { %v9689_v32 = vadd.f32 %v4180_v27, %v4102_v7  ;;  %vm11362_vm0 = vnez %v11361_v22  ;;  %v11373_v22 = vld [vmem:[#allocation55_spill] sm:$0xff] }
 0x499   : > { %vm2921_vm11 = vmand %vm11362_vm0, %vm11360_vm9  ;;  %vm11374_vm15 = vnez %v11373_v22 }
 0x49c   : > { %v4185_v12 = vpop.f32.mrf.mxu0 }
 0x49d   : > { %v4103_v9 = vpop.f32.mrf.mxu3 }
 0x49e   : > { %v9696_v35 = vadd.f32 %v4103_v9, %v11352_v15  ;;  %v11364_v9 = vld [vmem:[#allocation54_spill] sm:$0xff] }
 0x49f   : > { %vm11365_vm3 = vnez %v11364_v9  ;;  %v11376_v9 = vld [vmem:[#allocation59_spill] sm:$0xff] }
 0x4a0   : > { %vm5555_vm2 = vmpackc.low %vm2921_vm11, %vm11365_vm3 }
 0x4a2   : > { %5554 = vmatmul.msk.bf16.gmra.mxu3 %vm5552_vm6, %v11355_v60 }
 0x4a4   : > { %v9704_v42 = vpop.f32.mrf.mxu0 }
 0x4a5   : > { %v4106_v17 = vpop.f32.mrf.mxu3  ;;  %11358 = vst [vmem:[#allocation68_spill] sm:$0xff] %v9704_v42 }
 0x4a6   : > { %v4107_v51 = vadd.f32 %v4106_v17, %v11356_v33  ;;  %v11367_v17 = vld [vmem:[#allocation98_spill] sm:$0xff] }
 0x4a7   : > { %vm11368_vm5 = vcmp.lt.s32.totalorder %v11367_v17, 14  ;;  %v11378_v17 = vld [vmem:[#allocation108_spill] sm:$0xff] }
 0x4a8   : > { %v9702_v27 = vadd.f32 %v4185_v12, %v4107_v51  ;;  %vm2923_vm13 = vmand %vm11369_vm12, %vm11368_vm5  ;;  %vm11379_vm4 = vcmp.lt.s32.totalorder %v11378_v17, 14 }
 0x4a9   : > { %vm5558_vm14 = vmpackc.low %vm2923_vm13, %vm11374_vm15 }
 0x4aa   : > { %11357 = vst [vmem:[#allocation30_spill] sm:$0xff] %v9702_v27 }
 0x4ac   : > { %v4190_v15 = vpop.f32.mrf.mxu0 }
 0x4ad   : > { %v4108_v7 = vpop.f32.mrf.mxu3 }
 0x4ae   : > { %v9714_v30 = vadd.f32 %v4108_v7, %v11363_v61  ;;  %v11375_v7 = vld [vmem:[#allocation36_spill] sm:$0xff] }
 0x4b2   : > { %5557 = vmatmul.msk.bf16.gmra.mxu3 %vm5555_vm2, %v11165_v63  ;;  %v4219_v63 = vpop.f32.mrf.mxu2  ;;  %vm11388_vm2 = vnez %v11213_v46  ;;  %v11391_v46 = vld [vmem:[#allocation126_spill] sm:$0xff] }
 0x4b3   : > { %vm11392_vm15 = vcmp.lt.s32.totalorder %v11391_v46, 14 }
 0x4b4   : > { %v9726_v33 = vpop.f32.mrf.mxu0 }
 0x4b5   : > { %v4111_v12 = vpop.f32.mrf.mxu3  ;;  %11370 = vst [vmem:[#allocation77_spill] sm:$0xff] %v9726_v33 }
 0x4b6   : > { %v4112_v24 = vadd.f32 %v4111_v12, %v9161_v34  ;;  %v4298_v34 = vpop.f32.mrf.mxu1 }
 0x4b8   : > { %v9720_v60 = vadd.f32 %v4190_v15, %v4112_v24 }
 0x4ba   : > { %11366 = vst [vmem:[#allocation67_spill] sm:$0xff] %v9720_v60  ;;  %v4221_v47 = vpop.f32.mrf.mxu2  ;;  %v11380_v60 = vld [vmem:[#allocation60_spill] sm:$0xff] }
 0x4bb   : > { %vm11381_vm6 = vnez %v11380_v60 }
 0x4bc   : > { %v4195_v12 = vpop.f32.mrf.mxu0  ;;  %vm2925_vm9 = vmand %vm11381_vm6, %vm11379_vm4  ;;  %vm11394_vm6 = vnez %v11242_v18  ;;  %v11397_v18 = vld [vmem:[#allocation137_spill] sm:$0xff] }
 0x4bd   : > { %v4113_v51 = vpop.f32.mrf.mxu3 }
 0x4be   : > { %v9729_v14 = vadd.f32 %v4113_v51, %v11371_v1  ;;  %v11382_v1 = vld [vmem:[#allocation69_spill] sm:$0xff]  ;;  %v4300_v33 = vpop.f32.mrf.mxu1 }
 0x4c0   : > { %11372 = vst [vmem:[#allocation75_spill] sm:$0xff] %v9729_v14  ;;  %v11384_v14 = vld [vmem:[#allocation57_spill] sm:$0xff] }
 0x4c1   : > { %vm11385_vm0 = vnez %v11384_v14 }
 0x4c2   : > { %5560 = vmatmul.msk.bf16.gmra.mxu3 %vm5558_vm14, %v11375_v7  ;;  %vm5561_vm11 = vmpackc.low %vm2925_vm9, %vm11385_vm0  ;;  %v4224_v7 = vpop.f32.mrf.mxu2  ;;  %vm11393_vm14 = vnez %v11244_v8  ;;  %v11396_v8 = vld [vmem:[#allocation65_spill] sm:$0xff]  ;;  %vm11398_vm0 = vcmp.lt.s32.totalorder %v11397_v18, 14 }
 0x4c3   : > { %vm2929_vm4 = vmand %vm11393_vm14, %vm11392_vm15 }
 0x4c4   : > { %vm5567_vm9 = vmpackc.low %vm2929_vm4, %vm11394_vm6 }
 0x4c5   : > { %v4116_v61 = vpop.f32.mrf.mxu3 }
 0x4c6   : > { %v4117_v15 = vadd.f32 %v4116_v61, %v11376_v9  ;;  %v4303_v9 = vpop.f32.mrf.mxu1 }
 0x4c8   : > { %v9735_v24 = vadd.f32 %v4195_v12, %v4117_v15  ;;  %v11386_v12 = vld [vmem:[#allocation117_spill] sm:$0xff] }
 0x4c9   : > { %vm11387_vm3 = vcmp.lt.s32.totalorder %v11386_v12, 14 }
 0x4ca   : > { %11377 = vst [vmem:[#allocation70_spill] sm:$0xff] %v9735_v24  ;;  %vm2927_vm5 = vmand %vm11388_vm2, %vm11387_vm3  ;;  %vm11400_vm2 = vnez %v11272_v11 }
 0x4cd   : > { %v4118_v51 = vpop.f32.mrf.mxu3 }
 0x4ce   : > { %v9742_v22 = vadd.f32 %v4118_v51, %v11382_v1  ;;  %v4226_v51 = vpop.f32.mrf.mxu2  ;;  %v11389_v1 = vld [vmem:[#allocation63_spill] sm:$0xff] }
 0x4cf   : > { %vm11390_vm12 = vnez %v11389_v1 }
 0x4d0   : > { %11383 = vst [vmem:[#allocation71_spill] sm:$0xff] %v9742_v22  ;;  %vm5564_vm13 = vmpackc.low %vm2927_vm5, %vm11390_vm12  ;;  %v4305_v22 = vpop.f32.mrf.mxu1  ;;  %vm11401_vm12 = vcmp.lt.s32.totalorder %v11289_v19, 14 }
 0x4d2   : > { %5563 = vmatmul.msk.bf16.gmra.mxu3 %vm5561_vm11, %v11228_v41  ;;  %vm11399_vm11 = vnez %v11274_v21  ;;  %v4225_v21 = vadd.f32 %v4224_v7, %v9508_v31  ;;  %v4153_v7 = vadd.f32 %v9547_v50, %v9592_v56 }
 0x4d3   : > { %vm2931_vm3 = vmand %vm11399_vm11, %vm11398_vm0 }
 0x4d4   : > { %vm5570_vm5 = vmpackc.low %vm2931_vm3, %vm11400_vm2 }
 0x4d5   : > { %v4367_v61 = vpop.f32.mrf.mxu3 }
 0x4d6   : > { %v4368_v15 = vadd.f32 %v4367_v61, %v9314_v13  ;;  %v4229_v61 = vpop.f32.mrf.mxu2 }
 0x4d7   : > { %v4230_v20 = vadd.f32 %v4229_v61, %v9562_v6  ;;  %v11403_v6 = vld [vmem:[#allocation22_spill] sm:$0xff]  ;;  %v4158_v61 = vadd.f32 %v9602_v25, %v9612_v26  ;;  %v4163_v25 = vadd.f32 %v9617_v37, %v9630_v16 }
 0x4d8   : > { %v4437_v14 = vmax.f32 %v4368_v15, 0.0 }
 0x4dd   : > { %v4369_v60 = vpop.f32.mrf.mxu3 }
 0x4de   : > { %v4370_v17 = vadd.f32 %v4369_v60, %v9353_v62  ;;  %v4308_v62 = vpop.f32.mrf.mxu1 }
 0x4e0   : > { %v4438_v24 = vmax.f32 %v4370_v17, 0.0  ;;  %v4231_v17 = vpop.f32.mrf.mxu2 }
 0x4e2   : > { %v4465_v41 = vpack.c.bf16 %v4438_v24, %v4437_v14  ;;  %5566 = vmatmul.msk.bf16.gmra.mxu3 %vm5564_vm13, %v11256_v57  ;;  %vm2933_vm13 = vmand %vm9514_vm7, %vm11401_vm12 }
 0x4e3   : > { %vm5573_vm15 = vmpackc.low %vm2933_vm13, %vm9510_vm8  ;;  %vm11402_vm8 = vcmp.lt.s32.totalorder %v8519_v49, 14 }
 0x4e4   : > { %4555 = vmatmul.bf16.vlgmr.msrb.gmra.mxu0 %v4465_v41  ;;  %vm2935_vm7 = vmand %vm9568_vm10, %vm11402_vm8 }
 0x4e5   : > { %v4372_v13 = vpop.f32.mrf.mxu3  ;;  %vm5576_vm14 = vmpackc.low %vm2935_vm7, %vm9564_vm1  ;;  %vm11405_vm1 = vcmask 261120  }
 0x4e6   : > { %v4373_v12 = vadd.f32 %v4372_v13, %v9388_v54  ;;  %v11395_v54 = vld [vmem:[#allocation64_spill] sm:$0xff]  ;;  %v4220_v13 = vadd.f32 %v4219_v63, %v11396_v8  ;;  %v4310_v46 = vpop.f32.mrf.mxu1  ;;  %vm11407_vm10 = vmmov %vm11405_vm1 }
 0x4e7   : > { %v4143_v14 = vadd.f32 %v11395_v54, %v9472_v39  ;;  %vm11409_vm4 = vmmov %vm11405_vm1 }
 0x4e8   : > { %v4439_v24 = vmax.f32 %v4373_v12, 0.0  ;;  %v4299_v42 = vadd.f32 %v4298_v34, %v4220_v13  ;;  %vm11412_vm6 = vmmov %vm11405_vm1 }
 0x4e9   : > { %v4222_v27 = vadd.f32 %v4221_v47, %v4143_v14  ;;  %v4304_v47 = vadd.f32 %v4303_v9, %v4225_v21  ;;  %v4232_v9 = vadd.f32 %v4231_v17, %v4153_v7  ;;  %v4168_v7 = vadd.f32 %v9635_v5, %v9645_v52  ;;  %vm11419_vm0 = vmmov %vm11405_vm1 }
 0x4ea   : > { %vm11422_vm11 = vmmov %vm11419_vm0 }
 0x4eb   : > { %v4311_v28 = vadd.f32 %v4310_v46, %v4232_v9  ;;  %vm11425_vm3 = vmmov %vm11419_vm0 }
 0x4ec   : > { %vm11428_vm2 = vmmov %vm11419_vm0 }
 0x4ed   : > { %v4374_v60 = vpop.f32.mrf.mxu3  ;;  %vm11432_vm12 = vmmov %vm11419_vm0 }
 0x4ee   : > { %v4375_v1 = vadd.f32 %v4374_v60, %v9424_v23  ;;  %v4301_v60 = vadd.f32 %v4300_v33, %v4222_v27  ;;  %v4148_v27 = vadd.f32 %v9493_v43, %v9535_v45  ;;  %vm11434_vm13 = vmmov %vm11419_vm0 }
 0x4ef   : > { %vm11438_vm8 = vmmov %vm11419_vm0 }
 0x4f0   : > { %v4440_v57 = vmax.f32 %v4375_v1, 0.0  ;;  %v4227_v34 = vadd.f32 %v4226_v51, %v4148_v27  ;;  %v4309_v51 = vadd.f32 %v4308_v62, %v4230_v20  ;;  %vm11440_vm7 = vmmov %vm11419_vm0 }
 0x4f2   : > { %5569 = vmatmul.msk.bf16.gmra.mxu3 %vm5567_vm9, %v10923_v4  ;;  %v4466_v15 = vpack.c.bf16 %v4440_v57, %v4439_v24  ;;  %v4234_v4 = vpop.f32.mrf.mxu2  ;;  %v4313_v57 = vpop.f32.mrf.mxu1  ;;  %v4306_v11 = vadd.f32 %v4305_v22, %v4227_v34  ;;  %vm11415_vm9 = vmmov %vm11405_vm1 }
 0x4f3   : > { %v4235_v29 = vadd.f32 %v4234_v4, %v9605_v44 }
 0x4f4   : > { %4560 = vmatmul.bf16.gmra.mxu0 %v4466_v15 }
 0x4f5   : > { %v4377_v41 = vpop.f32.mrf.mxu3 }
 0x4f6   : > { %v4378_v23 = vadd.f32 %v4377_v41, %v4299_v42 }
 0x4f8   : > { %v4441_v39 = vmax.f32 %v4378_v23, 0.0 }
 0x4fa   : > { %v4236_v33 = vpop.f32.mrf.mxu2  ;;  %v4315_v15 = vpop.f32.mrf.mxu1 }
 0x4fb   : > { %v4237_v17 = vadd.f32 %v4236_v33, %v4158_v61 }
 0x4fd   : > { %v4379_v12 = vpop.f32.mrf.mxu3 }
 0x4fe   : > { %v4380_v1 = vadd.f32 %v4379_v12, %v4301_v60  ;;  %v4314_v12 = vadd.f32 %v4313_v57, %v4235_v29 }
 0x500   : > { %v4442_v24 = vmax.f32 %v4380_v1, 0.0 }
 0x502   : > { %v4467_v63 = vpack.c.bf16 %v4442_v24, %v4441_v39  ;;  %5572 = vmatmul.msk.bf16.gmra.mxu3 %vm5570_vm5, %v10945_v36  ;;  %v4239_v41 = vpop.f32.mrf.mxu2  ;;  %v4318_v22 = vpop.f32.mrf.mxu1  ;;  %v4316_v39 = vadd.f32 %v4315_v15, %v4237_v17  ;;  %v9812_v17 = vld [vmem:[%s10055_s10] ss:$0 sm:$0xff]  ;;  %vm11430_vm5 = vmmov %vm11419_vm0 }
 0x504   : > { %4565 = vmatmul.bf16.gmra.mxu0 %v4467_v63 }
 0x505   : > { %v4382_v42 = vpop.f32.mrf.mxu3 }
 0x506   : > { %v4383_v54 = vadd.f32 %v4382_v42, %v4304_v47  ;;  %v4240_v47 = vadd.f32 %v4239_v41, %v9623_v0 }
 0x508   : > { %v4443_v43 = vmax.f32 %v4383_v54, 0.0  ;;  %v4319_v33 = vadd.f32 %v4318_v22, %v4240_v47 }
 0x50a   : > { %v4241_v8 = vpop.f32.mrf.mxu2  ;;  %v4320_v60 = vpop.f32.mrf.mxu1 }
 0x50b   : > { %v4242_v44 = vadd.f32 %v4241_v8, %v4163_v25 }
 0x50d   : > { %v4384_v14 = vpop.f32.mrf.mxu3  ;;  %v4321_v54 = vadd.f32 %v4320_v60, %v4242_v44  ;;  %v4173_v60 = vadd.f32 %v9653_v2, %v9663_v3 }
 0x50e   : > { %v4385_v36 = vadd.f32 %v4384_v14, %v4306_v11 }
 0x510   : > { %v4444_v45 = vmax.f32 %v4385_v36, 0.0 }
 0x512   : > { %v4468_v31 = vpack.c.bf16 %v4444_v45, %v4443_v43  ;;  %5575 = vmatmul.msk.bf16.gmra.mxu3 %vm5573_vm15, %v11322_v55  ;;  %v4244_v62 = vpop.f32.mrf.mxu2  ;;  %v4323_v46 = vpop.f32.mrf.mxu1  ;;  %vm11436_vm15 = vmmov %vm11419_vm0 }
 0x513   : > { %v4245_v16 = vadd.f32 %v4244_v62, %v9638_v10 }
 0x514   : > { %4570 = vmatmul.bf16.gmra.mxu0 %v4468_v31 }
 0x515   : > { %v4387_v19 = vpop.f32.mrf.mxu3 }
 0x516   : > { %v4388_v13 = vadd.f32 %v4387_v19, %v4309_v51  ;;  %v4324_v19 = vadd.f32 %v4323_v46, %v4245_v16 }
 0x518   : > { %v4445_v50 = vmax.f32 %v4388_v13, 0.0 }
 0x51a   : > { %v4246_v63 = vpop.f32.mrf.mxu2  ;;  %v4325_v34 = vpop.f32.mrf.mxu1 }
 0x51b   : > { %v4247_v41 = vadd.f32 %v4246_v63, %v4168_v7  ;;  %v9821_v63 = vld [vmem:[%s10056_s11] ss:$0 sm:$0xff] }
 0x51d   : > { %v4389_v23 = vpop.f32.mrf.mxu3  ;;  %v4326_v20 = vadd.f32 %v4325_v34, %v4247_v41  ;;  %v5727_v34 = vld [vmem:[%s5855_s18] sm:$0xff] }
 0x51e   : > { %v4390_v55 = vadd.f32 %v4389_v23, %v4311_v28 }
 0x520   : > { %v4446_v56 = vmax.f32 %v4390_v55, 0.0 }
 0x522   : > { %v4469_v18 = vpack.c.bf16 %v4446_v56, %v4445_v50  ;;  %5578 = vmatmul.msk.bf16.gmra.mxu3 %vm5576_vm14, %v11403_v6  ;;  %v4249_v4 = vpop.f32.mrf.mxu2  ;;  %v4328_v15 = vpop.f32.mrf.mxu1  ;;  %vm11442_vm14 = vmmov %vm11419_vm0 }
 0x523   : > { %v4250_v52 = vadd.f32 %v4249_v4, %v9656_v58  ;;  %v9807_v56 = vpop.f32.mrf.mxu0 }
 0x524   : > { %4575 = vmatmul.bf16.gmra.mxu0 %v4469_v18 }
 0x525   : > { %v4392_v49 = vpop.f32.mrf.mxu3  ;;  %v4329_v18 = vadd.f32 %v4328_v15, %v4250_v52 }
 0x526   : > { %v4393_v1 = vadd.f32 %v4392_v49, %v4314_v12 }
 0x528   : > { %v4447_v27 = vmax.f32 %v4393_v1, 0.0 }
 0x52a   : > { %v4251_v31 = vpop.f32.mrf.mxu2  ;;  %v4330_v0 = vpop.f32.mrf.mxu1 }
 0x52b   : > { %v4252_v50 = vadd.f32 %v4251_v31, %v4173_v60 }
 0x52d   : > { %v4394_v38 = vpop.f32.mrf.mxu3  ;;  %v4331_v62 = vadd.f32 %v4330_v0, %v4252_v50 }
 0x52e   : > { %v4395_v24 = vadd.f32 %v4394_v38, %v4316_v39  ;;  %v4178_v39 = vadd.f32 %v9668_v59, %v9681_v40  ;;  %v11404_v38 = vld [vmem:[#allocation2_spill] sm:$0xff] }
 0x530   : > { %v4448_v42 = vmax.f32 %v4395_v24, 0.0 }
 0x532   : > { %v4470_v21 = vpack.c.bf16 %v4448_v42, %v4447_v27  ;;  %v4254_v9 = vpop.f32.mrf.mxu2  ;;  %v4333_v23 = vpop.f32.mrf.mxu1 }
 0x534   : > { %4580 = vmatmul.bf16.gmra.mxu0 %v4470_v21  ;;  %v4255_v21 = vadd.f32 %v4254_v9, %v9671_v53  ;;  %v11408_v9 = vld [vmem:[#allocation4_spill] sm:$0xff] }
 0x535   : > { %v4397_v26 = vpop.f32.mrf.mxu3 }
 0x536   : > { %v4398_v57 = vadd.f32 %v4397_v26, %v4319_v33  ;;  %v9828_v26 = vld [vmem:[%s10057_s12] ss:$0 sm:$0xff]  ;;  %v4334_v44 = vadd.f32 %v4333_v23, %v4255_v21  ;;  %v5729_v23 = vld [vmem:[%s5855_s18 + $0x10] sm:$0xff] }
 0x538   : > { %v4449_v36 = vmax.f32 %v4398_v57, 0.0 }
 0x53a   : > { %v4256_v10 = vpop.f32.mrf.mxu2  ;;  %v4335_v6 = vpop.f32.mrf.mxu1 }
 0x53b   : > { %v4257_v59 = vadd.f32 %v4256_v10, %v4178_v39 }
 0x53d   : > { %v4399_v11 = vpop.f32.mrf.mxu3 }
 0x53e   : > { %v4400_v14 = vadd.f32 %v4399_v11, %v4321_v54  ;;  %v11406_v54 = vld [vmem:[#allocation3_spill] sm:$0xff]  ;;  %v4336_v11 = vadd.f32 %v4335_v6, %v4257_v59  ;;  %v11410_v6 = vld [vmem:[#allocation5_spill] sm:$0xff] }
 0x540   : > { %v4450_v43 = vmax.f32 %v4400_v14, 0.0 }
 0x542   : > { %v4471_v45 = vpack.c.bf16 %v4450_v43, %v4449_v36  ;;  %v4259_v46 = vpop.f32.mrf.mxu2  ;;  %v4338_v27 = vpop.f32.mrf.mxu1  ;;  %v5728_v36 = vld [vmem:[%s5855_s18 + $0x8] sm:$0xff] }
 0x544   : > { %4585 = vmatmul.bf16.gmra.mxu0 %v4471_v45 }
 0x545   : > { %v4402_v37 = vpop.f32.mrf.mxu3 }
 0x546   : > { %v4403_v22 = vadd.f32 %v4402_v37, %v4324_v19 }
 0x548   : > { %v4451_v13 = vmax.f32 %v4403_v22, 0.0 }
 0x54a   : > { %v4261_v33 = vpop.f32.mrf.mxu2  ;;  %v4340_v31 = vpop.f32.mrf.mxu1 }
 0x54d   : > { %v4404_v51 = vpop.f32.mrf.mxu3 }
 0x54e   : > { %v4405_v8 = vadd.f32 %v4404_v51, %v4326_v20  ;;  %v4183_v20 = vadd.f32 %v9686_v48, %v9696_v35 }
 0x550   : > { %v4452_v28 = vmax.f32 %v4405_v8, 0.0  ;;  %v4262_v60 = vadd.f32 %v4261_v33, %v4183_v20 }
 0x552   : > { %v4472_v55 = vpack.c.bf16 %v4452_v28, %v4451_v13  ;;  %v4264_v8 = vpop.f32.mrf.mxu2  ;;  %v4260_v28 = vadd.f32 %v4259_v46, %v9689_v32  ;;  %v4343_v52 = vpop.f32.mrf.mxu1 }
 0x554   : > { %4590 = vmatmul.bf16.gmra.mxu0 %v4472_v55  ;;  %v4339_v35 = vadd.f32 %v4338_v27, %v4260_v28  ;;  %v11417_v28 = vld [vmem:[#allocation75_spill] sm:$0xff] }
 0x555   : > { %v4407_v5 = vpop.f32.mrf.mxu3 }
 0x556   : > { %v4408_v61 = vadd.f32 %v4407_v5, %v4329_v18 }
 0x558   : > { %v4453_v2 = vmax.f32 %v4408_v61, 0.0 }
 0x55a   : > { %v4345_v27 = vpop.f32.mrf.mxu1 }
 0x55d   : > { %v4409_v49 = vpop.f32.mrf.mxu3 }
 0x55e   : > { %v4410_v29 = vadd.f32 %v4409_v49, %v4331_v62  ;;  %v4341_v62 = vadd.f32 %v4340_v31, %v4262_v60  ;;  %v5730_v49 = vld [vmem:[%s5855_s18 + $0x18] sm:$0xff]  ;;  %v11420_v60 = vld [vmem:[#allocation8_spill] sm:$0xff] }
 0x560   : > { %v4454_v3 = vmax.f32 %v4410_v29, 0.0 }
 0x561   : > { %v4556_v58 = vpop.f32.mrf.mxu0 }
 0x562   : > { %v4473_v12 = vpack.c.bf16 %v4454_v3, %v4453_v2  ;;  %v4557_v1 = vadd.f32 %v9812_v17, %v4556_v58  ;;  %v4266_v3 = vpop.f32.mrf.mxu2  ;;  %v4348_v31 = vpop.f32.mrf.mxu1 }
 0x564   : > { %v4626_v24 = vadd.f32 %v4557_v1, %v11404_v38  ;;  %4595 = vmatmul.bf16.gmra.mxu0 %v4473_v12 }
 0x565   : > { %v4412_v42 = vpop.f32.mrf.mxu3 }
 0x566   : > { %v4654_v25 = vadd.f32 %v5727_v34, %v4626_v24  ;;  %v4413_v57 = vadd.f32 %v4412_v42, %v4334_v44  ;;  %v11411_v42 = vld [vmem:[#allocation68_spill] sm:$0xff]  ;;  %v11413_v34 = vld [vmem:[#allocation6_spill] sm:$0xff] }
 0x567   : > { %v4188_v21 = vadd.f32 %v11411_v42, %v9714_v30 }
 0x568   : > { %v4686_v40 = vmul.f32 %v9821_v63, %v4654_v25  ;;  %v4455_v7 = vmax.f32 %v4413_v57, 0.0 }
 0x569   : > { %v4558_v47 = vpop.f32.mrf.mxu0 }
 0x56a   : > { %v4718_v53 = vadd.f32 %v9828_v26, %v4686_v40  ;;  %v4559_v4 = vadd.f32 %v9812_v17, %v4558_v47  ;;  %v11414_v40 = vld [vmem:[#allocation30_spill] sm:$0xff]  ;;  %v4269_v57 = vpop.f32.mrf.mxu2 }
 0x56b   : > { %v4265_v47 = vadd.f32 %v4264_v8, %v11414_v40 }
 0x56c   : > { %4746 = vst.msk [vmem:[%s9836_s22] sm:$0xff] %vm11405_vm1, %v4718_v53  ;;  %v4627_v15 = vadd.f32 %v4559_v4, %v11406_v54  ;;  %v5731_v53 = vld [vmem:[%s5855_s18 + $0x20] sm:$0xff]  ;;  %v4267_v4 = vadd.f32 %v4266_v3, %v4188_v21  ;;  %v11423_v3 = vld [vmem:[#allocation9_spill] sm:$0xff]  ;;  %vm11444_vm1 = vmmov %vm11419_vm0 }
 0x56d   : > { %v4414_v14 = vpop.f32.mrf.mxu3 }
 0x56e   : > { %v4655_v43 = vadd.f32 %v5728_v36, %v4627_v15  ;;  %v4415_v45 = vadd.f32 %v4414_v14, %v4336_v11  ;;  %v4344_v11 = vadd.f32 %v4343_v52, %v4265_v47  ;;  %v11416_v36 = vld [vmem:[#allocation7_spill] sm:$0xff] }
 0x570   : > { %v4687_v37 = vmul.f32 %v9821_v63, %v4655_v43  ;;  %v4456_v16 = vmax.f32 %v4415_v45, 0.0  ;;  %v4346_v45 = vadd.f32 %v4345_v27, %v4267_v4  ;;  %v11426_v4 = vld [vmem:[#allocation10_spill] sm:$0xff] }
 0x571   : > { %v4561_v0 = vpop.f32.mrf.mxu0 }
 0x572   : > { %v4719_v41 = vadd.f32 %v9828_v26, %v4687_v37  ;;  %v4474_v19 = vpack.c.bf16 %v4456_v16, %v4455_v7  ;;  %v4562_v22 = vadd.f32 %v9812_v17, %v4561_v0  ;;  %v5732_v37 = vld [vmem:[%s5855_s18 + $0x28] sm:$0xff] }
 0x574   : > { %4747 = vst.msk [vmem:[%s9836_s22 + $0x8] sm:$0xff] %vm11407_vm10, %v4719_v41  ;;  %v4628_v51 = vadd.f32 %v4562_v22, %v11408_v9  ;;  %4600 = vmatmul.bf16.gmra.mxu0 %v4474_v19  ;;  %vm11446_vm10 = vmmov %vm11419_vm0 }
 0x575   : > { %v4417_v13 = vpop.f32.mrf.mxu3 }
 0x576   : > { %v4656_v55 = vadd.f32 %v5729_v23, %v4628_v51  ;;  %v4418_v18 = vadd.f32 %v4417_v13, %v4339_v35  ;;  %v4271_v13 = vpop.f32.mrf.mxu2  ;;  %v11418_v23 = vld [vmem:[#allocation77_spill] sm:$0xff]  ;;  %v5733_v35 = vld [vmem:[%s5855_s18 + $0x30] sm:$0xff] }
 0x578   : > { %v4688_v5 = vmul.f32 %v9821_v63, %v4656_v55  ;;  %v4457_v46 = vmax.f32 %v4418_v18, 0.0  ;;  %v4193_v55 = vadd.f32 %v11418_v23, %v11417_v28  ;;  %v4350_v18 = vpop.f32.mrf.mxu1 }
 0x579   : > { %v4563_v10 = vpop.f32.mrf.mxu0 }
 0x57a   : > { %v4720_v48 = vadd.f32 %v9828_v26, %v4688_v5  ;;  %v4564_v50 = vadd.f32 %v9812_v17, %v4563_v10  ;;  %v11421_v10 = vld [vmem:[#allocation67_spill] sm:$0xff] }
 0x57c   : > { %4748 = vst.msk [vmem:[%s9836_s22 + $0x10] sm:$0xff] %vm11409_vm4, %v4720_v48  ;;  %v4629_v61 = vadd.f32 %v4564_v50, %v11410_v6  ;;  %v4270_v48 = vadd.f32 %v4269_v57, %v11421_v10  ;;  %v4272_v6 = vadd.f32 %v4271_v13, %v4193_v55  ;;  %vm11448_vm4 = vmmov %vm11419_vm0 }
 0x57d   : > { %v4419_v32 = vpop.f32.mrf.mxu3 }
 0x57e   : > { %v4657_v29 = vadd.f32 %v5730_v49, %v4629_v61  ;;  %v4420_v2 = vadd.f32 %v4419_v32, %v4341_v62  ;;  %v4349_v49 = vadd.f32 %v4348_v31, %v4270_v48  ;;  %v5737_v48 = vld [vmem:[%s5855_s18 + $0x50] sm:$0xff] }
 0x580   : > { %v4689_v58 = vmul.f32 %v9821_v63, %v4657_v29  ;;  %v4458_v12 = vmax.f32 %v4420_v2, 0.0 }
 0x581   : > { %v4566_v1 = vpop.f32.mrf.mxu0 }
 0x582   : > { %v4721_v39 = vadd.f32 %v9828_v26, %v4689_v58  ;;  %v4475_v38 = vpack.c.bf16 %v4458_v12, %v4457_v46  ;;  %v4567_v24 = vadd.f32 %v9812_v17, %v4566_v1  ;;  %v4351_v58 = vadd.f32 %v4350_v18, %v4272_v6  ;;  %v4274_v12 = vpop.f32.mrf.mxu2 }
 0x584   : > { %4749 = vst.msk [vmem:[%s9836_s22 + $0x18] sm:$0xff] %vm11412_vm6, %v4721_v39  ;;  %v4630_v25 = vadd.f32 %v4567_v24, %v11413_v34  ;;  %4605 = vmatmul.bf16.gmra.mxu0 %v4475_v38  ;;  %v5734_v39 = vld [vmem:[%s5855_s18 + $0x38] sm:$0xff]  ;;  %v4353_v34 = vpop.f32.mrf.mxu1  ;;  %vm11450_vm6 = vmmov %vm11419_vm0 }
 0x585   : > { %v4422_v59 = vpop.f32.mrf.mxu3 }
 0x586   : > { %v4658_v44 = vadd.f32 %v5731_v53, %v4630_v25  ;;  %v4423_v14 = vadd.f32 %v4422_v59, %v4344_v11  ;;  %v11424_v53 = vld [vmem:[#allocation71_spill] sm:$0xff]  ;;  %v5735_v11 = vld [vmem:[%s5855_s18 + $0x40] sm:$0xff] }
 0x588   : > { %v4690_v33 = vmul.f32 %v9821_v63, %v4658_v44  ;;  %v4459_v41 = vmax.f32 %v4423_v14, 0.0  ;;  %v4198_v44 = vadd.f32 %v9807_v56, %v11424_v53 }
 0x589   : > { %v4568_v54 = vpop.f32.mrf.mxu0 }
 0x58a   : > { %v4722_v15 = vadd.f32 %v9828_v26, %v4690_v33  ;;  %v4569_v30 = vadd.f32 %v9812_v17, %v4568_v54  ;;  %v11427_v54 = vld [vmem:[#allocation70_spill] sm:$0xff]  ;;  %v4276_v14 = vpop.f32.mrf.mxu2 }
 0x58c   : > { %4750 = vst.msk [vmem:[%s9836_s22 + $0x20] sm:$0xff] %vm11415_vm9, %v4722_v15  ;;  %v4631_v43 = vadd.f32 %v4569_v30, %v11416_v36  ;;  %v4275_v15 = vadd.f32 %v4274_v12, %v11427_v54  ;;  %v4277_v36 = vadd.f32 %v4276_v14, %v4198_v44  ;;  %v11435_v12 = vld [vmem:[#allocation14_spill] sm:$0xff]  ;;  %v5741_v54 = vld [vmem:[%s5855_s18 + $0x70] sm:$0xff]  ;;  %vm11452_vm9 = vmmov %vm11419_vm0 }
 0x58d   : > { %v4424_v7 = vpop.f32.mrf.mxu3 }
 0x58e   : > { %v4659_v16 = vadd.f32 %v5732_v37, %v4631_v43  ;;  %v4425_v0 = vadd.f32 %v4424_v7, %v4346_v45  ;;  %v4354_v56 = vadd.f32 %v4353_v34, %v4275_v15  ;;  %v4355_v37 = vpop.f32.mrf.mxu1  ;;  %v11437_v34 = vld [vmem:[#allocation15_spill] sm:$0xff] }
 0x590   : > { %v4691_v19 = vmul.f32 %v9821_v63, %v4659_v16  ;;  %v4460_v22 = vmax.f32 %v4425_v0, 0.0  ;;  %v11429_v0 = vld [vmem:[#allocation11_spill] sm:$0xff] }
 0x591   : > { %v4571_v20 = vpop.f32.mrf.mxu0 }
 0x592   : > { %v4723_v9 = vadd.f32 %v9828_v26, %v4691_v19  ;;  %v4476_v51 = vpack.c.bf16 %v4460_v22, %v4459_v41  ;;  %v4572_v8 = vadd.f32 %v9812_v17, %v4571_v20  ;;  %v4356_v19 = vadd.f32 %v4355_v37, %v4277_v36  ;;  %v5736_v20 = vld [vmem:[%s5855_s18 + $0x48] sm:$0xff] }
 0x594   : > { %4751 = vst.msk [vmem:[%s9836_s22 + $0x28] sm:$0xff] %vm11419_vm0, %v4723_v9  ;;  %v4632_v5 = vadd.f32 %v4572_v8, %v11420_v60  ;;  %4610 = vmatmul.bf16.gmra.mxu0 %v4476_v51 }
 0x595   : > { %v4427_v52 = vpop.f32.mrf.mxu3 }
 0x596   : > { %v4660_v50 = vadd.f32 %v5733_v35, %v4632_v5  ;;  %v4428_v2 = vadd.f32 %v4427_v52, %v4349_v49  ;;  %v11431_v52 = vld [vmem:[#allocation12_spill] sm:$0xff]  ;;  %v5738_v49 = vld [vmem:[%s5855_s18 + $0x58] sm:$0xff] }
 0x598   : > { %v4692_v61 = vmul.f32 %v9821_v63, %v4660_v50  ;;  %v4461_v27 = vmax.f32 %v4428_v2, 0.0 }
 0x599   : > { %v4573_v62 = vpop.f32.mrf.mxu0 }
 0x59a   : > { %v4724_v32 = vadd.f32 %v9828_v26, %v4692_v61  ;;  %v4574_v29 = vadd.f32 %v9812_v17, %v4573_v62  ;;  %v11433_v62 = vld [vmem:[#allocation13_spill] sm:$0xff] }
 0x59c   : > { %4752 = vst.msk [vmem:[%s9836_s22 + $0x30] sm:$0xff] %vm11422_vm11, %v4724_v32  ;;  %v4633_v46 = vadd.f32 %v4574_v29, %v11423_v3  ;;  %vm11455_vm11 = vmmov %vm11419_vm0 }
 0x59d   : > { %v4429_v1 = vpop.f32.mrf.mxu3 }
 0x59e   : > { %v4661_v38 = vadd.f32 %v5734_v39, %v4633_v46  ;;  %v4430_v24 = vadd.f32 %v4429_v1, %v4351_v58  ;;  %v5739_v39 = vld [vmem:[%s5855_s18 + $0x60] sm:$0xff] }
 0x5a0   : > { %v4693_v42 = vmul.f32 %v9821_v63, %v4661_v38  ;;  %v4462_v21 = vmax.f32 %v4430_v24, 0.0 }
 0x5a1   : > { %v4576_v25 = vpop.f32.mrf.mxu0 }
 0x5a2   : > { %v4725_v59 = vadd.f32 %v9828_v26, %v4693_v42  ;;  %v4477_v40 = vpack.c.bf16 %v4462_v21, %v4461_v27  ;;  %v4577_v47 = vadd.f32 %v9812_v17, %v4576_v25 }
 0x5a4   : > { %4753 = vst.msk [vmem:[%s9836_s22 + $0x38] sm:$0xff] %vm11425_vm3, %v4725_v59  ;;  %v4634_v33 = vadd.f32 %v4577_v47, %v11426_v4  ;;  %4615 = vmatmul.bf16.gmra.mxu0 %v4477_v40  ;;  %v5740_v59 = vld [vmem:[%s5855_s18 + $0x68] sm:$0xff]  ;;  %vm11457_vm3 = vmmov %vm11419_vm0 }
 0x5a5   : > { %v4432_v57 = vpop.f32.mrf.mxu3 }
 0x5a6   : > { %v4662_v30 = vadd.f32 %v5735_v11, %v4634_v33  ;;  %v4433_v16 = vadd.f32 %v4432_v57, %v4354_v56  ;;  %v11439_v33 = vld [vmem:[#allocation16_spill] sm:$0xff] }
 0x5a8   : > { %v4694_v43 = vmul.f32 %v9821_v63, %v4662_v30  ;;  %v4463_v8 = vmax.f32 %v4433_v16, 0.0 }
 0x5a9   : > { %v4578_v45 = vpop.f32.mrf.mxu0 }
 0x5aa   : > { %v4726_v31 = vadd.f32 %v9828_v26, %v4694_v43  ;;  %v4579_v7 = vadd.f32 %v9812_v17, %v4578_v45  ;;  %v11441_v43 = vld [vmem:[#allocation17_spill] sm:$0xff] }
 0x5ac   : > { %4754 = vst.msk [vmem:[%s9836_s22 + $0x40] sm:$0xff] %vm11428_vm2, %v4726_v31  ;;  %v4635_v41 = vadd.f32 %v4579_v7, %v11429_v0  ;;  %v5742_v31 = vld [vmem:[%s5855_s18 + $0x78] sm:$0xff]  ;;  %vm11459_vm2 = vmmov %vm11419_vm0 }
 0x5ad   : > { %v4434_v22 = vpop.f32.mrf.mxu3 }
 0x5ae   : > { %v4663_v9 = vadd.f32 %v5736_v20, %v4635_v41  ;;  %v4435_v51 = vadd.f32 %v4434_v22, %v4356_v19  ;;  %v11443_v41 = vld [vmem:[#allocation18_spill] sm:$0xff] }
 0x5af   : > { %v5743_v22 = vld [vmem:[%s5855_s18 + $0x80] sm:$0xff] }
 0x5b0   : > { %v4695_v13 = vmul.f32 %v9821_v63, %v4663_v9  ;;  %v4464_v28 = vmax.f32 %v4435_v51, 0.0 }
 0x5b1   : > { %v4581_v23 = vpop.f32.mrf.mxu0 }
 0x5b2   : > { %v4727_v55 = vadd.f32 %v9828_v26, %v4695_v13  ;;  %v4478_v60 = vpack.c.bf16 %v4464_v28, %v4463_v8  ;;  %v4582_v5 = vadd.f32 %v9812_v17, %v4581_v23  ;;  %v11445_v28 = vld [vmem:[#allocation19_spill] sm:$0xff] }
 0x5b4   : > { %4755 = vst.msk [vmem:[%s9836_s22 + $0x48] sm:$0xff] %vm11430_vm5, %v4727_v55  ;;  %v4636_v10 = vadd.f32 %v4582_v5, %v11431_v52  ;;  %4620 = vmatmul.bf16.gmra.mxu0 %v4478_v60  ;;  %v5744_v55 = vld [vmem:[%s5855_s18 + $0x88] sm:$0xff]  ;;  %vm11461_vm5 = vmmov %vm11419_vm0 }
 0x5b6   : > { %v4664_v35 = vadd.f32 %v5737_v48, %v4636_v10 }
 0x5b8   : > { %v4696_v50 = vmul.f32 %v9821_v63, %v4664_v35  ;;  %v11447_v35 = vld [vmem:[#allocation20_spill] sm:$0xff] }
 0x5b9   : > { %v4583_v18 = vpop.f32.mrf.mxu0 }
 0x5ba   : > { %v4728_v6 = vadd.f32 %v9828_v26, %v4696_v50  ;;  %v4584_v61 = vadd.f32 %v9812_v17, %v4583_v18  ;;  %v5745_v18 = vld [vmem:[%s5855_s18 + $0x90] sm:$0xff] }
 0x5bc   : > { %4756 = vst.msk [vmem:[%s9836_s22 + $0x50] sm:$0xff] %vm11432_vm12, %v4728_v6  ;;  %v4637_v32 = vadd.f32 %v4584_v61, %v11433_v62  ;;  %vm11463_vm12 = vmmov %vm11419_vm0 }
 0x5be   : > { %v4665_v29 = vadd.f32 %v5738_v49, %v4637_v32 }
 0x5c0   : > { %v4697_v2 = vmul.f32 %v9821_v63, %v4665_v29  ;;  %v11449_v29 = vld [vmem:[#allocation21_spill] sm:$0xff] }
 0x5c1   : > { %v4586_v3 = vpop.f32.mrf.mxu0 }
 0x5c2   : > { %v4729_v46 = vadd.f32 %v9828_v26, %v4697_v2  ;;  %v4587_v58 = vadd.f32 %v9812_v17, %v4586_v3  ;;  %v5746_v3 = vld [vmem:[%s5855_s18 + $0x98] sm:$0xff] }
 0x5c4   : > { %4757 = vst.msk [vmem:[%s9836_s22 + $0x58] sm:$0xff] %vm11434_vm13, %v4729_v46  ;;  %v4638_v1 = vadd.f32 %v4587_v58, %v11435_v12  ;;  %vm11465_vm13 = vmmov %vm11419_vm0 }
 0x5c6   : > { %v4666_v38 = vadd.f32 %v5739_v39, %v4638_v1 }
 0x5c8   : > { %v4698_v24 = vmul.f32 %v9821_v63, %v4666_v38  ;;  %v11451_v38 = vld [vmem:[#allocation23_spill] sm:$0xff] }
 0x5c9   : > { %v4588_v27 = vpop.f32.mrf.mxu0 }
 0x5ca   : > { %v4730_v42 = vadd.f32 %v9828_v26, %v4698_v24  ;;  %v4589_v21 = vadd.f32 %v9812_v17, %v4588_v27  ;;  %v5747_v27 = vld [vmem:[%s5855_s18 + $0xa0] sm:$0xff] }
 0x5cc   : > { %4758 = vst.msk [vmem:[%s9836_s22 + $0x60] sm:$0xff] %vm11436_vm15, %v4730_v42  ;;  %v4639_v25 = vadd.f32 %v4589_v21, %v11437_v34 }
 0x5ce   : > { %v4667_v40 = vadd.f32 %v5740_v59, %v4639_v25 }
 0x5d0   : > { %v4699_v47 = vmul.f32 %v9821_v63, %v4667_v40  ;;  %v11453_v40 = vld [vmem:[#allocation24_spill] sm:$0xff] }
 0x5d1   : > { %v4591_v53 = vpop.f32.mrf.mxu0 }
 0x5d2   : > { %v4731_v44 = vadd.f32 %v9828_v26, %v4699_v47  ;;  %v4592_v4 = vadd.f32 %v9812_v17, %v4591_v53  ;;  %v5748_v53 = vld [vmem:[%s5855_s18 + $0xa8] sm:$0xff] }
 0x5d4   : > { %4759 = vst.msk [vmem:[%s9836_s22 + $0x68] sm:$0xff] %vm11438_vm8, %v4731_v44  ;;  %v4640_v57 = vadd.f32 %v4592_v4, %v11439_v33 }
 0x5d6   : > { %v4668_v15 = vadd.f32 %v5741_v54, %v4640_v57 }
 0x5d8   : > { %v4700_v11 = vmul.f32 %v9821_v63, %v4668_v15  ;;  %v11454_v15 = vld [vmem:[#allocation26_spill] sm:$0xff] }
 0x5d9   : > { %v4593_v30 = vpop.f32.mrf.mxu0 }
 0x5da   : > { %v4732_v14 = vadd.f32 %v9828_v26, %v4700_v11  ;;  %v4594_v36 = vadd.f32 %v9812_v17, %v4593_v30  ;;  %v5749_v30 = vld [vmem:[%s5855_s18 + $0xb0] sm:$0xff] }
 0x5dc   : > { %4760 = vst.msk [vmem:[%s9836_s22 + $0x70] sm:$0xff] %vm11440_vm7, %v4732_v14  ;;  %v4641_v45 = vadd.f32 %v4594_v36, %v11441_v43 }
 0x5de   : > { %v4669_v56 = vadd.f32 %v5742_v31, %v4641_v45 }
 0x5e0   : > { %v4701_v7 = vmul.f32 %v9821_v63, %v4669_v56  ;;  %v11456_v56 = vld [vmem:[#allocation27_spill] sm:$0xff] }
 0x5e1   : > { %v4596_v37 = vpop.f32.mrf.mxu0 }
 0x5e2   : > { %v4733_v16 = vadd.f32 %v9828_v26, %v4701_v7  ;;  %v4597_v0 = vadd.f32 %v9812_v17, %v4596_v37  ;;  %v5750_v37 = vld [vmem:[%s5855_s18 + $0xb8] sm:$0xff] }
 0x5e4   : > { %4761 = vst.msk [vmem:[%s9836_s22 + $0x78] sm:$0xff] %vm11442_vm14, %v4733_v16  ;;  %v4642_v19 = vadd.f32 %v4597_v0, %v11443_v41 }
 0x5e6   : > { %v4670_v20 = vadd.f32 %v5743_v22, %v4642_v19 }
 0x5e8   : > { %v4702_v9 = vmul.f32 %v9821_v63, %v4670_v20  ;;  %v11458_v20 = vld [vmem:[#allocation28_spill] sm:$0xff] }
 0x5e9   : > { %v4598_v51 = vpop.f32.mrf.mxu0 }
 0x5ea   : > { %v4734_v8 = vadd.f32 %v9828_v26, %v4702_v9  ;;  %v4599_v13 = vadd.f32 %v9812_v17, %v4598_v51  ;;  %v5751_v51 = vld [vmem:[%s5855_s18 + $0xc0] sm:$0xff] }
 0x5ec   : > { %4762 = vst.msk [vmem:[%s9836_s22 + $0x80] sm:$0xff] %vm11444_vm1, %v4734_v8  ;;  %v4643_v23 = vadd.f32 %v4599_v13, %v11445_v28 }
 0x5ee   : > { %v4671_v60 = vadd.f32 %v5744_v55, %v4643_v23 }
 0x5f0   : > { %v4703_v5 = vmul.f32 %v9821_v63, %v4671_v60  ;;  %v11460_v60 = vld [vmem:[#allocation29_spill] sm:$0xff] }
 0x5f1   : > { %v4601_v52 = vpop.f32.mrf.mxu0 }
 0x5f2   : > { %v4735_v10 = vadd.f32 %v9828_v26, %v4703_v5  ;;  %v4602_v48 = vadd.f32 %v9812_v17, %v4601_v52  ;;  %v5752_v52 = vld [vmem:[%s5855_s18 + $0xc8] sm:$0xff] }
 0x5f4   : > { %4763 = vst.msk [vmem:[%s9836_s22 + $0x88] sm:$0xff] %vm11446_vm10, %v4735_v10  ;;  %v4644_v50 = vadd.f32 %v4602_v48, %v11447_v35 }
 0x5f6   : > { %v4672_v6 = vadd.f32 %v5745_v18, %v4644_v50 }
 0x5f8   : > { %v4704_v61 = vmul.f32 %v9821_v63, %v4672_v6  ;;  %v11462_v6 = vld [vmem:[#allocation31_spill] sm:$0xff] }
 0x5f9   : > { %v4603_v62 = vpop.f32.mrf.mxu0 }
 0x5fa   : > { %v4736_v32 = vadd.f32 %v9828_v26, %v4704_v61  ;;  %v4604_v49 = vadd.f32 %v9812_v17, %v4603_v62  ;;  %v5753_v62 = vld [vmem:[%s5855_s18 + $0xd0] sm:$0xff] }
 0x5fc   : > { %4764 = vst.msk [vmem:[%s9836_s22 + $0x90] sm:$0xff] %vm11448_vm4, %v4736_v32  ;;  %v4645_v2 = vadd.f32 %v4604_v49, %v11449_v29 }
 0x5fe   : > { %v4673_v46 = vadd.f32 %v5746_v3, %v4645_v2 }
 0x600   : > { %v4705_v58 = vmul.f32 %v9821_v63, %v4673_v46  ;;  %v11464_v46 = vld [vmem:[#allocation32_spill] sm:$0xff] }
 0x601   : > { %v4606_v12 = vpop.f32.mrf.mxu0 }
 0x602   : > { %v4737_v1 = vadd.f32 %v9828_v26, %v4705_v58  ;;  %v4607_v39 = vadd.f32 %v9812_v17, %v4606_v12  ;;  %v5754_v12 = vld [vmem:[%s5855_s18 + $0xd8] sm:$0xff] }
 0x604   : > { %4765 = vst.msk [vmem:[%s9836_s22 + $0x98] sm:$0xff] %vm11450_vm6, %v4737_v1  ;;  %v4646_v24 = vadd.f32 %v4607_v39, %v11451_v38 }
 0x606   : > { %v4674_v42 = vadd.f32 %v5747_v27, %v4646_v24 }
 0x608   : > { %v4706_v21 = vmul.f32 %v9821_v63, %v4674_v42 }
 0x609   : > { %v4608_v34 = vpop.f32.mrf.mxu0 }
 0x60a   : > { %v4738_v25 = vadd.f32 %v9828_v26, %v4706_v21  ;;  %v4609_v59 = vadd.f32 %v9812_v17, %v4608_v34 }
 0x60c   : > { %4766 = vst.msk [vmem:[%s9836_s22 + $0xa0] sm:$0xff] %vm11452_vm9, %v4738_v25  ;;  %v4647_v47 = vadd.f32 %v4609_v59, %v11453_v40 }
 0x60e   : > { %v4675_v44 = vadd.f32 %v5748_v53, %v4647_v47 }
 0x610   : > { %v4707_v4 = vmul.f32 %v9821_v63, %v4675_v44 }
 0x611   : > { %v4611_v33 = vpop.f32.mrf.mxu0 }
 0x612   : > { %v4739_v57 = vadd.f32 %v9828_v26, %v4707_v4  ;;  %v4612_v54 = vadd.f32 %v9812_v17, %v4611_v33 }
 0x614   : > { %4767 = vst.msk [vmem:[%s9836_s22 + $0xa8] sm:$0xff] %vm11419_vm0, %v4739_v57  ;;  %v4648_v11 = vadd.f32 %v4612_v54, %v11454_v15 }
 0x616   : > { %v4676_v14 = vadd.f32 %v5749_v30, %v4648_v11 }
 0x618   : > { %v4708_v36 = vmul.f32 %v9821_v63, %v4676_v14 }
 0x619   : > { %v4613_v43 = vpop.f32.mrf.mxu0 }
 0x61a   : > { %v4740_v45 = vadd.f32 %v9828_v26, %v4708_v36  ;;  %v4614_v31 = vadd.f32 %v9812_v17, %v4613_v43 }
 0x61c   : > { %4768 = vst.msk [vmem:[%s9836_s22 + $0xb0] sm:$0xff] %vm11455_vm11, %v4740_v45  ;;  %v4649_v7 = vadd.f32 %v4614_v31, %v11456_v56 }
 0x61e   : > { %v4677_v16 = vadd.f32 %v5750_v37, %v4649_v7 }
 0x620   : > { %v4709_v0 = vmul.f32 %v9821_v63, %v4677_v16 }
 0x621   : > { %v4616_v41 = vpop.f32.mrf.mxu0 }
 0x622   : > { %v4741_v19 = vadd.f32 %v9828_v26, %v4709_v0  ;;  %v4617_v22 = vadd.f32 %v9812_v17, %v4616_v41 }
 0x624   : > { %4769 = vst.msk [vmem:[%s9836_s22 + $0xb8] sm:$0xff] %vm11457_vm3, %v4741_v19  ;;  %v4650_v9 = vadd.f32 %v4617_v22, %v11458_v20 }
 0x626   : > { %v4678_v8 = vadd.f32 %v5751_v51, %v4650_v9 }
 0x628   : > { %v4710_v13 = vmul.f32 %v9821_v63, %v4678_v8 }
 0x629   : > { %v4618_v28 = vpop.f32.mrf.mxu0 }
 0x62a   : > { %v4742_v23 = vadd.f32 %v9828_v26, %v4710_v13  ;;  %v4619_v55 = vadd.f32 %v9812_v17, %v4618_v28 }
 0x62c   : > { %4770 = vst.msk [vmem:[%s9836_s22 + $0xc0] sm:$0xff] %vm11459_vm2, %v4742_v23  ;;  %v4651_v5 = vadd.f32 %v4619_v55, %v11460_v60 }
 0x62e   : > { %v4679_v10 = vadd.f32 %v5752_v52, %v4651_v5 }
 0x630   : > { %v4711_v48 = vmul.f32 %v9821_v63, %v4679_v10 }
 0x631   : > { %v4621_v35 = vpop.f32.mrf.mxu0 }
 0x632   : > { %v4743_v50 = vadd.f32 %v9828_v26, %v4711_v48  ;;  %v4622_v18 = vadd.f32 %v9812_v17, %v4621_v35 }
 0x634   : > { %4771 = vst.msk [vmem:[%s9836_s22 + $0xc8] sm:$0xff] %vm11461_vm5, %v4743_v50  ;;  %v4652_v61 = vadd.f32 %v4622_v18, %v11462_v6 }
 0x636   : > { %v4680_v32 = vadd.f32 %v5753_v62, %v4652_v61 }
 0x638   : > { %v4712_v49 = vmul.f32 %v9821_v63, %v4680_v32 }
 0x639   : > { %v4623_v29 = vpop.f32.mrf.mxu0 }
 0x63a   : > { %v4744_v2 = vadd.f32 %v9828_v26, %v4712_v49  ;;  %v4624_v3 = vadd.f32 %v9812_v17, %v4623_v29 }
 0x63c   : > { %4772 = vst.msk [vmem:[%s9836_s22 + $0xd0] sm:$0xff] %vm11463_vm12, %v4744_v2  ;;  %v4653_v58 = vadd.f32 %v4624_v3, %v11464_v46 }
 0x63e   : > { %v4681_v1 = vadd.f32 %v5754_v12, %v4653_v58 }
 0x640   : > { %v4713_v39 = vmul.f32 %v9821_v63, %v4681_v1 }
 0x642   : > { %v4745_v38 = vadd.f32 %v9828_v26, %v4713_v39 }
 0x644   : > { %4773 = vst.msk [vmem:[%s9836_s22 + $0xd8] sm:$0xff] %vm11465_vm13, %v4745_v38 }
 0x645 PF: > { %s23_s25 = sadd.s32 1, %s5761_s25  }
 0x646   : > { %p20_p4 = scmp.ge.s32.totalorder %s23_s25, 4  }
 0x648   :  { %22 = sbr.rel (!%p20_p4) target bundleno = 1 (0x1), region = 102 }

</bundles_post_ra>
